<compile_context>
chip_gen: v6e
topology: v6e:2x2x1
jax: 0.10.0
libtpu: 0.0.40
codegen_flags: <defaults>
</compile_context>

<pallas_src>
import functools

import jax
import jax.numpy as jnp
from jax.experimental import pallas as pl
from jax.experimental.pallas import tpu as pltpu


def _silu(x, approx):
    if approx:
        # exp -> EUP, approximate reciprocal -> EUP; frees the VALU divide.
        return x * pl.reciprocal(1.0 + jnp.exp(-x), approx=True)
    return x * (1.0 / (1.0 + jnp.exp(-x)))


def _round_up(v, m):
    return ((v + m - 1) // m) * m


# ------------------------------ fused kernel ------------------------------- #

def cspnext_fused_kernel(
    x_ref,      # (1, H+6, W+6, Cin)   zero-padded input image (resident per image)
    w1_ref,     # (9, Cin, C)          3x3 weights (BN scale folded), per-tap matrices
    b1_ref,     # (1, C)
    wdw_ref,    # (25, 1, C)           depthwise 5x5 taps (BN scale folded)
    bd_ref,     # (1, C)
    wpw_ref,    # (C, C)               pointwise weights (BN scale folded)
    bp_ref,     # (1, C)
    o_ref,      # (1, TH, W, C)        output row-tile
    s1pad_ref,  # VMEM (TH+4, W+4, C)  stage-1 output with 5x5 halo
    *, TH, W, Cin, C, add, approx_silu,
):
    f32 = jnp.float32
    t = pl.program_id(1)
    r0 = pl.multiple_of(t * TH, TH)          # first output row of this tile

    # ---- stage 1: 3x3 conv as 9 accumulating matmuls (recompute halo of 2 rows) ----
    # stage-1 rows computed: global [r0-2, r0+TH+2); padded-input row = global + 3.
    M1 = (TH + 4) * W
    acc1 = jnp.zeros((M1, C), f32)
    for kh in range(3):
        for kw in range(3):
            slab = x_ref[0, pl.ds(r0 + kh, TH + 4), pl.ds(kw + 2, W), :]
            a = slab.reshape(M1, Cin).astype(w1_ref.dtype)
            acc1 = acc1 + jnp.dot(a, w1_ref[kh * 3 + kw],
                                  preferred_element_type=f32)
    y1 = _silu(acc1 + b1_ref[...], approx_silu)

    # Write the tile interior once; zero only the thin halo borders.
    s1pad_ref[:, 2:2 + W, :] = y1.reshape(TH + 4, W, C)
    zcol = jnp.zeros((TH + 4, 2, C), f32)
    s1pad_ref[:, 0:2, :] = zcol
    s1pad_ref[:, W + 2:W + 4, :] = zcol

    @pl.when(t == 0)                          # rows above the image are zero padding
    def _():
        s1pad_ref[0:2, :, :] = jnp.zeros((2, W + 4, C), f32)

    @pl.when(t == pl.num_programs(1) - 1)     # rows below the image are zero padding
    def _():
        s1pad_ref[TH + 2:TH + 4, :, :] = jnp.zeros((2, W + 4, C), f32)

    # ---- stage 2: depthwise 5x5 + BN bias + SiLU (accumulate in vregs) -------------
    acc2 = jnp.zeros((TH, W, C), f32)
    for kh in range(5):
        for kw in range(5):
            acc2 = acc2 + s1pad_ref[kh:kh + TH, kw:kw + W, :] * wdw_ref[kh * 5 + kw]
    y2 = _silu(acc2 + bd_ref[...], approx_silu)

    # ---- stage 3: pointwise 1x1 + BN bias + SiLU (+ residual) ----------------------
    a2 = y2.reshape(TH * W, C).astype(wpw_ref.dtype)
    y3 = jnp.dot(a2, wpw_ref[...], preferred_element_type=f32)
    y3 = _silu(y3 + bp_ref[...], approx_silu)
    if add:
        res = x_ref[0, pl.ds(r0 + 3, TH), pl.ds(3, W), :]
        y3 = y3 + res.reshape(TH * W, Cin).astype(f32)
    o_ref[0] = y3.reshape(TH, W, C).astype(o_ref.dtype)


# --------------------------------- wrapper --------------------------------- #

def cspnext_block(x_nhwc, params, *, add=True, mxu_dtype=jnp.bfloat16,
                  approx_silu=True, tile_h=None, out_dtype=jnp.float32):
    """Fused CSPNeXtBlock forward.  x_nhwc: (N, H, W, Cin) f32 -> (N, H, W, Cout)."""
    N, H, W, Cin = x_nhwc.shape
    conv1_w = params["conv1_w"]                       # (3, 3, Cin, Cout) HWIO
    Cout = conv1_w.shape[-1]
    if add:
        assert Cin == Cout, "residual requires in_channels == out_channels"

    # Row-tile size for the H grid axis.
    if tile_h is None:
        tile_h = H
        for cand in (32, 24, 16, 8):
            if H > cand and H % cand == 0:
                tile_h = cand
                break
    assert H % tile_h == 0 and (tile_h == H or tile_h % 8 == 0), (H, tile_h)
    n_h = H // tile_h

    # Lane-dense channels: round up to a multiple of 128 (no-op when already >= 128k).
    Cin_p = _round_up(Cin, 128)
    C = _round_up(Cout, 128)
    if add:
        assert Cin_p == C

    f32 = jnp.float32
    s1 = params["conv1_scale"].astype(f32)
    sd = params["dw_scale"].astype(f32)
    sp = params["pw_scale"].astype(f32)

    # Fold BN scales into the conv weights (one-time constant folding), pad channels.
    w1 = conv1_w.astype(f32) * s1                                  # (3,3,Cin,Cout)
    w1 = jnp.pad(w1, ((0, 0), (0, 0), (0, Cin_p - Cin), (0, C - Cout)))
    w1 = w1.reshape(9, Cin_p, C)
    wdw = params["dw_w"].astype(f32) * sd                          # (5,5,Cout)
    wdw = jnp.pad(wdw, ((0, 0), (0, 0), (0, C - Cout))).reshape(25, 1, C)
    wpw = params["pw_w"].astype(f32) * sp                          # (Cout,Cout)
    wpw = jnp.pad(wpw, ((0, C - Cout), (0, C - Cout)))
    if mxu_dtype is not None:
        w1 = w1.astype(mxu_dtype)
        wpw = wpw.astype(mxu_dtype)

    def pad_bias(b):
        return jnp.pad(b.astype(f32), ((0, C - Cout),)).reshape(1, C)

    b1 = pad_bias(params["conv1_bias"])
    bd = pad_bias(params["dw_bias"])
    bp = pad_bias(params["pw_bias"])

    # Zero-pad the input once (3 = 1 halo for the 3x3 + 2 for the 5x5) and pad channels.
    x_pad = jnp.pad(x_nhwc, ((0, 0), (3, 3), (3, 3), (0, Cin_p - Cin)))
    Hp, Wp = H + 6, W + 6

    kernel = functools.partial(
        cspnext_fused_kernel,
        TH=tile_h, W=W, Cin=Cin_p, C=C, add=add, approx_silu=approx_silu,
    )

    out = pl.pallas_call(
        kernel,
        out_shape=jax.ShapeDtypeStruct((N, H, W, C), out_dtype),
        grid=(N, n_h),
        in_specs=[
            pl.BlockSpec((1, Hp, Wp, Cin_p), lambda n, t: (n, 0, 0, 0)),  # padded input
            pl.BlockSpec((9, Cin_p, C), lambda n, t: (0, 0, 0)),          # 3x3 weights
            pl.BlockSpec((1, C), lambda n, t: (0, 0)),                    # bias 1
            pl.BlockSpec((25, 1, C), lambda n, t: (0, 0, 0)),             # dw weights
            pl.BlockSpec((1, C), lambda n, t: (0, 0)),                    # bias dw
            pl.BlockSpec((C, C), lambda n, t: (0, 0)),                    # pw weights
            pl.BlockSpec((1, C), lambda n, t: (0, 0)),                    # bias pw
        ],
        out_specs=pl.BlockSpec((1, tile_h, W, C), lambda n, t: (n, t, 0, 0)),
        scratch_shapes=[pltpu.VMEM((tile_h + 4, W + 4, C), jnp.float32)],
        compiler_params=pltpu.CompilerParams(
            dimension_semantics=("parallel", "parallel"),   # megacore / 2 TCs on v7x
            vmem_limit_bytes=48 * 1024 * 1024,              # safe on v5e/v6e/v7x
        ),
    )(x_pad, w1, b1, wdw, bd, wpw, bp)

    return out[..., :Cout]


# ------------------------- plain-JAX reference path ------------------------ #

def ref_forward(x_nhwc, params, *, add=True):
    dn = ("NHWC", "HWIO", "NHWC")
    C = params["conv1_w"].shape[-1]
    prec = jax.lax.Precision.HIGHEST

    def bn_silu(y, scale, bias):
        y = y * scale + bias
        return y * jax.nn.sigmoid(y)

    y = jax.lax.conv_general_dilated(
        x_nhwc, params["conv1_w"], (1, 1), ((1, 1), (1, 1)),
        dimension_numbers=dn, precision=prec)
    y = bn_silu(y, params["conv1_scale"], params["conv1_bias"])

    y2 = jax.lax.conv_general_dilated(
        y, params["dw_w"].reshape(5, 5, 1, C), (1, 1), ((2, 2), (2, 2)),
        dimension_numbers=dn, feature_group_count=C, precision=prec)
    y2 = bn_silu(y2, params["dw_scale"], params["dw_bias"])

    y3 = jax.lax.conv_general_dilated(
        y2, params["pw_w"].reshape(1, 1, C, C), (1, 1), ((0, 0), (0, 0)),
        dimension_numbers=dn, precision=prec)
    y3 = bn_silu(y3, params["pw_scale"], params["pw_bias"])

    if add:
        y3 = y3 + x_nhwc
    return y3


# ------------------------------ param helpers ------------------------------ #

def fold_bn(gamma, beta, mean, var, eps=1e-5):
    scale = gamma / jnp.sqrt(var + eps)
    bias = beta - mean * scale
    return scale, bias


def init_params(key, cin, cout):
    ks = jax.random.split(key, 10)
    conv1_w = 0.1 * jax.random.normal(ks[0], (3, 3, cin, cout), jnp.float32)   # HWIO
    dw_w = 0.1 * jax.random.normal(ks[1], (5, 5, cout), jnp.float32)           # per-channel
    pw_w = 0.1 * jax.random.normal(ks[2], (cout, cout), jnp.float32)           # (Cin, Cout)

    def bn_params(k):
        k1, k2, k3, k4 = jax.random.split(k, 4)
        gamma = 1.0 + 0.1 * jax.random.normal(k1, (cout,), jnp.float32)
        beta = 0.1 * jax.random.normal(k2, (cout,), jnp.float32)
        mean = 0.1 * jax.random.normal(k3, (cout,), jnp.float32)
        var = 1.0 + 0.1 * jnp.abs(jax.random.normal(k4, (cout,), jnp.float32))
        return fold_bn(gamma, beta, mean, var)

    s1, b1 = bn_params(ks[3])
    sd, bd = bn_params(ks[4])
    sp, bp = bn_params(ks[5])
    return {
        "conv1_w": conv1_w, "conv1_scale": s1, "conv1_bias": b1,
        "dw_w": dw_w, "dw_scale": sd, "dw_bias": bd,
        "pw_w": pw_w, "pw_scale": sp, "pw_bias": bp,
    }


if __name__ == "__main__":
    key = jax.random.PRNGKey(0)
    kx, kp = jax.random.split(key)

    N, C, H, W = 2, 8, 16, 16          # in_channels == out_channels, add=True
    x_nchw = jax.random.normal(kx, (N, C, H, W), jnp.float32)   # PyTorch layout
    x_nhwc = jnp.transpose(x_nchw, (0, 2, 3, 1))                # kernel layout

    params = init_params(kp, C, C)
    ref = ref_forward(x_nhwc, params, add=True)

    # 1) accuracy configuration: f32 MXU operands + exact SiLU -> tight check.
    out = cspnext_block(x_nhwc, params, add=True, mxu_dtype=None,
                        approx_silu=False, tile_h=8)
    out = jax.block_until_ready(out)
    assert out.shape == (N, H, W, C)
    err = float(jnp.max(jnp.abs(out - ref)))
    assert err < 1e-2, f"f32 path mismatch vs JAX reference (max abs err {err})"

    # 2) deployment configuration: bf16 MXU operands + EUP-approx SiLU.
    out_fast = cspnext_block(x_nhwc, params, add=True, mxu_dtype=jnp.bfloat16,
                             approx_silu=True, tile_h=8)
    out_fast = jax.block_until_ready(out_fast)
    err_fast = float(jnp.max(jnp.abs(out_fast - ref)))
    assert err_fast < 6e-2, f"bf16 path mismatch vs JAX reference (max abs err {err_fast})"

    print("KERNEL_OK")
</pallas_src>

<mosaic_0001>
module attributes {stable_mosaic.version = 11 : i64} {
  func.func @cspnext_fused_kernel(%arg0: i32, %arg1: i32, %arg2: memref<1x22x22x128xf32, #tpu.memory_space<vmem>>, %arg3: memref<9x128x128xf32, #tpu.memory_space<vmem>>, %arg4: memref<1x128xf32, #tpu.memory_space<vmem>>, %arg5: memref<25x1x128xf32, #tpu.memory_space<vmem>>, %arg6: memref<1x128xf32, #tpu.memory_space<vmem>>, %arg7: memref<128x128xf32, #tpu.memory_space<vmem>>, %arg8: memref<1x128xf32, #tpu.memory_space<vmem>>, %arg9: memref<1x8x16x128xf32, #tpu.memory_space<vmem>>, %arg10: memref<12x20x128xf32, #tpu.memory_space<vmem>>) attributes {dimension_semantics = [#tpu.dimension_semantics<parallel>, #tpu.dimension_semantics<parallel>], iteration_bounds = array<i64: 2, 2>, scalar_prefetch = 0 : i64, scratch_operands = 1 : i64, tpu.core_type = #tpu.core_type<tc>, window_params = [{transform_indices = @transform_0, window_bounds = array<i64: 1, 22, 22, 128>}, {pipeline_mode = #tpu.pipeline_mode<synchronous>, transform_indices = @transform_1, window_bounds = array<i64: 9, 128, 128>}, {pipeline_mode = #tpu.pipeline_mode<synchronous>, transform_indices = @transform_2, window_bounds = array<i64: 1, 128>}, {pipeline_mode = #tpu.pipeline_mode<synchronous>, transform_indices = @transform_3, window_bounds = array<i64: 25, 1, 128>}, {pipeline_mode = #tpu.pipeline_mode<synchronous>, transform_indices = @transform_4, window_bounds = array<i64: 1, 128>}, {pipeline_mode = #tpu.pipeline_mode<synchronous>, transform_indices = @transform_5, window_bounds = array<i64: 128, 128>}, {pipeline_mode = #tpu.pipeline_mode<synchronous>, transform_indices = @transform_6, window_bounds = array<i64: 1, 128>}, {transform_indices = @transform_7, window_bounds = array<i64: 1, 8, 16, 128>}]} {
    %c8_i32 = arith.constant 8 : i32
    %0 = arith.muli %arg1, %c8_i32 : i32
    %1 = tpu.assume_multiple %0, 8 : i32
    %cst = arith.constant 0.000000e+00 : f32
    %2 = vector.broadcast %cst : f32 to vector<192x128xf32>
    %c0_i32 = arith.constant 0 : i32
    %3 = arith.addi %1, %c0_i32 : i32
    %c0 = arith.constant 0 : index
    %4 = arith.index_cast %3 : i32 to index
    %c2 = arith.constant 2 : index
    %c0_0 = arith.constant 0 : index
    %5 = vector.load %arg2[%c0, %4, %c2, %c0_0] : memref<1x22x22x128xf32, #tpu.memory_space<vmem>>, vector<1x12x16x128xf32>
    %6 = vector.shape_cast %5 : vector<1x12x16x128xf32> to vector<12x16x128xf32>
    %7 = vector.shape_cast %6 : vector<12x16x128xf32> to vector<192x128xf32>
    %c0_1 = arith.constant 0 : index
    %c0_2 = arith.constant 0 : index
    %c0_3 = arith.constant 0 : index
    %8 = vector.load %arg3[%c0_1, %c0_2, %c0_3] : memref<9x128x128xf32, #tpu.memory_space<vmem>>, vector<1x128x128xf32>
    %9 = vector.shape_cast %8 : vector<1x128x128xf32> to vector<128x128xf32>
    %cst_4 = arith.constant dense<0.000000e+00> : vector<192x128xf32>
    %10 = tpu.matmul %7, %9, %cst_4 {dimension_numbers = #tpu.dot_dimension_numbers<[1], [0], [0], [1], [0, 0, 1, 1], [], []>} : vector<192x128xf32>, vector<128x128xf32>, vector<192x128xf32> -> vector<192x128xf32>
    %11 = arith.addf %2, %10 : vector<192x128xf32>
    %c0_i32_5 = arith.constant 0 : i32
    %12 = arith.addi %1, %c0_i32_5 : i32
    %c0_6 = arith.constant 0 : index
    %13 = arith.index_cast %12 : i32 to index
    %c3 = arith.constant 3 : index
    %c0_7 = arith.constant 0 : index
    %14 = vector.load %arg2[%c0_6, %13, %c3, %c0_7] : memref<1x22x22x128xf32, #tpu.memory_space<vmem>>, vector<1x12x16x128xf32>
    %15 = vector.shape_cast %14 : vector<1x12x16x128xf32> to vector<12x16x128xf32>
    %16 = vector.shape_cast %15 : vector<12x16x128xf32> to vector<192x128xf32>
    %c1 = arith.constant 1 : index
    %c0_8 = arith.constant 0 : index
    %c0_9 = arith.constant 0 : index
    %17 = vector.load %arg3[%c1, %c0_8, %c0_9] : memref<9x128x128xf32, #tpu.memory_space<vmem>>, vector<1x128x128xf32>
    %18 = vector.shape_cast %17 : vector<1x128x128xf32> to vector<128x128xf32>
    %cst_10 = arith.constant dense<0.000000e+00> : vector<192x128xf32>
    %19 = tpu.matmul %16, %18, %cst_10 {dimension_numbers = #tpu.dot_dimension_numbers<[1], [0], [0], [1], [0, 0, 1, 1], [], []>} : vector<192x128xf32>, vector<128x128xf32>, vector<192x128xf32> -> vector<192x128xf32>
    %20 = arith.addf %11, %19 : vector<192x128xf32>
    %c0_i32_11 = arith.constant 0 : i32
    %21 = arith.addi %1, %c0_i32_11 : i32
    %c0_12 = arith.constant 0 : index
    %22 = arith.index_cast %21 : i32 to index
    %c4 = arith.constant 4 : index
    %c0_13 = arith.constant 0 : index
    %23 = vector.load %arg2[%c0_12, %22, %c4, %c0_13] : memref<1x22x22x128xf32, #tpu.memory_space<vmem>>, vector<1x12x16x128xf32>
    %24 = vector.shape_cast %23 : vector<1x12x16x128xf32> to vector<12x16x128xf32>
    %25 = vector.shape_cast %24 : vector<12x16x128xf32> to vector<192x128xf32>
    %c2_14 = arith.constant 2 : index
    %c0_15 = arith.constant 0 : index
    %c0_16 = arith.constant 0 : index
    %26 = vector.load %arg3[%c2_14, %c0_15, %c0_16] : memref<9x128x128xf32, #tpu.memory_space<vmem>>, vector<1x128x128xf32>
    %27 = vector.shape_cast %26 : vector<1x128x128xf32> to vector<128x128xf32>
    %cst_17 = arith.constant dense<0.000000e+00> : vector<192x128xf32>
    %28 = tpu.matmul %25, %27, %cst_17 {dimension_numbers = #tpu.dot_dimension_numbers<[1], [0], [0], [1], [0, 0, 1, 1], [], []>} : vector<192x128xf32>, vector<128x128xf32>, vector<192x128xf32> -> vector<192x128xf32>
    %29 = arith.addf %20, %28 : vector<192x128xf32>
    %c1_i32 = arith.constant 1 : i32
    %30 = arith.addi %1, %c1_i32 : i32
    %c0_18 = arith.constant 0 : index
    %31 = arith.index_cast %30 : i32 to index
    %c2_19 = arith.constant 2 : index
    %c0_20 = arith.constant 0 : index
    %32 = vector.load %arg2[%c0_18, %31, %c2_19, %c0_20] : memref<1x22x22x128xf32, #tpu.memory_space<vmem>>, vector<1x12x16x128xf32>
    %33 = vector.shape_cast %32 : vector<1x12x16x128xf32> to vector<12x16x128xf32>
    %34 = vector.shape_cast %33 : vector<12x16x128xf32> to vector<192x128xf32>
    %c3_21 = arith.constant 3 : index
    %c0_22 = arith.constant 0 : index
    %c0_23 = arith.constant 0 : index
    %35 = vector.load %arg3[%c3_21, %c0_22, %c0_23] : memref<9x128x128xf32, #tpu.memory_space<vmem>>, vector<1x128x128xf32>
    %36 = vector.shape_cast %35 : vector<1x128x128xf32> to vector<128x128xf32>
    %cst_24 = arith.constant dense<0.000000e+00> : vector<192x128xf32>
    %37 = tpu.matmul %34, %36, %cst_24 {dimension_numbers = #tpu.dot_dimension_numbers<[1], [0], [0], [1], [0, 0, 1, 1], [], []>} : vector<192x128xf32>, vector<128x128xf32>, vector<192x128xf32> -> vector<192x128xf32>
    %38 = arith.addf %29, %37 : vector<192x128xf32>
    %c1_i32_25 = arith.constant 1 : i32
    %39 = arith.addi %1, %c1_i32_25 : i32
    %c0_26 = arith.constant 0 : index
    %40 = arith.index_cast %39 : i32 to index
    %c3_27 = arith.constant 3 : index
    %c0_28 = arith.constant 0 : index
    %41 = vector.load %arg2[%c0_26, %40, %c3_27, %c0_28] : memref<1x22x22x128xf32, #tpu.memory_space<vmem>>, vector<1x12x16x128xf32>
    %42 = vector.shape_cast %41 : vector<1x12x16x128xf32> to vector<12x16x128xf32>
    %43 = vector.shape_cast %42 : vector<12x16x128xf32> to vector<192x128xf32>
    %c4_29 = arith.constant 4 : index
    %c0_30 = arith.constant 0 : index
    %c0_31 = arith.constant 0 : index
    %44 = vector.load %arg3[%c4_29, %c0_30, %c0_31] : memref<9x128x128xf32, #tpu.memory_space<vmem>>, vector<1x128x128xf32>
    %45 = vector.shape_cast %44 : vector<1x128x128xf32> to vector<128x128xf32>
    %cst_32 = arith.constant dense<0.000000e+00> : vector<192x128xf32>
    %46 = tpu.matmul %43, %45, %cst_32 {dimension_numbers = #tpu.dot_dimension_numbers<[1], [0], [0], [1], [0, 0, 1, 1], [], []>} : vector<192x128xf32>, vector<128x128xf32>, vector<192x128xf32> -> vector<192x128xf32>
    %47 = arith.addf %38, %46 : vector<192x128xf32>
    %c1_i32_33 = arith.constant 1 : i32
    %48 = arith.addi %1, %c1_i32_33 : i32
    %c0_34 = arith.constant 0 : index
    %49 = arith.index_cast %48 : i32 to index
    %c4_35 = arith.constant 4 : index
    %c0_36 = arith.constant 0 : index
    %50 = vector.load %arg2[%c0_34, %49, %c4_35, %c0_36] : memref<1x22x22x128xf32, #tpu.memory_space<vmem>>, vector<1x12x16x128xf32>
    %51 = vector.shape_cast %50 : vector<1x12x16x128xf32> to vector<12x16x128xf32>
    %52 = vector.shape_cast %51 : vector<12x16x128xf32> to vector<192x128xf32>
    %c5 = arith.constant 5 : index
    %c0_37 = arith.constant 0 : index
    %c0_38 = arith.constant 0 : index
    %53 = vector.load %arg3[%c5, %c0_37, %c0_38] : memref<9x128x128xf32, #tpu.memory_space<vmem>>, vector<1x128x128xf32>
    %54 = vector.shape_cast %53 : vector<1x128x128xf32> to vector<128x128xf32>
    %cst_39 = arith.constant dense<0.000000e+00> : vector<192x128xf32>
    %55 = tpu.matmul %52, %54, %cst_39 {dimension_numbers = #tpu.dot_dimension_numbers<[1], [0], [0], [1], [0, 0, 1, 1], [], []>} : vector<192x128xf32>, vector<128x128xf32>, vector<192x128xf32> -> vector<192x128xf32>
    %56 = arith.addf %47, %55 : vector<192x128xf32>
    %c2_i32 = arith.constant 2 : i32
    %57 = arith.addi %1, %c2_i32 : i32
    %c0_40 = arith.constant 0 : index
    %58 = arith.index_cast %57 : i32 to index
    %c2_41 = arith.constant 2 : index
    %c0_42 = arith.constant 0 : index
    %59 = vector.load %arg2[%c0_40, %58, %c2_41, %c0_42] : memref<1x22x22x128xf32, #tpu.memory_space<vmem>>, vector<1x12x16x128xf32>
    %60 = vector.shape_cast %59 : vector<1x12x16x128xf32> to vector<12x16x128xf32>
    %61 = vector.shape_cast %60 : vector<12x16x128xf32> to vector<192x128xf32>
    %c6 = arith.constant 6 : index
    %c0_43 = arith.constant 0 : index
    %c0_44 = arith.constant 0 : index
    %62 = vector.load %arg3[%c6, %c0_43, %c0_44] : memref<9x128x128xf32, #tpu.memory_space<vmem>>, vector<1x128x128xf32>
    %63 = vector.shape_cast %62 : vector<1x128x128xf32> to vector<128x128xf32>
    %cst_45 = arith.constant dense<0.000000e+00> : vector<192x128xf32>
    %64 = tpu.matmul %61, %63, %cst_45 {dimension_numbers = #tpu.dot_dimension_numbers<[1], [0], [0], [1], [0, 0, 1, 1], [], []>} : vector<192x128xf32>, vector<128x128xf32>, vector<192x128xf32> -> vector<192x128xf32>
    %65 = arith.addf %56, %64 : vector<192x128xf32>
    %c2_i32_46 = arith.constant 2 : i32
    %66 = arith.addi %1, %c2_i32_46 : i32
    %c0_47 = arith.constant 0 : index
    %67 = arith.index_cast %66 : i32 to index
    %c3_48 = arith.constant 3 : index
    %c0_49 = arith.constant 0 : index
    %68 = vector.load %arg2[%c0_47, %67, %c3_48, %c0_49] : memref<1x22x22x128xf32, #tpu.memory_space<vmem>>, vector<1x12x16x128xf32>
    %69 = vector.shape_cast %68 : vector<1x12x16x128xf32> to vector<12x16x128xf32>
    %70 = vector.shape_cast %69 : vector<12x16x128xf32> to vector<192x128xf32>
    %c7 = arith.constant 7 : index
    %c0_50 = arith.constant 0 : index
    %c0_51 = arith.constant 0 : index
    %71 = vector.load %arg3[%c7, %c0_50, %c0_51] : memref<9x128x128xf32, #tpu.memory_space<vmem>>, vector<1x128x128xf32>
    %72 = vector.shape_cast %71 : vector<1x128x128xf32> to vector<128x128xf32>
    %cst_52 = arith.constant dense<0.000000e+00> : vector<192x128xf32>
    %73 = tpu.matmul %70, %72, %cst_52 {dimension_numbers = #tpu.dot_dimension_numbers<[1], [0], [0], [1], [0, 0, 1, 1], [], []>} : vector<192x128xf32>, vector<128x128xf32>, vector<192x128xf32> -> vector<192x128xf32>
    %74 = arith.addf %65, %73 : vector<192x128xf32>
    %c2_i32_53 = arith.constant 2 : i32
    %75 = arith.addi %1, %c2_i32_53 : i32
    %c0_54 = arith.constant 0 : index
    %76 = arith.index_cast %75 : i32 to index
    %c4_55 = arith.constant 4 : index
    %c0_56 = arith.constant 0 : index
    %77 = vector.load %arg2[%c0_54, %76, %c4_55, %c0_56] : memref<1x22x22x128xf32, #tpu.memory_space<vmem>>, vector<1x12x16x128xf32>
    %78 = vector.shape_cast %77 : vector<1x12x16x128xf32> to vector<12x16x128xf32>
    %79 = vector.shape_cast %78 : vector<12x16x128xf32> to vector<192x128xf32>
    %c8 = arith.constant 8 : index
    %c0_57 = arith.constant 0 : index
    %c0_58 = arith.constant 0 : index
    %80 = vector.load %arg3[%c8, %c0_57, %c0_58] : memref<9x128x128xf32, #tpu.memory_space<vmem>>, vector<1x128x128xf32>
    %81 = vector.shape_cast %80 : vector<1x128x128xf32> to vector<128x128xf32>
    %cst_59 = arith.constant dense<0.000000e+00> : vector<192x128xf32>
    %82 = tpu.matmul %79, %81, %cst_59 {dimension_numbers = #tpu.dot_dimension_numbers<[1], [0], [0], [1], [0, 0, 1, 1], [], []>} : vector<192x128xf32>, vector<128x128xf32>, vector<192x128xf32> -> vector<192x128xf32>
    %83 = arith.addf %74, %82 : vector<192x128xf32>
    %c0_60 = arith.constant 0 : index
    %c0_61 = arith.constant 0 : index
    %84 = vector.load %arg4[%c0_60, %c0_61] : memref<1x128xf32, #tpu.memory_space<vmem>>, vector<1x128xf32>
    %85 = vector.broadcast %84 : vector<1x128xf32> to vector<192x128xf32>
    %86 = arith.addf %83, %85 : vector<192x128xf32>
    %cst_62 = arith.constant 0.000000e+00 : f32
    %87 = vector.broadcast %cst_62 : f32 to vector<192x128xf32>
    %88 = arith.subf %87, %86 : vector<192x128xf32>
    %89 = math.exp %88 : vector<192x128xf32>
    %cst_63 = arith.constant 1.000000e+00 : f32
    %90 = vector.broadcast %cst_63 : f32 to vector<192x128xf32>
    %91 = arith.addf %90, %89 : vector<192x128xf32>
    %cst_64 = arith.constant 1.000000e+00 : f32
    %92 = vector.broadcast %cst_64 : f32 to vector<192x128xf32>
    %93 = arith.divf %92, %91 : vector<192x128xf32>
    %94 = arith.mulf %86, %93 : vector<192x128xf32>
    %95 = vector.shape_cast %94 : vector<192x128xf32> to vector<12x16x128xf32>
    %c0_65 = arith.constant 0 : index
    %c2_66 = arith.constant 2 : index
    %c0_67 = arith.constant 0 : index
    %96 = vector.load %arg10[%c0_65, %c2_66, %c0_67] : memref<12x20x128xf32, #tpu.memory_space<vmem>>, vector<12x16x128xf32>
    tpu.vector_store %arg10[%c0_65, %c2_66, %c0_67], %95 {strides = array<i32>} : memref<12x20x128xf32, #tpu.memory_space<vmem>>, vector<12x16x128xf32>,
    %cst_68 = arith.constant 0.000000e+00 : f32
    %97 = vector.broadcast %cst_68 : f32 to vector<12x2x128xf32>
    %c0_69 = arith.constant 0 : index
    %c0_70 = arith.constant 0 : index
    %c0_71 = arith.constant 0 : index
    %98 = vector.load %arg10[%c0_69, %c0_70, %c0_71] : memref<12x20x128xf32, #tpu.memory_space<vmem>>, vector<12x2x128xf32>
    tpu.vector_store %arg10[%c0_69, %c0_70, %c0_71], %97 {strides = array<i32>} : memref<12x20x128xf32, #tpu.memory_space<vmem>>, vector<12x2x128xf32>,
    %c0_72 = arith.constant 0 : index
    %c18 = arith.constant 18 : index
    %c0_73 = arith.constant 0 : index
    %99 = vector.load %arg10[%c0_72, %c18, %c0_73] : memref<12x20x128xf32, #tpu.memory_space<vmem>>, vector<12x2x128xf32>
    tpu.vector_store %arg10[%c0_72, %c18, %c0_73], %97 {strides = array<i32>} : memref<12x20x128xf32, #tpu.memory_space<vmem>>, vector<12x2x128xf32>,
    %c0_i32_74 = arith.constant 0 : i32
    %100 = arith.cmpi eq, %arg1, %c0_i32_74 : i32
    %101 = arith.extui %100 : i1 to i32
    %c0_i32_75 = arith.constant 0 : i32
    %102 = arith.cmpi ne, %101, %c0_i32_75 : i32
    scf.if %102 {
      %cst_234 = arith.constant 0.000000e+00 : f32
      %318 = vector.broadcast %cst_234 : f32 to vector<2x20x128xf32>
      %c0_235 = arith.constant 0 : index
      %c0_236 = arith.constant 0 : index
      %c0_237 = arith.constant 0 : index
      %319 = vector.load %arg10[%c0_235, %c0_236, %c0_237] : memref<12x20x128xf32, #tpu.memory_space<vmem>>, vector<2x20x128xf32>
      tpu.vector_store %arg10[%c0_235, %c0_236, %c0_237], %318 {strides = array<i32>} : memref<12x20x128xf32, #tpu.memory_space<vmem>>, vector<2x20x128xf32>,
    } else {
    }
    %c1_i32_76 = arith.constant 1 : i32
    %103 = arith.cmpi eq, %arg1, %c1_i32_76 : i32
    %104 = arith.extui %103 : i1 to i32
    %c0_i32_77 = arith.constant 0 : i32
    %105 = arith.cmpi ne, %104, %c0_i32_77 : i32
    scf.if %105 {
      %cst_234 = arith.constant 0.000000e+00 : f32
      %318 = vector.broadcast %cst_234 : f32 to vector<2x20x128xf32>
      %c10_235 = arith.constant 10 : index
      %c0_236 = arith.constant 0 : index
      %c0_237 = arith.constant 0 : index
      %319 = vector.load %arg10[%c10_235, %c0_236, %c0_237] : memref<12x20x128xf32, #tpu.memory_space<vmem>>, vector<2x20x128xf32>
      tpu.vector_store %arg10[%c10_235, %c0_236, %c0_237], %318 {strides = array<i32>} : memref<12x20x128xf32, #tpu.memory_space<vmem>>, vector<2x20x128xf32>,
    } else {
    }
    %cst_78 = arith.constant 0.000000e+00 : f32
    %106 = vector.broadcast %cst_78 : f32 to vector<8x16x128xf32>
    %c0_79 = arith.constant 0 : index
    %c0_80 = arith.constant 0 : index
    %c0_81 = arith.constant 0 : index
    %107 = vector.load %arg10[%c0_79, %c0_80, %c0_81] : memref<12x20x128xf32, #tpu.memory_space<vmem>>, vector<8x16x128xf32>
    %c0_82 = arith.constant 0 : index
    %c0_83 = arith.constant 0 : index
    %c0_84 = arith.constant 0 : index
    %108 = vector.load %arg5[%c0_82, %c0_83, %c0_84] : memref<25x1x128xf32, #tpu.memory_space<vmem>>, vector<1x1x128xf32>
    %109 = vector.shape_cast %108 : vector<1x1x128xf32> to vector<1x128xf32>
    %110 = vector.shape_cast %109 : vector<1x128xf32> to vector<1x1x128xf32>
    %111 = vector.broadcast %110 : vector<1x1x128xf32> to vector<8x16x128xf32>
    %112 = arith.mulf %107, %111 : vector<8x16x128xf32>
    %113 = arith.addf %106, %112 : vector<8x16x128xf32>
    %c0_85 = arith.constant 0 : index
    %c1_86 = arith.constant 1 : index
    %c0_87 = arith.constant 0 : index
    %114 = vector.load %arg10[%c0_85, %c1_86, %c0_87] : memref<12x20x128xf32, #tpu.memory_space<vmem>>, vector<8x16x128xf32>
    %c1_88 = arith.constant 1 : index
    %c0_89 = arith.constant 0 : index
    %c0_90 = arith.constant 0 : index
    %115 = vector.load %arg5[%c1_88, %c0_89, %c0_90] : memref<25x1x128xf32, #tpu.memory_space<vmem>>, vector<1x1x128xf32>
    %116 = vector.shape_cast %115 : vector<1x1x128xf32> to vector<1x128xf32>
    %117 = vector.shape_cast %116 : vector<1x128xf32> to vector<1x1x128xf32>
    %118 = vector.broadcast %117 : vector<1x1x128xf32> to vector<8x16x128xf32>
    %119 = arith.mulf %114, %118 : vector<8x16x128xf32>
    %120 = arith.addf %113, %119 : vector<8x16x128xf32>
    %c0_91 = arith.constant 0 : index
    %c2_92 = arith.constant 2 : index
    %c0_93 = arith.constant 0 : index
    %121 = vector.load %arg10[%c0_91, %c2_92, %c0_93] : memref<12x20x128xf32, #tpu.memory_space<vmem>>, vector<8x16x128xf32>
    %c2_94 = arith.constant 2 : index
    %c0_95 = arith.constant 0 : index
    %c0_96 = arith.constant 0 : index
    %122 = vector.load %arg5[%c2_94, %c0_95, %c0_96] : memref<25x1x128xf32, #tpu.memory_space<vmem>>, vector<1x1x128xf32>
    %123 = vector.shape_cast %122 : vector<1x1x128xf32> to vector<1x128xf32>
    %124 = vector.shape_cast %123 : vector<1x128xf32> to vector<1x1x128xf32>
    %125 = vector.broadcast %124 : vector<1x1x128xf32> to vector<8x16x128xf32>
    %126 = arith.mulf %121, %125 : vector<8x16x128xf32>
    %127 = arith.addf %120, %126 : vector<8x16x128xf32>
    %c0_97 = arith.constant 0 : index
    %c3_98 = arith.constant 3 : index
    %c0_99 = arith.constant 0 : index
    %128 = vector.load %arg10[%c0_97, %c3_98, %c0_99] : memref<12x20x128xf32, #tpu.memory_space<vmem>>, vector<8x16x128xf32>
    %c3_100 = arith.constant 3 : index
    %c0_101 = arith.constant 0 : index
    %c0_102 = arith.constant 0 : index
    %129 = vector.load %arg5[%c3_100, %c0_101, %c0_102] : memref<25x1x128xf32, #tpu.memory_space<vmem>>, vector<1x1x128xf32>
    %130 = vector.shape_cast %129 : vector<1x1x128xf32> to vector<1x128xf32>
    %131 = vector.shape_cast %130 : vector<1x128xf32> to vector<1x1x128xf32>
    %132 = vector.broadcast %131 : vector<1x1x128xf32> to vector<8x16x128xf32>
    %133 = arith.mulf %128, %132 : vector<8x16x128xf32>
    %134 = arith.addf %127, %133 : vector<8x16x128xf32>
    %c0_103 = arith.constant 0 : index
    %c4_104 = arith.constant 4 : index
    %c0_105 = arith.constant 0 : index
    %135 = vector.load %arg10[%c0_103, %c4_104, %c0_105] : memref<12x20x128xf32, #tpu.memory_space<vmem>>, vector<8x16x128xf32>
    %c4_106 = arith.constant 4 : index
    %c0_107 = arith.constant 0 : index
    %c0_108 = arith.constant 0 : index
    %136 = vector.load %arg5[%c4_106, %c0_107, %c0_108] : memref<25x1x128xf32, #tpu.memory_space<vmem>>, vector<1x1x128xf32>
    %137 = vector.shape_cast %136 : vector<1x1x128xf32> to vector<1x128xf32>
    %138 = vector.shape_cast %137 : vector<1x128xf32> to vector<1x1x128xf32>
    %139 = vector.broadcast %138 : vector<1x1x128xf32> to vector<8x16x128xf32>
    %140 = arith.mulf %135, %139 : vector<8x16x128xf32>
    %141 = arith.addf %134, %140 : vector<8x16x128xf32>
    %c1_109 = arith.constant 1 : index
    %c0_110 = arith.constant 0 : index
    %c0_111 = arith.constant 0 : index
    %142 = vector.load %arg10[%c1_109, %c0_110, %c0_111] : memref<12x20x128xf32, #tpu.memory_space<vmem>>, vector<8x16x128xf32>
    %c5_112 = arith.constant 5 : index
    %c0_113 = arith.constant 0 : index
    %c0_114 = arith.constant 0 : index
    %143 = vector.load %arg5[%c5_112, %c0_113, %c0_114] : memref<25x1x128xf32, #tpu.memory_space<vmem>>, vector<1x1x128xf32>
    %144 = vector.shape_cast %143 : vector<1x1x128xf32> to vector<1x128xf32>
    %145 = vector.shape_cast %144 : vector<1x128xf32> to vector<1x1x128xf32>
    %146 = vector.broadcast %145 : vector<1x1x128xf32> to vector<8x16x128xf32>
    %147 = arith.mulf %142, %146 : vector<8x16x128xf32>
    %148 = arith.addf %141, %147 : vector<8x16x128xf32>
    %c1_115 = arith.constant 1 : index
    %c1_116 = arith.constant 1 : index
    %c0_117 = arith.constant 0 : index
    %149 = vector.load %arg10[%c1_115, %c1_116, %c0_117] : memref<12x20x128xf32, #tpu.memory_space<vmem>>, vector<8x16x128xf32>
    %c6_118 = arith.constant 6 : index
    %c0_119 = arith.constant 0 : index
    %c0_120 = arith.constant 0 : index
    %150 = vector.load %arg5[%c6_118, %c0_119, %c0_120] : memref<25x1x128xf32, #tpu.memory_space<vmem>>, vector<1x1x128xf32>
    %151 = vector.shape_cast %150 : vector<1x1x128xf32> to vector<1x128xf32>
    %152 = vector.shape_cast %151 : vector<1x128xf32> to vector<1x1x128xf32>
    %153 = vector.broadcast %152 : vector<1x1x128xf32> to vector<8x16x128xf32>
    %154 = arith.mulf %149, %153 : vector<8x16x128xf32>
    %155 = arith.addf %148, %154 : vector<8x16x128xf32>
    %c1_121 = arith.constant 1 : index
    %c2_122 = arith.constant 2 : index
    %c0_123 = arith.constant 0 : index
    %156 = vector.load %arg10[%c1_121, %c2_122, %c0_123] : memref<12x20x128xf32, #tpu.memory_space<vmem>>, vector<8x16x128xf32>
    %c7_124 = arith.constant 7 : index
    %c0_125 = arith.constant 0 : index
    %c0_126 = arith.constant 0 : index
    %157 = vector.load %arg5[%c7_124, %c0_125, %c0_126] : memref<25x1x128xf32, #tpu.memory_space<vmem>>, vector<1x1x128xf32>
    %158 = vector.shape_cast %157 : vector<1x1x128xf32> to vector<1x128xf32>
    %159 = vector.shape_cast %158 : vector<1x128xf32> to vector<1x1x128xf32>
    %160 = vector.broadcast %159 : vector<1x1x128xf32> to vector<8x16x128xf32>
    %161 = arith.mulf %156, %160 : vector<8x16x128xf32>
    %162 = arith.addf %155, %161 : vector<8x16x128xf32>
    %c1_127 = arith.constant 1 : index
    %c3_128 = arith.constant 3 : index
    %c0_129 = arith.constant 0 : index
    %163 = vector.load %arg10[%c1_127, %c3_128, %c0_129] : memref<12x20x128xf32, #tpu.memory_space<vmem>>, vector<8x16x128xf32>
    %c8_130 = arith.constant 8 : index
    %c0_131 = arith.constant 0 : index
    %c0_132 = arith.constant 0 : index
    %164 = vector.load %arg5[%c8_130, %c0_131, %c0_132] : memref<25x1x128xf32, #tpu.memory_space<vmem>>, vector<1x1x128xf32>
    %165 = vector.shape_cast %164 : vector<1x1x128xf32> to vector<1x128xf32>
    %166 = vector.shape_cast %165 : vector<1x128xf32> to vector<1x1x128xf32>
    %167 = vector.broadcast %166 : vector<1x1x128xf32> to vector<8x16x128xf32>
    %168 = arith.mulf %163, %167 : vector<8x16x128xf32>
    %169 = arith.addf %162, %168 : vector<8x16x128xf32>
    %c1_133 = arith.constant 1 : index
    %c4_134 = arith.constant 4 : index
    %c0_135 = arith.constant 0 : index
    %170 = vector.load %arg10[%c1_133, %c4_134, %c0_135] : memref<12x20x128xf32, #tpu.memory_space<vmem>>, vector<8x16x128xf32>
    %c9 = arith.constant 9 : index
    %c0_136 = arith.constant 0 : index
    %c0_137 = arith.constant 0 : index
    %171 = vector.load %arg5[%c9, %c0_136, %c0_137] : memref<25x1x128xf32, #tpu.memory_space<vmem>>, vector<1x1x128xf32>
    %172 = vector.shape_cast %171 : vector<1x1x128xf32> to vector<1x128xf32>
    %173 = vector.shape_cast %172 : vector<1x128xf32> to vector<1x1x128xf32>
    %174 = vector.broadcast %173 : vector<1x1x128xf32> to vector<8x16x128xf32>
    %175 = arith.mulf %170, %174 : vector<8x16x128xf32>
    %176 = arith.addf %169, %175 : vector<8x16x128xf32>
    %c2_138 = arith.constant 2 : index
    %c0_139 = arith.constant 0 : index
    %c0_140 = arith.constant 0 : index
    %177 = vector.load %arg10[%c2_138, %c0_139, %c0_140] : memref<12x20x128xf32, #tpu.memory_space<vmem>>, vector<8x16x128xf32>
    %c10 = arith.constant 10 : index
    %c0_141 = arith.constant 0 : index
    %c0_142 = arith.constant 0 : index
    %178 = vector.load %arg5[%c10, %c0_141, %c0_142] : memref<25x1x128xf32, #tpu.memory_space<vmem>>, vector<1x1x128xf32>
    %179 = vector.shape_cast %178 : vector<1x1x128xf32> to vector<1x128xf32>
    %180 = vector.shape_cast %179 : vector<1x128xf32> to vector<1x1x128xf32>
    %181 = vector.broadcast %180 : vector<1x1x128xf32> to vector<8x16x128xf32>
    %182 = arith.mulf %177, %181 : vector<8x16x128xf32>
    %183 = arith.addf %176, %182 : vector<8x16x128xf32>
    %c2_143 = arith.constant 2 : index
    %c1_144 = arith.constant 1 : index
    %c0_145 = arith.constant 0 : index
    %184 = vector.load %arg10[%c2_143, %c1_144, %c0_145] : memref<12x20x128xf32, #tpu.memory_space<vmem>>, vector<8x16x128xf32>
    %c11 = arith.constant 11 : index
    %c0_146 = arith.constant 0 : index
    %c0_147 = arith.constant 0 : index
    %185 = vector.load %arg5[%c11, %c0_146, %c0_147] : memref<25x1x128xf32, #tpu.memory_space<vmem>>, vector<1x1x128xf32>
    %186 = vector.shape_cast %185 : vector<1x1x128xf32> to vector<1x128xf32>
    %187 = vector.shape_cast %186 : vector<1x128xf32> to vector<1x1x128xf32>
    %188 = vector.broadcast %187 : vector<1x1x128xf32> to vector<8x16x128xf32>
    %189 = arith.mulf %184, %188 : vector<8x16x128xf32>
    %190 = arith.addf %183, %189 : vector<8x16x128xf32>
    %c2_148 = arith.constant 2 : index
    %c2_149 = arith.constant 2 : index
    %c0_150 = arith.constant 0 : index
    %191 = vector.load %arg10[%c2_148, %c2_149, %c0_150] : memref<12x20x128xf32, #tpu.memory_space<vmem>>, vector<8x16x128xf32>
    %c12 = arith.constant 12 : index
    %c0_151 = arith.constant 0 : index
    %c0_152 = arith.constant 0 : index
    %192 = vector.load %arg5[%c12, %c0_151, %c0_152] : memref<25x1x128xf32, #tpu.memory_space<vmem>>, vector<1x1x128xf32>
    %193 = vector.shape_cast %192 : vector<1x1x128xf32> to vector<1x128xf32>
    %194 = vector.shape_cast %193 : vector<1x128xf32> to vector<1x1x128xf32>
    %195 = vector.broadcast %194 : vector<1x1x128xf32> to vector<8x16x128xf32>
    %196 = arith.mulf %191, %195 : vector<8x16x128xf32>
    %197 = arith.addf %190, %196 : vector<8x16x128xf32>
    %c2_153 = arith.constant 2 : index
    %c3_154 = arith.constant 3 : index
    %c0_155 = arith.constant 0 : index
    %198 = vector.load %arg10[%c2_153, %c3_154, %c0_155] : memref<12x20x128xf32, #tpu.memory_space<vmem>>, vector<8x16x128xf32>
    %c13 = arith.constant 13 : index
    %c0_156 = arith.constant 0 : index
    %c0_157 = arith.constant 0 : index
    %199 = vector.load %arg5[%c13, %c0_156, %c0_157] : memref<25x1x128xf32, #tpu.memory_space<vmem>>, vector<1x1x128xf32>
    %200 = vector.shape_cast %199 : vector<1x1x128xf32> to vector<1x128xf32>
    %201 = vector.shape_cast %200 : vector<1x128xf32> to vector<1x1x128xf32>
    %202 = vector.broadcast %201 : vector<1x1x128xf32> to vector<8x16x128xf32>
    %203 = arith.mulf %198, %202 : vector<8x16x128xf32>
    %204 = arith.addf %197, %203 : vector<8x16x128xf32>
    %c2_158 = arith.constant 2 : index
    %c4_159 = arith.constant 4 : index
    %c0_160 = arith.constant 0 : index
    %205 = vector.load %arg10[%c2_158, %c4_159, %c0_160] : memref<12x20x128xf32, #tpu.memory_space<vmem>>, vector<8x16x128xf32>
    %c14 = arith.constant 14 : index
    %c0_161 = arith.constant 0 : index
    %c0_162 = arith.constant 0 : index
    %206 = vector.load %arg5[%c14, %c0_161, %c0_162] : memref<25x1x128xf32, #tpu.memory_space<vmem>>, vector<1x1x128xf32>
    %207 = vector.shape_cast %206 : vector<1x1x128xf32> to vector<1x128xf32>
    %208 = vector.shape_cast %207 : vector<1x128xf32> to vector<1x1x128xf32>
    %209 = vector.broadcast %208 : vector<1x1x128xf32> to vector<8x16x128xf32>
    %210 = arith.mulf %205, %209 : vector<8x16x128xf32>
    %211 = arith.addf %204, %210 : vector<8x16x128xf32>
    %c3_163 = arith.constant 3 : index
    %c0_164 = arith.constant 0 : index
    %c0_165 = arith.constant 0 : index
    %212 = vector.load %arg10[%c3_163, %c0_164, %c0_165] : memref<12x20x128xf32, #tpu.memory_space<vmem>>, vector<8x16x128xf32>
    %c15 = arith.constant 15 : index
    %c0_166 = arith.constant 0 : index
    %c0_167 = arith.constant 0 : index
    %213 = vector.load %arg5[%c15, %c0_166, %c0_167] : memref<25x1x128xf32, #tpu.memory_space<vmem>>, vector<1x1x128xf32>
    %214 = vector.shape_cast %213 : vector<1x1x128xf32> to vector<1x128xf32>
    %215 = vector.shape_cast %214 : vector<1x128xf32> to vector<1x1x128xf32>
    %216 = vector.broadcast %215 : vector<1x1x128xf32> to vector<8x16x128xf32>
    %217 = arith.mulf %212, %216 : vector<8x16x128xf32>
    %218 = arith.addf %211, %217 : vector<8x16x128xf32>
    %c3_168 = arith.constant 3 : index
    %c1_169 = arith.constant 1 : index
    %c0_170 = arith.constant 0 : index
    %219 = vector.load %arg10[%c3_168, %c1_169, %c0_170] : memref<12x20x128xf32, #tpu.memory_space<vmem>>, vector<8x16x128xf32>
    %c16 = arith.constant 16 : index
    %c0_171 = arith.constant 0 : index
    %c0_172 = arith.constant 0 : index
    %220 = vector.load %arg5[%c16, %c0_171, %c0_172] : memref<25x1x128xf32, #tpu.memory_space<vmem>>, vector<1x1x128xf32>
    %221 = vector.shape_cast %220 : vector<1x1x128xf32> to vector<1x128xf32>
    %222 = vector.shape_cast %221 : vector<1x128xf32> to vector<1x1x128xf32>
    %223 = vector.broadcast %222 : vector<1x1x128xf32> to vector<8x16x128xf32>
    %224 = arith.mulf %219, %223 : vector<8x16x128xf32>
    %225 = arith.addf %218, %224 : vector<8x16x128xf32>
    %c3_173 = arith.constant 3 : index
    %c2_174 = arith.constant 2 : index
    %c0_175 = arith.constant 0 : index
    %226 = vector.load %arg10[%c3_173, %c2_174, %c0_175] : memref<12x20x128xf32, #tpu.memory_space<vmem>>, vector<8x16x128xf32>
    %c17 = arith.constant 17 : index
    %c0_176 = arith.constant 0 : index
    %c0_177 = arith.constant 0 : index
    %227 = vector.load %arg5[%c17, %c0_176, %c0_177] : memref<25x1x128xf32, #tpu.memory_space<vmem>>, vector<1x1x128xf32>
    %228 = vector.shape_cast %227 : vector<1x1x128xf32> to vector<1x128xf32>
    %229 = vector.shape_cast %228 : vector<1x128xf32> to vector<1x1x128xf32>
    %230 = vector.broadcast %229 : vector<1x1x128xf32> to vector<8x16x128xf32>
    %231 = arith.mulf %226, %230 : vector<8x16x128xf32>
    %232 = arith.addf %225, %231 : vector<8x16x128xf32>
    %c3_178 = arith.constant 3 : index
    %c3_179 = arith.constant 3 : index
    %c0_180 = arith.constant 0 : index
    %233 = vector.load %arg10[%c3_178, %c3_179, %c0_180] : memref<12x20x128xf32, #tpu.memory_space<vmem>>, vector<8x16x128xf32>
    %c18_181 = arith.constant 18 : index
    %c0_182 = arith.constant 0 : index
    %c0_183 = arith.constant 0 : index
    %234 = vector.load %arg5[%c18_181, %c0_182, %c0_183] : memref<25x1x128xf32, #tpu.memory_space<vmem>>, vector<1x1x128xf32>
    %235 = vector.shape_cast %234 : vector<1x1x128xf32> to vector<1x128xf32>
    %236 = vector.shape_cast %235 : vector<1x128xf32> to vector<1x1x128xf32>
    %237 = vector.broadcast %236 : vector<1x1x128xf32> to vector<8x16x128xf32>
    %238 = arith.mulf %233, %237 : vector<8x16x128xf32>
    %239 = arith.addf %232, %238 : vector<8x16x128xf32>
    %c3_184 = arith.constant 3 : index
    %c4_185 = arith.constant 4 : index
    %c0_186 = arith.constant 0 : index
    %240 = vector.load %arg10[%c3_184, %c4_185, %c0_186] : memref<12x20x128xf32, #tpu.memory_space<vmem>>, vector<8x16x128xf32>
    %c19 = arith.constant 19 : index
    %c0_187 = arith.constant 0 : index
    %c0_188 = arith.constant 0 : index
    %241 = vector.load %arg5[%c19, %c0_187, %c0_188] : memref<25x1x128xf32, #tpu.memory_space<vmem>>, vector<1x1x128xf32>
    %242 = vector.shape_cast %241 : vector<1x1x128xf32> to vector<1x128xf32>
    %243 = vector.shape_cast %242 : vector<1x128xf32> to vector<1x1x128xf32>
    %244 = vector.broadcast %243 : vector<1x1x128xf32> to vector<8x16x128xf32>
    %245 = arith.mulf %240, %244 : vector<8x16x128xf32>
    %246 = arith.addf %239, %245 : vector<8x16x128xf32>
    %c4_189 = arith.constant 4 : index
    %c0_190 = arith.constant 0 : index
    %c0_191 = arith.constant 0 : index
    %247 = vector.load %arg10[%c4_189, %c0_190, %c0_191] : memref<12x20x128xf32, #tpu.memory_space<vmem>>, vector<8x16x128xf32>
    %c20 = arith.constant 20 : index
    %c0_192 = arith.constant 0 : index
    %c0_193 = arith.constant 0 : index
    %248 = vector.load %arg5[%c20, %c0_192, %c0_193] : memref<25x1x128xf32, #tpu.memory_space<vmem>>, vector<1x1x128xf32>
    %249 = vector.shape_cast %248 : vector<1x1x128xf32> to vector<1x128xf32>
    %250 = vector.shape_cast %249 : vector<1x128xf32> to vector<1x1x128xf32>
    %251 = vector.broadcast %250 : vector<1x1x128xf32> to vector<8x16x128xf32>
    %252 = arith.mulf %247, %251 : vector<8x16x128xf32>
    %253 = arith.addf %246, %252 : vector<8x16x128xf32>
    %c4_194 = arith.constant 4 : index
    %c1_195 = arith.constant 1 : index
    %c0_196 = arith.constant 0 : index
    %254 = vector.load %arg10[%c4_194, %c1_195, %c0_196] : memref<12x20x128xf32, #tpu.memory_space<vmem>>, vector<8x16x128xf32>
    %c21 = arith.constant 21 : index
    %c0_197 = arith.constant 0 : index
    %c0_198 = arith.constant 0 : index
    %255 = vector.load %arg5[%c21, %c0_197, %c0_198] : memref<25x1x128xf32, #tpu.memory_space<vmem>>, vector<1x1x128xf32>
    %256 = vector.shape_cast %255 : vector<1x1x128xf32> to vector<1x128xf32>
    %257 = vector.shape_cast %256 : vector<1x128xf32> to vector<1x1x128xf32>
    %258 = vector.broadcast %257 : vector<1x1x128xf32> to vector<8x16x128xf32>
    %259 = arith.mulf %254, %258 : vector<8x16x128xf32>
    %260 = arith.addf %253, %259 : vector<8x16x128xf32>
    %c4_199 = arith.constant 4 : index
    %c2_200 = arith.constant 2 : index
    %c0_201 = arith.constant 0 : index
    %261 = vector.load %arg10[%c4_199, %c2_200, %c0_201] : memref<12x20x128xf32, #tpu.memory_space<vmem>>, vector<8x16x128xf32>
    %c22 = arith.constant 22 : index
    %c0_202 = arith.constant 0 : index
    %c0_203 = arith.constant 0 : index
    %262 = vector.load %arg5[%c22, %c0_202, %c0_203] : memref<25x1x128xf32, #tpu.memory_space<vmem>>, vector<1x1x128xf32>
    %263 = vector.shape_cast %262 : vector<1x1x128xf32> to vector<1x128xf32>
    %264 = vector.shape_cast %263 : vector<1x128xf32> to vector<1x1x128xf32>
    %265 = vector.broadcast %264 : vector<1x1x128xf32> to vector<8x16x128xf32>
    %266 = arith.mulf %261, %265 : vector<8x16x128xf32>
    %267 = arith.addf %260, %266 : vector<8x16x128xf32>
    %c4_204 = arith.constant 4 : index
    %c3_205 = arith.constant 3 : index
    %c0_206 = arith.constant 0 : index
    %268 = vector.load %arg10[%c4_204, %c3_205, %c0_206] : memref<12x20x128xf32, #tpu.memory_space<vmem>>, vector<8x16x128xf32>
    %c23 = arith.constant 23 : index
    %c0_207 = arith.constant 0 : index
    %c0_208 = arith.constant 0 : index
    %269 = vector.load %arg5[%c23, %c0_207, %c0_208] : memref<25x1x128xf32, #tpu.memory_space<vmem>>, vector<1x1x128xf32>
    %270 = vector.shape_cast %269 : vector<1x1x128xf32> to vector<1x128xf32>
    %271 = vector.shape_cast %270 : vector<1x128xf32> to vector<1x1x128xf32>
    %272 = vector.broadcast %271 : vector<1x1x128xf32> to vector<8x16x128xf32>
    %273 = arith.mulf %268, %272 : vector<8x16x128xf32>
    %274 = arith.addf %267, %273 : vector<8x16x128xf32>
    %c4_209 = arith.constant 4 : index
    %c4_210 = arith.constant 4 : index
    %c0_211 = arith.constant 0 : index
    %275 = vector.load %arg10[%c4_209, %c4_210, %c0_211] : memref<12x20x128xf32, #tpu.memory_space<vmem>>, vector<8x16x128xf32>
    %c24 = arith.constant 24 : index
    %c0_212 = arith.constant 0 : index
    %c0_213 = arith.constant 0 : index
    %276 = vector.load %arg5[%c24, %c0_212, %c0_213] : memref<25x1x128xf32, #tpu.memory_space<vmem>>, vector<1x1x128xf32>
    %277 = vector.shape_cast %276 : vector<1x1x128xf32> to vector<1x128xf32>
    %278 = vector.shape_cast %277 : vector<1x128xf32> to vector<1x1x128xf32>
    %279 = vector.broadcast %278 : vector<1x1x128xf32> to vector<8x16x128xf32>
    %280 = arith.mulf %275, %279 : vector<8x16x128xf32>
    %281 = arith.addf %274, %280 : vector<8x16x128xf32>
    %c0_214 = arith.constant 0 : index
    %c0_215 = arith.constant 0 : index
    %282 = vector.load %arg6[%c0_214, %c0_215] : memref<1x128xf32, #tpu.memory_space<vmem>>, vector<1x128xf32>
    %283 = vector.shape_cast %282 : vector<1x128xf32> to vector<1x1x128xf32>
    %284 = vector.broadcast %283 : vector<1x1x128xf32> to vector<8x16x128xf32>
    %285 = arith.addf %281, %284 : vector<8x16x128xf32>
    %cst_216 = arith.constant 0.000000e+00 : f32
    %286 = vector.broadcast %cst_216 : f32 to vector<8x16x128xf32>
    %287 = arith.subf %286, %285 : vector<8x16x128xf32>
    %288 = math.exp %287 : vector<8x16x128xf32>
    %cst_217 = arith.constant 1.000000e+00 : f32
    %289 = vector.broadcast %cst_217 : f32 to vector<8x16x128xf32>
    %290 = arith.addf %289, %288 : vector<8x16x128xf32>
    %cst_218 = arith.constant 1.000000e+00 : f32
    %291 = vector.broadcast %cst_218 : f32 to vector<8x16x128xf32>
    %292 = arith.divf %291, %290 : vector<8x16x128xf32>
    %293 = arith.mulf %285, %292 : vector<8x16x128xf32>
    %294 = vector.shape_cast %293 : vector<8x16x128xf32> to vector<128x128xf32>
    %c0_219 = arith.constant 0 : index
    %c0_220 = arith.constant 0 : index
    %295 = vector.load %arg7[%c0_219, %c0_220] : memref<128x128xf32, #tpu.memory_space<vmem>>, vector<128x128xf32>
    %cst_221 = arith.constant dense<0.000000e+00> : vector<128x128xf32>
    %296 = tpu.matmul %294, %295, %cst_221 {dimension_numbers = #tpu.dot_dimension_numbers<[1], [0], [0], [1], [0, 0, 1, 1], [], []>} : vector<128x128xf32>, vector<128x128xf32>, vector<128x128xf32> -> vector<128x128xf32>
    %c0_222 = arith.constant 0 : index
    %c0_223 = arith.constant 0 : index
    %297 = vector.load %arg8[%c0_222, %c0_223] : memref<1x128xf32, #tpu.memory_space<vmem>>, vector<1x128xf32>
    %298 = vector.broadcast %297 : vector<1x128xf32> to vector<128x128xf32>
    %299 = arith.addf %296, %298 : vector<128x128xf32>
    %cst_224 = arith.constant 0.000000e+00 : f32
    %300 = vector.broadcast %cst_224 : f32 to vector<128x128xf32>
    %301 = arith.subf %300, %299 : vector<128x128xf32>
    %302 = math.exp %301 : vector<128x128xf32>
    %cst_225 = arith.constant 1.000000e+00 : f32
    %303 = vector.broadcast %cst_225 : f32 to vector<128x128xf32>
    %304 = arith.addf %303, %302 : vector<128x128xf32>
    %cst_226 = arith.constant 1.000000e+00 : f32
    %305 = vector.broadcast %cst_226 : f32 to vector<128x128xf32>
    %306 = arith.divf %305, %304 : vector<128x128xf32>
    %307 = arith.mulf %299, %306 : vector<128x128xf32>
    %c3_i32 = arith.constant 3 : i32
    %308 = arith.addi %1, %c3_i32 : i32
    %c0_227 = arith.constant 0 : index
    %309 = arith.index_cast %308 : i32 to index
    %c3_228 = arith.constant 3 : index
    %c0_229 = arith.constant 0 : index
    %310 = vector.load %arg2[%c0_227, %309, %c3_228, %c0_229] : memref<1x22x22x128xf32, #tpu.memory_space<vmem>>, vector<1x8x16x128xf32>
    %311 = vector.shape_cast %310 : vector<1x8x16x128xf32> to vector<8x16x128xf32>
    %312 = vector.shape_cast %311 : vector<8x16x128xf32> to vector<128x128xf32>
    %313 = arith.addf %307, %312 : vector<128x128xf32>
    %314 = vector.shape_cast %313 : vector<128x128xf32> to vector<8x16x128xf32>
    %c0_230 = arith.constant 0 : index
    %c0_231 = arith.constant 0 : index
    %c0_232 = arith.constant 0 : index
    %c0_233 = arith.constant 0 : index
    %315 = vector.load %arg9[%c0_230, %c0_231, %c0_232, %c0_233] : memref<1x8x16x128xf32, #tpu.memory_space<vmem>>, vector<1x8x16x128xf32>
    %316 = vector.shape_cast %315 : vector<1x8x16x128xf32> to vector<8x16x128xf32>
    %317 = vector.shape_cast %314 : vector<8x16x128xf32> to vector<1x8x16x128xf32>
    tpu.vector_store %arg9[%c0_230, %c0_231, %c0_232, %c0_233], %317 {strides = array<i32>} : memref<1x8x16x128xf32, #tpu.memory_space<vmem>>, vector<1x8x16x128xf32>,
    return
  }
  func.func @transform_0(%arg0: i32, %arg1: i32) -> (i32, i32, i32, i32) {
    %c0_i32 = arith.constant 0 : i32
    %c0_i32_0 = arith.constant 0 : i32
    %c0_i32_1 = arith.constant 0 : i32
    %c0_i32_2 = arith.constant 0 : i32
    return %arg0, %c0_i32, %c0_i32_0, %c0_i32_1 : i32, i32, i32, i32
  }
  func.func @transform_1(%arg0: i32, %arg1: i32) -> (i32, i32, i32) {
    %c0_i32 = arith.constant 0 : i32
    %c0_i32_0 = arith.constant 0 : i32
    %c0_i32_1 = arith.constant 0 : i32
    %c0_i32_2 = arith.constant 0 : i32
    return %c0_i32, %c0_i32_0, %c0_i32_1 : i32, i32, i32
  }
  func.func @transform_2(%arg0: i32, %arg1: i32) -> (i32, i32) {
    %c0_i32 = arith.constant 0 : i32
    %c0_i32_0 = arith.constant 0 : i32
    %c0_i32_1 = arith.constant 0 : i32
    return %c0_i32, %c0_i32_0 : i32, i32
  }
  func.func @transform_3(%arg0: i32, %arg1: i32) -> (i32, i32, i32) {
    %c0_i32 = arith.constant 0 : i32
    %c0_i32_0 = arith.constant 0 : i32
    %c0_i32_1 = arith.constant 0 : i32
    %c0_i32_2 = arith.constant 0 : i32
    return %c0_i32, %c0_i32_0, %c0_i32_1 : i32, i32, i32
  }
  func.func @transform_4(%arg0: i32, %arg1: i32) -> (i32, i32) {
    %c0_i32 = arith.constant 0 : i32
    %c0_i32_0 = arith.constant 0 : i32
    %c0_i32_1 = arith.constant 0 : i32
    return %c0_i32, %c0_i32_0 : i32, i32
  }
  func.func @transform_5(%arg0: i32, %arg1: i32) -> (i32, i32) {
    %c0_i32 = arith.constant 0 : i32
    %c0_i32_0 = arith.constant 0 : i32
    %c0_i32_1 = arith.constant 0 : i32
    return %c0_i32, %c0_i32_0 : i32, i32
  }
  func.func @transform_6(%arg0: i32, %arg1: i32) -> (i32, i32) {
    %c0_i32 = arith.constant 0 : i32
    %c0_i32_0 = arith.constant 0 : i32
    %c0_i32_1 = arith.constant 0 : i32
    return %c0_i32, %c0_i32_0 : i32, i32
  }
  func.func @transform_7(%arg0: i32, %arg1: i32) -> (i32, i32, i32, i32) {
    %c0_i32 = arith.constant 0 : i32
    %c0_i32_0 = arith.constant 0 : i32
    %c0_i32_1 = arith.constant 0 : i32
    return %arg0, %arg1, %c0_i32, %c0_i32_0 : i32, i32, i32, i32
  }
}

</mosaic_0001>

<bundles_post_ra>
// kernel: tpu_custom_call.1
= control target key start
LH: loop header
LB: loop body
LE: loop exit
PB: predicated region body
PF: predicated region fallthrough
CT: control target
= control target key end

     0   :  { %12 = vsyncpa [#allocation4], 0  ;;  %s9703_s0 = inlined_call_operand.vmem [shape: f32[2,22,22,128], index: 0, kind: input, shape index: {}]   ;;  %s9704_s1 = inlined_call_operand.vmem [shape: f32[9,128,128], index: 1, kind: input, shape index: {}]   ;;  %s9705_s2 = inlined_call_operand.vmem [shape: f32[1,128], index: 2, kind: input, shape index: {}]   ;;  %s9706_s3 = inlined_call_operand.vmem [shape: f32[25,1,128], index: 3, kind: input, shape index: {}]   ;;  %s9707_s4 = inlined_call_operand.vmem [shape: f32[1,128], index: 4, kind: input, shape index: {}]   ;;  %s9708_s5 = inlined_call_operand.vmem [shape: f32[128,128], index: 5, kind: input, shape index: {}]   ;;  %s9709_s6 = inlined_call_operand.vmem [shape: f32[1,128], index: 6, kind: input, shape index: {}]   ;;  %s9710_s7 = inlined_call_operand.hbm [shape: f32[2,16,16,128], index: 7, kind: output, shape index: {}]  }
   0x1   :  { %14 = vsyncpa [#allocation4 + $0x1], 0  ;;  %s6638_s24 = smov 0   ;;  %s6640_s25 = smov 0  }
   0x2   :  { %s6642_s26 = smov 0   ;;  %s6644_s27 = smov 0  }
   0x3   :  { %s6646_s28 = smov 0   ;;  %s6648_s29 = smov 0  }
   0x4   :  { %s6650_s30 = smov 0   ;;  %s6652_s8 = smov 0  }
   0x5 LB: > { %9902 = sst [smem:[#allocation6_spill]] %s6586_s30  ;;  %s4746_s9 = sadd.s32 4294967295, %s6590_s8   ;;  %s6590_s8 = sphi %s6652_s8, %s20_s8   ;;  %s6586_s30 = sphi %s6650_s30, %s10237_s30   ;;  %s6582_s29 = sphi %s6648_s29, %s10242_s29   ;;  %s6578_s28 = sphi %s6646_s28, %s10235_s28   ;;  %s6574_s27 = sphi %s6644_s27, %s10241_s27   ;;  %s6570_s26 = sphi %s6642_s26, %s10240_s26   ;;  %s6566_s25 = sphi %s6640_s25, %s10239_s25   ;;  %s6562_s24 = sphi %s6638_s24, %s10238_s24  }
   0x6   : > { %s4747_s10 = sadd.s32 4294967294, %s6590_s8   ;;  %s29_s11 = sadd.s32 1, %s6582_s29 }
   0x7   : > { %p30_p0 = scmp.ge.s32.totalorder %s29_s11, 2  ;;  %s32_s12 = sadd.s32 1, %s6586_s30 }
   0x8   : > { %p203_p1 = scmp.ne.s32.totalorder %s6570_s26, %s6566_s25  ;;  %p204_p2 = scmp.eq.s32.totalorder %s4746_s9, 3 }
   0x9   : > { %s10244_s11 = smov (%p30_p0, %s29_s11), 0  ;;  %s10246_s12 = smov (!%p30_p0, %s32_s12), %s6586_s30 }
   0xa   : > { %9903 = sst [smem:[#allocation7_spill]] %s10244_s11  ;;  %s189_s13 = ssub.s32 %s6582_s29, %s10244_s11 }
   0xb   : > { %p6689_p3 = por %p204_p2, %p203_p1  ;;  %p34_p4 = scmp.ge.s32.totalorder %s10246_s12, 2 }
   0xc   : > { %p209_p5 = scmp.ne.s32.totalorder %s6566_s25, %s6562_s24  ;;  %p210_p6 = scmp.eq.s32.totalorder %s4747_s10, 3 }
   0xd   : > { %p4750_p7 = scmp.ge.s32.totalorder %s6590_s8, 1  ;;  %s10248_s12 = smov (%p34_p4, %s10246_s12), 0 }
   0xe   : > { %9905 = sst [smem:[#allocation8_spill]] %s10248_s12  ;;  %p6698_p8 = por %p210_p6, %p209_p5 }
   0xf   : > { %p254_p9 = scmp.lt.s32.totalorder %s6590_s8, 5  ;;  %s188_s16 = ssub.s32 %s6586_s30, %s10248_s12 }
  0x10   : > { %s193_s17 = sadd.s32 1, %s6570_s26  ;;  %s190_s18 = sor.u32 %s189_s13, %s188_s16 }
  0x11   : > { %p255_p10 = pnand %p4750_p7, %p254_p9  ;;  %p191_p11 = scmp.eq.s32.totalorder %s190_s18, 0 }
  0x13   : > { %s6707_s19 = scalar_select %p191_p11, %s6570_s26, %s193_s17  }
  0x14   : > { %258 = sbr.rel (%p255_p10) target bundleno = 1114 (0x45a), region = 48 }
  0x19   : > { %s9712_s20 = sand.u32 1, %s6566_s25   ;;  %v4770_v0 = vld [vmem:[%s9704_s1 + $0xf8] sm:$0xff]  ;;  %v4769_v2 = vld [vmem:[%s9704_s1 + $0xf0] sm:$0xff]  ;;  %v4768_v4 = vld [vmem:[%s9704_s1 + $0xe8] sm:$0xff]  ;;  %p286_p12 = scmp.lt.s32.totalorder %s6578_s28, 1 }
  0x1a   : > { %v334_v1 = vld [vmem:[%s9704_s1 + $0x78] sm:$0xff]  ;;  %s6721_s13 = sshll.u32 %s9712_s20, 7  ;;  %5503 = vmatprep.subr.mxu0 %v4770_v0  ;;  %v333_v3 = vld [vmem:[%s9704_s1 + $0x70] sm:$0xff]  ;;  %v332_v5 = vld [vmem:[%s9704_s1 + $0x68] sm:$0xff]  ;;  %s4754_s18 = smul.u32 192, %s6574_s27 }
  0x1b   : > { %5571 = vmatprep.subr.mxu1 %v334_v1  ;;  %5504 = vmatpush3.msra.mxu0 %v4770_v0  ;;  %v4767_v6 = vld [vmem:[%s9704_s1 + $0xe0] sm:$0xff]  ;;  %v4766_v8 = vld [vmem:[%s9704_s1 + $0xd8] sm:$0xff]  ;;  %v4765_v10 = vld [vmem:[%s9704_s1 + $0xd0] sm:$0xff]  ;;  %s287_s21 = scalar_select %p286_p12, %s6578_s28, 1 }
  0x1c   : > { %5572 = vmatpush3.msra.mxu1 %v334_v1  ;;  %5505 = vmatprep.subr.mxu0 %v4769_v2  ;;  %v331_v7 = vld [vmem:[%s9704_s1 + $0x60] sm:$0xff]  ;;  %v330_v9 = vld [vmem:[%s9704_s1 + $0x58] sm:$0xff]  ;;  %v329_v11 = vld [vmem:[%s9704_s1 + $0x50] sm:$0xff]  ;;  %p5032_p13 = scmp.ne.s32.totalorder %s6574_s27, 0 }
  0x1d   : > { %5573 = vmatprep.subr.mxu1 %v333_v3  ;;  %5506 = vmatpush3.msra.mxu0 %v4769_v2  ;;  %v4764_v12 = vld [vmem:[%s9704_s1 + $0xc8] sm:$0xff]  ;;  %v4763_v14 = vld [vmem:[%s9704_s1 + $0xc0] sm:$0xff]  ;;  %v4762_v16 = vld [vmem:[%s9704_s1 + $0xb8] sm:$0xff]  ;;  %s6171_s22 = smul.u32 528, %s287_s21 }
  0x1e   : > { %5574 = vmatpush3.msra.mxu1 %v333_v3  ;;  %5507 = vmatprep.subr.mxu0 %v4768_v4  ;;  %v328_v13 = vld [vmem:[%s9704_s1 + $0x48] sm:$0xff]  ;;  %v327_v15 = vld [vmem:[%s9704_s1 + $0x40] sm:$0xff]  ;;  %v326_v17 = vld [vmem:[%s9704_s1 + $0x38] sm:$0xff] }
  0x1f   : > { %5575 = vmatprep.subr.mxu1 %v332_v5  ;;  %5508 = vmatpush3.msra.mxu0 %v4768_v4  ;;  %v4761_v18 = vld [vmem:[%s9704_s1 + $0xb0] sm:$0xff]  ;;  %v4760_v20 = vld [vmem:[%s9704_s1 + $0xa8] sm:$0xff]  ;;  %v4759_v22 = vld [vmem:[%s9704_s1 + $0xa0] sm:$0xff]  ;;  %s290_s20 = scalar_lea.vmem %s9703_s0, %s6171_s22  ;;  %s8165_s22 = scalar_lea.vmem [#allocation3], %s6721_s13 }
  0x20   : > { %5576 = vmatpush3.msra.mxu1 %v332_v5  ;;  %5509 = vmatprep.subr.mxu0 %v4767_v6  ;;  %v325_v19 = vld [vmem:[%s9704_s1 + $0x30] sm:$0xff]  ;;  %v324_v21 = vld [vmem:[%s9704_s1 + $0x28] sm:$0xff]  ;;  %v323_v23 = vld [vmem:[%s9704_s1 + $0x20] sm:$0xff]  ;;  %s6810_s23 = scalar_lea.vmem %s290_s20, %s4754_s18 }
  0x21   : > { %5577 = vmatprep.subr.mxu1 %v331_v7  ;;  %5510 = vmatpush3.msra.mxu0 %v4767_v6  ;;  %v4758_v24 = vld [vmem:[%s9704_s1 + $0x98] sm:$0xff]  ;;  %v4757_v26 = vld [vmem:[%s9704_s1 + $0x90] sm:$0xff]  ;;  %v4756_v28 = vld [vmem:[%s9704_s1 + $0x88] sm:$0xff] }
  0x22   : > { %5578 = vmatpush3.msra.mxu1 %v331_v7  ;;  %5511 = vmatprep.subr.mxu0 %v4766_v8  ;;  %v322_v25 = vld [vmem:[%s9704_s1 + $0x18] sm:$0xff]  ;;  %v321_v27 = vld [vmem:[%s9704_s1 + $0x10] sm:$0xff]  ;;  %v320_v29 = vld [vmem:[%s9704_s1 + $0x8] sm:$0xff] }
  0x23   : > { %5579 = vmatprep.subr.mxu1 %v330_v9  ;;  %5512 = vmatpush3.msra.mxu0 %v4766_v8  ;;  %v4755_v30 = vld [vmem:[%s9704_s1 + $0x80] sm:$0xff]  ;;  %v336_v34 = vld [vmem:[%s6810_s23 + $0xb] sm:$0xff]  ;;  %v4786_v36 = vld [vmem:[%s9704_s1 + $0x178] sm:$0xff] }
  0x24   : > { %5580 = vmatpush3.msra.mxu1 %v330_v9  ;;  %5513 = vmatprep.subr.mxu0 %v4765_v10  ;;  %v319_v31 = vld [vmem:[%s9704_s1] sm:$0xff]  ;;  %v296_v35 = vld [vmem:[%s6810_s23 + $0xa] sm:$0xff]  ;;  %v4828_v40 = vld [vmem:[%s9704_s1 + $0x1f8] sm:$0xff] }
  0x25   : > { %5581 = vmatprep.subr.mxu1 %v329_v11  ;;  %5514 = vmatpush3.msra.mxu0 %v4765_v10  ;;  %v335_v32 = vld [vmem:[%s6810_s23 + $0x3] sm:$0xff]  ;;  %v6826_v37 = vld [vmem:[%s6810_s23 + $0x1b] sm:$0xff]  ;;  %v4785_v39 = vld [vmem:[%s9704_s1 + $0x170] sm:$0xff] }
  0x26   : > { %5582 = vmatpush3.msra.mxu1 %v329_v11  ;;  %5515 = vmatprep.subr.mxu0 %v4764_v12  ;;  %v295_v33 = vld [vmem:[%s6810_s23 + $0x2] sm:$0xff]  ;;  %v6829_v38 = vld [vmem:[%s6810_s23 + $0x1a] sm:$0xff]  ;;  %v6852_v45 = vld [vmem:[%s6810_s23 + $0x32] sm:$0xff] }
  0x27   : > { %5583 = vmatprep.subr.mxu1 %v328_v13  ;;  %5516 = vmatpush3.msra.mxu0 %v4764_v12  ;;  %v6839_v41 = vld [vmem:[%s6810_s23 + $0x23] sm:$0xff]  ;;  %v6846_v43 = vld [vmem:[%s6810_s23 + $0x33] sm:$0xff]  ;;  %v6858_v46 = vld [vmem:[%s6810_s23 + $0x3b] sm:$0xff] }
  0x28   : > { %5584 = vmatpush3.msra.mxu1 %v328_v13  ;;  %5517 = vmatprep.subr.mxu0 %v4763_v14  ;;  %v6842_v42 = vld [vmem:[%s6810_s23 + $0x22] sm:$0xff]  ;;  %v6861_v47 = vld [vmem:[%s6810_s23 + $0x3a] sm:$0xff]  ;;  %v6868_v49 = vld [vmem:[%s6810_s23 + $0x4b] sm:$0xff] }
  0x29   : > { %5585 = vmatprep.subr.mxu1 %v327_v15  ;;  %5518 = vmatpush3.msra.mxu0 %v4763_v14  ;;  %v4784_v44 = vld [vmem:[%s9704_s1 + $0x168] sm:$0xff]  ;;  %v4783_v48 = vld [vmem:[%s9704_s1 + $0x160] sm:$0xff]  ;;  %v4782_v51 = vld [vmem:[%s9704_s1 + $0x158] sm:$0xff] }
  0x2a   : > { %5586 = vmatpush3.msra.mxu1 %v327_v15  ;;  %5519 = vmatprep.subr.mxu0 %v4762_v16  ;;  %v6871_v50 = vld [vmem:[%s6810_s23 + $0x4a] sm:$0xff]  ;;  %v6883_v53 = vld [vmem:[%s6810_s23 + $0x53] sm:$0xff]  ;;  %v6893_v56 = vld [vmem:[%s6810_s23 + $0x62] sm:$0xff] }
  0x2b   : > { %5587 = vmatprep.subr.mxu1 %v326_v17  ;;  %5520 = vmatpush3.msra.mxu0 %v4762_v16  ;;  %v4827_v52 = vld [vmem:[%s9704_s1 + $0x1f0] sm:$0xff]  ;;  %v6890_v55 = vld [vmem:[%s6810_s23 + $0x63] sm:$0xff]  ;;  %v6912_v61 = vld [vmem:[%s6810_s23 + $0x7b] sm:$0xff] }
  0x2c   : > { %5588 = vmatpush3.msra.mxu1 %v326_v17  ;;  %5521 = vmatprep.subr.mxu0 %v4761_v18  ;;  %v6886_v54 = vld [vmem:[%s6810_s23 + $0x52] sm:$0xff]  ;;  %v6905_v59 = vld [vmem:[%s6810_s23 + $0x6a] sm:$0xff]  ;;  %v6915_v62 = vld [vmem:[%s6810_s23 + $0x7a] sm:$0xff] }
  0x2d   : > { %5589 = vmatprep.subr.mxu1 %v325_v19  ;;  %5522 = vmatpush3.msra.mxu0 %v4761_v18  ;;  %v4781_v57 = vld [vmem:[%s9704_s1 + $0x150] sm:$0xff]  ;;  %v4780_v60 = vld [vmem:[%s9704_s1 + $0x148] sm:$0xff]  ;;  %v4779_v63 = vld [vmem:[%s9704_s1 + $0x140] sm:$0xff] }
  0x2e   : > { %5590 = vmatpush3.msra.mxu1 %v325_v19  ;;  %5523 = vmatprep.subr.mxu0 %v4760_v20  ;;  %v6902_v58 = vld [vmem:[%s6810_s23 + $0x6b] sm:$0xff]  ;;  %v6927_v1 = vld [vmem:[%s6810_s23 + $0x83] sm:$0xff]  ;;  %v6934_v3 = vld [vmem:[%s6810_s23 + $0x93] sm:$0xff] }
  0x2f   : > { %5591 = vmatprep.subr.mxu1 %v324_v21  ;;  %5524 = vmatpush3.msra.mxu0 %v4760_v20  ;;  %v4826_v0 = vld [vmem:[%s9704_s1 + $0x1e8] sm:$0xff]  ;;  %v6937_v4 = vld [vmem:[%s6810_s23 + $0x92] sm:$0xff]  ;;  %v4825_v6 = vld [vmem:[%s9704_s1 + $0x1e0] sm:$0xff] }
  0x30   : > { %5592 = vmatpush3.msra.mxu1 %v324_v21  ;;  %5525 = vmatprep.subr.mxu0 %v4759_v22  ;;  %v6930_v2 = vld [vmem:[%s6810_s23 + $0x82] sm:$0xff]  ;;  %v4778_v5 = vld [vmem:[%s9704_s1 + $0x138] sm:$0xff]  ;;  %v6959_v10 = vld [vmem:[%s6810_s23 + $0xab] sm:$0xff] }
  0x31   : > { %5593 = vmatprep.subr.mxu1 %v323_v23  ;;  %5526 = vmatpush3.msra.mxu0 %v4759_v22  ;;  %v6949_v7 = vld [vmem:[%s6810_s23 + $0x9b] sm:$0xff]  ;;  %v6964_v11 = vld [vmem:[%s6810_s23 + $0xaa] sm:$0xff]  ;;  %v6970_v13 = vld [vmem:[%s6810_s23 + $0xb3] sm:$0xff] }
  0x32   : > { %5594 = vmatpush3.msra.mxu1 %v323_v23  ;;  %5527 = vmatprep.subr.mxu0 %v4758_v24  ;;  %v6952_v8 = vld [vmem:[%s6810_s23 + $0x9a] sm:$0xff]  ;;  %v4777_v12 = vld [vmem:[%s9704_s1 + $0x130] sm:$0xff]  ;;  %v4776_v16 = vld [vmem:[%s9704_s1 + $0x128] sm:$0xff] }
  0x33   : > { %5595 = vmatprep.subr.mxu1 %v322_v25  ;;  %5528 = vmatpush3.msra.mxu0 %v4758_v24  ;;  %v4824_v9 = vld [vmem:[%s9704_s1 + $0x1d8] sm:$0xff]  ;;  %v4823_v15 = vld [vmem:[%s9704_s1 + $0x1d0] sm:$0xff]  ;;  %v6985_v17 = vld [vmem:[%s6810_s23 + $0xc3] sm:$0xff] }
  0x34   : > { %5596 = vmatpush3.msra.mxu1 %v322_v25  ;;  %5529 = vmatprep.subr.mxu0 %v4757_v26  ;;  %v6974_v14 = vld [vmem:[%s6810_s23 + $0xb2] sm:$0xff]  ;;  %v4822_v18 = vld [vmem:[%s9704_s1 + $0x1c8] sm:$0xff]  ;;  %v4821_v22 = vld [vmem:[%s9704_s1 + $0x1c0] sm:$0xff] }
  0x35   : > { %5597 = vmatprep.subr.mxu1 %v321_v27  ;;  %5530 = vmatpush3.msra.mxu0 %v4757_v26  ;;  %v6992_v19 = vld [vmem:[%s6810_s23 + $0xc2] sm:$0xff]  ;;  %v6996_v20 = vld [vmem:[%s6810_s23 + $0xcb] sm:$0xff]  ;;  %v4820_v24 = vld [vmem:[%s9704_s1 + $0x1b8] sm:$0xff] }
  0x36   : > { %5598 = vmatpush3.msra.mxu1 %v321_v27  ;;  %5531 = vmatprep.subr.mxu0 %v4756_v28  ;;  %v6999_v21 = vld [vmem:[%s6810_s23 + $0xca] sm:$0xff]  ;;  %v4775_v23 = vld [vmem:[%s9704_s1 + $0x120] sm:$0xff] }
  0x37   : > { %5599 = vmatprep.subr.mxu1 %v320_v29  ;;  %5532 = vmatpush3.msra.mxu0 %v4756_v28  ;;  %v7014_v25 = vld [vmem:[%s6810_s23 + $0xdb] sm:$0xff]  ;;  %v7020_v27 = vld [vmem:[%s6810_s23 + $0xe3] sm:$0xff] }
  0x38   : > { %5600 = vmatpush3.msra.mxu1 %v320_v29  ;;  %5533 = vmatprep.subr.mxu0 %v4755_v30  ;;  %v7017_v26 = vld [vmem:[%s6810_s23 + $0xda] sm:$0xff]  ;;  %v7023_v28 = vld [vmem:[%s6810_s23 + $0xe2] sm:$0xff] }
  0x39   : > { %5601 = vmatprep.subr.mxu1 %v319_v31  ;;  %5534 = vmatpush3.msra.mxu0 %v4755_v30  ;;  %v4774_v29 = vld [vmem:[%s9704_s1 + $0x118] sm:$0xff]  ;;  %v4819_v30 = vld [vmem:[%s9704_s1 + $0x1b0] sm:$0xff] }
  0x3a   : > { %5535 = vmatprep.mubr.f32.mxu0 %v335_v32  ;;  %5602 = vmatpush3.msra.mxu1 %v319_v31  ;;  %v4818_v31 = vld [vmem:[%s9704_s1 + $0x1a8] sm:$0xff]  ;;  %v7039_v32 = vld [vmem:[%s6810_s23 + $0xf3] sm:$0xff] }
  0x3b   : > { %5603 = vmatprep.mubr.f32.mxu1 %v295_v33  ;;  %5536 = vmatmul.mubr.f32.vlgmr.msra.gmra.mxu0 %v336_v34  ;;  %v7042_v33 = vld [vmem:[%s6810_s23 + $0xf2] sm:$0xff] }
  0x3c   : > { %5604 = vmatmul.mubr.f32.vlgmr.msra.gmra.mxu1 %v296_v35  ;;  %5639 = vmatprep.subr.mxu0 %v4786_v36  ;;  %v4773_v34 = vld [vmem:[%s9704_s1 + $0x110] sm:$0xff]  ;;  %v7048_v35 = vld [vmem:[%s6810_s23 + $0xfb] sm:$0xff] }
  0x3d   : > { %5538 = vmatprep.mubr.f32.mxu0 %v6826_v37  ;;  %5640 = vmatpush3.msra.mxu0 %v4786_v36  ;;  %v7052_v36 = vld [vmem:[%s6810_s23 + $0xfa] sm:$0xff] }
  0x3e   : > { %5606 = vmatprep.mubr.f32.mxu1 %v6829_v38  ;;  %5641 = vmatprep.subr.mxu0 %v4785_v39 }
  0x3f   : > { %5707 = vmatprep.subr.mxu1 %v4828_v40  ;;  %5539 = vmatmul.mubr.f32.gmra.mxu0 %v6839_v41 }
  0x40   : > { %5607 = vmatmul.mubr.f32.gmra.mxu1 %v6842_v42  ;;  %5642 = vmatpush3.msra.mxu0 %v4785_v39  ;;  %v4817_v39 = vld [vmem:[%s9704_s1 + $0x1a0] sm:$0xff] }
  0x41   : > { %5541 = vmatprep.mubr.f32.mxu0 %v6846_v43  ;;  %5643 = vmatprep.subr.mxu0 %v4784_v44 }
  0x42   : > { %5609 = vmatprep.mubr.f32.mxu1 %v6852_v45  ;;  %5644 = vmatpush3.msra.mxu0 %v4784_v44  ;;  %v7063_v44 = vld [vmem:[%s6810_s23 + $0x10b] sm:$0xff] }
  0x43   : > { %5708 = vmatpush3.msra.mxu1 %v4828_v40  ;;  %5542 = vmatmul.mubr.f32.gmra.mxu0 %v6858_v46  ;;  %v4772_v40 = vld [vmem:[%s9704_s1 + $0x108] sm:$0xff] }
  0x44   : > { %5610 = vmatmul.mubr.f32.gmra.mxu1 %v6861_v47  ;;  %5645 = vmatprep.subr.mxu0 %v4783_v48 }
  0x45   : > { %5544 = vmatprep.mubr.f32.mxu0 %v6868_v49  ;;  %5646 = vmatpush3.msra.mxu0 %v4783_v48  ;;  %v4816_v48 = vld [vmem:[%s9704_s1 + $0x198] sm:$0xff] }
  0x46   : > { %5612 = vmatprep.mubr.f32.mxu1 %v6871_v50  ;;  %5647 = vmatprep.subr.mxu0 %v4782_v51 }
  0x47   : > { %5709 = vmatprep.subr.mxu1 %v4827_v52  ;;  %5545 = vmatmul.mubr.f32.gmra.mxu0 %v6883_v53 }
  0x48   : > { %5613 = vmatmul.mubr.f32.gmra.mxu1 %v6886_v54  ;;  %5648 = vmatpush3.msra.mxu0 %v4782_v51  ;;  %v7070_v51 = vld [vmem:[%s6810_s23 + $0x10a] sm:$0xff] }
  0x49   : > { %5547 = vmatprep.mubr.f32.mxu0 %v6890_v55  ;;  %5615 = vmatprep.mubr.f32.mxu1 %v6893_v56 }
  0x4a   : > { %5649 = vmatprep.subr.mxu0 %v4781_v57  ;;  %5710 = vmatpush3.msra.mxu1 %v4827_v52  ;;  %v7074_v52 = vld [vmem:[%s6810_s23 + $0x113] sm:$0xff] }
  0x4b   : > { %5650 = vmatpush3.msra.mxu0 %v4781_v57  ;;  %5711 = vmatprep.subr.mxu1 %v4826_v0  ;;  %v7077_v57 = vld [vmem:[%s6810_s23 + $0x112] sm:$0xff] }
  0x4c   : > { %5548 = vmatmul.mubr.f32.gmra.mxu0 %v6902_v58  ;;  %5616 = vmatmul.mubr.f32.gmra.mxu1 %v6905_v59 }
  0x4d   : > { %5651 = vmatprep.subr.mxu0 %v4780_v60  ;;  %5550 = vmatprep.mubr.f32.mxu0 %v6912_v61 }
  0x4e   : > { %5618 = vmatprep.mubr.f32.mxu1 %v6915_v62  ;;  %5652 = vmatpush3.msra.mxu0 %v4780_v60  ;;  %v4815_v60 = vld [vmem:[%s9704_s1 + $0x190] sm:$0xff] }
  0x4f   : > { %5653 = vmatprep.subr.mxu0 %v4779_v63  ;;  %5712 = vmatpush3.msra.mxu1 %v4826_v0  ;;  %v4814_v0 = vld [vmem:[%s9704_s1 + $0x188] sm:$0xff] }
  0x50   : > { %5551 = vmatmul.mubr.f32.gmra.mxu0 %v6927_v1  ;;  %5619 = vmatmul.mubr.f32.gmra.mxu1 %v6930_v2 }
  0x51   : > { %5654 = vmatpush3.msra.mxu0 %v4779_v63  ;;  %5553 = vmatprep.mubr.f32.mxu0 %v6934_v3  ;;  %v4771_v63 = vld [vmem:[%s9704_s1 + $0x100] sm:$0xff] }
  0x52   : > { %5621 = vmatprep.mubr.f32.mxu1 %v6937_v4  ;;  %5655 = vmatprep.subr.mxu0 %v4778_v5 }
  0x53   : > { %5713 = vmatprep.subr.mxu1 %v4825_v6  ;;  %5656 = vmatpush3.msra.mxu0 %v4778_v5  ;;  %v746_v5 = vld [vmem:[%s6810_s23 + $0x4] sm:$0xff] }
  0x54   : > { %5554 = vmatmul.mubr.f32.gmra.mxu0 %v6949_v7  ;;  %5622 = vmatmul.mubr.f32.gmra.mxu1 %v6952_v8 }
  0x55   : > { %5714 = vmatpush3.msra.mxu1 %v4825_v6  ;;  %5556 = vmatprep.mubr.f32.mxu0 %v6959_v10  ;;  %v747_v6 = vld [vmem:[%s6810_s23 + $0xc] sm:$0xff] }
  0x56   : > { %5715 = vmatprep.subr.mxu1 %v4824_v9  ;;  %5624 = vmatprep.mubr.f32.mxu1 %v6964_v11 }
  0x57   : > { %5657 = vmatprep.subr.mxu0 %v4777_v12  ;;  %5716 = vmatpush3.msra.mxu1 %v4824_v9  ;;  %v4813_v9 = vld [vmem:[%s9704_s1 + $0x180] sm:$0xff] }
  0x58   : > { %5557 = vmatmul.mubr.f32.gmra.mxu0 %v6970_v13  ;;  %5625 = vmatmul.mubr.f32.gmra.mxu1 %v6974_v14 }
  0x59   : > { %5658 = vmatpush3.msra.mxu0 %v4777_v12  ;;  %5717 = vmatprep.subr.mxu1 %v4823_v15  ;;  %v4868_v12 = vld [vmem:[%s9704_s1 + $0x278] sm:$0xff] }
  0x5a   : > { %5659 = vmatprep.subr.mxu0 %v4776_v16  ;;  %5718 = vmatpush3.msra.mxu1 %v4823_v15  ;;  %v7100_v15 = vld [vmem:[%s6810_s23 + $0x1c] sm:$0xff] }
  0x5b   : > { %5559 = vmatprep.mubr.f32.mxu0 %v6985_v17  ;;  %5719 = vmatprep.subr.mxu1 %v4822_v18 }
  0x5c   : > { %5627 = vmatprep.mubr.f32.mxu1 %v6992_v19  ;;  %5660 = vmatpush3.msra.mxu0 %v4776_v16  ;;  %v4867_v16 = vld [vmem:[%s9704_s1 + $0x270] sm:$0xff] }
  0x5d   : > { %5720 = vmatpush3.msra.mxu1 %v4822_v18  ;;  %5560 = vmatmul.mubr.f32.gmra.mxu0 %v6996_v20  ;;  %v7107_v18 = vld [vmem:[%s6810_s23 + $0x24] sm:$0xff] }
  0x5e   : > { %5628 = vmatmul.mubr.f32.gmra.mxu1 %v6999_v21  ;;  %5721 = vmatprep.subr.mxu1 %v4821_v22 }
  0x5f   : > { %5661 = vmatprep.subr.mxu0 %v4775_v23  ;;  %5722 = vmatpush3.msra.mxu1 %v4821_v22  ;;  %v7111_v22 = vld [vmem:[%s6810_s23 + $0x34] sm:$0xff] }
  0x60   : > { %5662 = vmatpush3.msra.mxu0 %v4775_v23  ;;  %5723 = vmatprep.subr.mxu1 %v4820_v24  ;;  %v4866_v23 = vld [vmem:[%s9704_s1 + $0x268] sm:$0xff] }
  0x61   : > { %5562 = vmatprep.mubr.f32.mxu0 %v7014_v25  ;;  %5630 = vmatprep.mubr.f32.mxu1 %v7017_v26 }
  0x62   : > { %5724 = vmatpush3.msra.mxu1 %v4820_v24  ;;  %5563 = vmatmul.mubr.f32.gmra.mxu0 %v7020_v27  ;;  %v7128_v24 = vld [vmem:[%s6810_s23 + $0x4c] sm:$0xff] }
  0x63   : > { %5631 = vmatmul.mubr.f32.gmra.mxu1 %v7023_v28  ;;  %5663 = vmatprep.subr.mxu0 %v4774_v29 }
  0x64   : > { %5725 = vmatprep.subr.mxu1 %v4819_v30  ;;  %5664 = vmatpush3.msra.mxu0 %v4774_v29  ;;  %v7137_v29 = vld [vmem:[%s6810_s23 + $0x54] sm:$0xff] }
  0x65   : > { %5726 = vmatpush3.msra.mxu1 %v4819_v30  ;;  %5565 = vmatprep.mubr.f32.mxu0 %v7039_v32  ;;  %v4862_v30 = vld [vmem:[%s9704_s1 + $0x248] sm:$0xff] }
  0x66   : > { %5727 = vmatprep.subr.mxu1 %v4818_v31  ;;  %5633 = vmatprep.mubr.f32.mxu1 %v7042_v33 }
  0x67   : > { %5665 = vmatprep.subr.mxu0 %v4773_v34  ;;  %5728 = vmatpush3.msra.mxu1 %v4818_v31  ;;  %v4908_v31 = vld [vmem:[%s9704_s1 + $0x2f8] sm:$0xff] }
  0x68   : > { %5566 = vmatmul.mubr.f32.gmra.mxu0 %v7048_v35  ;;  %5634 = vmatmul.mubr.f32.gmra.mxu1 %v7052_v36 }
  0x69   : > { %5666 = vmatpush3.msra.mxu0 %v4773_v34  ;;  %5729 = vmatprep.subr.mxu1 %v4817_v39  ;;  %v4907_v34 = vld [vmem:[%s9704_s1 + $0x2f0] sm:$0xff] }
  0x6a   : > { %5667 = vmatprep.subr.mxu0 %v4772_v40  ;;  %5730 = vmatpush3.msra.mxu1 %v4817_v39  ;;  %v4861_v39 = vld [vmem:[%s9704_s1 + $0x240] sm:$0xff] }
  0x6b   : > { %5568 = vmatprep.mubr.f32.mxu0 %v7063_v44  ;;  %5731 = vmatprep.subr.mxu1 %v4816_v48 }
  0x6c   : > { %5636 = vmatprep.mubr.f32.mxu1 %v7070_v51  ;;  %5668 = vmatpush3.msra.mxu0 %v4772_v40  ;;  %v7180_v40 = vld [vmem:[%s6810_s23 + $0x94] sm:$0xff] }
  0x6d   : > { %5732 = vmatpush3.msra.mxu1 %v4816_v48  ;;  %5569 = vmatmul.mubr.f32.gmra.mxu0 %v7074_v52  ;;  %v4860_v48 = vld [vmem:[%s9704_s1 + $0x238] sm:$0xff] }
  0x6e   : > { %5637 = vmatmul.mubr.f32.gmra.mxu1 %v7077_v57  ;;  %5733 = vmatprep.subr.mxu1 %v4815_v60 }
  0x6f   : > { %5669 = vmatprep.subr.mxu0 %v4771_v63  ;;  %5734 = vmatpush3.msra.mxu1 %v4815_v60  ;;  %v4905_v60 = vld [vmem:[%s9704_s1 + $0x2e0] sm:$0xff] }
  0x70   : > { %5670 = vmatpush3.msra.mxu0 %v4771_v63  ;;  %5735 = vmatprep.subr.mxu1 %v4814_v0  ;;  %v4904_v63 = vld [vmem:[%s9704_s1 + $0x2d8] sm:$0xff] }
  0x71   : > { %5671 = vmatprep.mubr.f32.mxu0 %v746_v5  ;;  %5736 = vmatpush3.msra.mxu1 %v4814_v0  ;;  %v7207_v0 = vld [vmem:[%s6810_s23 + $0xb4] sm:$0xff] }
  0x72   : > { %5672 = vmatmul.mubr.f32.vlgmr.msra.gmra.mxu0 %v747_v6  ;;  %5737 = vmatprep.subr.mxu1 %v4813_v9  ;;  %v4903_v5 = vld [vmem:[%s9704_s1 + $0x2d0] sm:$0xff]  ;;  %v4902_v6 = vld [vmem:[%s9704_s1 + $0x2c8] sm:$0xff] }
  0x73   : > { %5775 = vmatprep.subr.mxu0 %v4868_v12  ;;  %5738 = vmatpush3.msra.mxu1 %v4813_v9  ;;  %v7222_v9 = vld [vmem:[%s6810_s23 + $0xc4] sm:$0xff] }
  0x74   : > { %5739 = vmatprep.mubr.f32.mxu1 %v6829_v38  ;;  %5776 = vmatpush3.msra.mxu0 %v4868_v12  ;;  %v7121_v38 = vld [vmem:[%s6810_s23 + $0x3c] sm:$0xff] }
  0x75   : > { %5740 = vmatmul.mubr.f32.vlgmr.msra.gmra.mxu1 %v6842_v42  ;;  %5674 = vmatprep.mubr.f32.mxu0 %v7100_v15  ;;  %v4865_v42 = vld [vmem:[%s9704_s1 + $0x260] sm:$0xff] }
  0x76   : > { %5777 = vmatprep.subr.mxu0 %v4867_v16  ;;  %5675 = vmatmul.mubr.f32.gmra.mxu0 %v7107_v18  ;;  %v4901_v12 = vld [vmem:[%s9704_s1 + $0x2c0] sm:$0xff] }
  0x77   : > { %5742 = vmatprep.mubr.f32.mxu1 %v6852_v45  ;;  %5778 = vmatpush3.msra.mxu0 %v4867_v16  ;;  %v4864_v45 = vld [vmem:[%s9704_s1 + $0x258] sm:$0xff] }
  0x78   : > { %5677 = vmatprep.mubr.f32.mxu0 %v7111_v22  ;;  %5779 = vmatprep.subr.mxu0 %v4866_v23  ;;  %v7241_v16 = vld [vmem:[%s6810_s23 + $0xdc] sm:$0xff] }
  0x79   : > { %5743 = vmatmul.mubr.f32.gmra.mxu1 %v6861_v47  ;;  %5780 = vmatpush3.msra.mxu0 %v4866_v23  ;;  %v4863_v47 = vld [vmem:[%s9704_s1 + $0x250] sm:$0xff]  ;;  %v7244_v23 = vld [vmem:[%s6810_s23 + $0xe4] sm:$0xff] }
  0x7a   : > { %5745 = vmatprep.mubr.f32.mxu1 %v6871_v50  ;;  %5678 = vmatmul.mubr.f32.gmra.mxu0 %v7121_v38  ;;  %v7144_v50 = vld [vmem:[%s6810_s23 + $0x64] sm:$0xff] }
  0x7b   : > { %5781 = vmatprep.subr.mxu0 %v4865_v42  ;;  %5680 = vmatprep.mubr.f32.mxu0 %v7128_v24 }
  0x7c   : > { %5782 = vmatpush3.msra.mxu0 %v4865_v42  ;;  %5843 = vmatprep.subr.mxu1 %v4908_v31  ;;  %v4856_v42 = vld [vmem:[%s9704_s1 + $0x218] sm:$0xff] }
  0x7d   : > { %5746 = vmatmul.mubr.f32.gmra.mxu1 %v6886_v54  ;;  %5783 = vmatprep.subr.mxu0 %v4864_v45  ;;  %v7156_v54 = vld [vmem:[%s6810_s23 + $0x6c] sm:$0xff] }
  0x7e   : > { %5748 = vmatprep.mubr.f32.mxu1 %v6893_v56  ;;  %5784 = vmatpush3.msra.mxu0 %v4864_v45  ;;  %v7160_v56 = vld [vmem:[%s6810_s23 + $0x7c] sm:$0xff]  ;;  %v7256_v45 = vld [vmem:[%s6810_s23 + $0xf4] sm:$0xff] }
  0x7f   : > { %5681 = vmatmul.mubr.f32.gmra.mxu0 %v7137_v29  ;;  %5785 = vmatprep.subr.mxu0 %v4863_v47 }
  0x80   : > { %5683 = vmatprep.mubr.f32.mxu0 %v7144_v50  ;;  %5786 = vmatpush3.msra.mxu0 %v4863_v47  ;;  %v4855_v47 = vld [vmem:[%s9704_s1 + $0x210] sm:$0xff] }
  0x81   : > { %5749 = vmatmul.mubr.f32.gmra.mxu1 %v6905_v59  ;;  %5787 = vmatprep.subr.mxu0 %v4862_v30  ;;  %v7172_v59 = vld [vmem:[%s6810_s23 + $0x84] sm:$0xff] }
  0x82   : > { %5751 = vmatprep.mubr.f32.mxu1 %v6915_v62  ;;  %5844 = vmatpush3.msra.mxu1 %v4908_v31  ;;  %v4906_v62 = vld [vmem:[%s9704_s1 + $0x2e8] sm:$0xff]  ;;  %v4897_v31 = vld [vmem:[%s9704_s1 + $0x2a0] sm:$0xff] }
  0x83   : > { %5684 = vmatmul.mubr.f32.gmra.mxu0 %v7156_v54  ;;  %5845 = vmatprep.subr.mxu1 %v4907_v34 }
  0x84   : > { %5686 = vmatprep.mubr.f32.mxu0 %v7160_v56  ;;  %5788 = vmatpush3.msra.mxu0 %v4862_v30  ;;  %v7267_v30 = vld [vmem:[%s6810_s23 + $0xfc] sm:$0xff] }
  0x85   : > { %5752 = vmatmul.mubr.f32.gmra.mxu1 %v6930_v2  ;;  %5789 = vmatprep.subr.mxu0 %v4861_v39  ;;  %v7187_v2 = vld [vmem:[%s6810_s23 + $0x9c] sm:$0xff] }
  0x86   : > { %5754 = vmatprep.mubr.f32.mxu1 %v6937_v4  ;;  %5846 = vmatpush3.msra.mxu1 %v4907_v34  ;;  %v7195_v4 = vld [vmem:[%s6810_s23 + $0xac] sm:$0xff]  ;;  %v4896_v34 = vld [vmem:[%s9704_s1 + $0x298] sm:$0xff] }
  0x87   : > { %5687 = vmatmul.mubr.f32.gmra.mxu0 %v7172_v59  ;;  %5847 = vmatprep.subr.mxu1 %v4906_v62 }
  0x88   : > { %5790 = vmatpush3.msra.mxu0 %v4861_v39  ;;  %5689 = vmatprep.mubr.f32.mxu0 %v7180_v40  ;;  %v7285_v39 = vld [vmem:[%s6810_s23 + $0x114] sm:$0xff] }
  0x89   : > { %5755 = vmatmul.mubr.f32.gmra.mxu1 %v6952_v8  ;;  %5791 = vmatprep.subr.mxu0 %v4860_v48  ;;  %v4859_v8 = vld [vmem:[%s9704_s1 + $0x230] sm:$0xff] }
  0x8a   : > { %5848 = vmatpush3.msra.mxu1 %v4906_v62  ;;  %5757 = vmatprep.mubr.f32.mxu1 %v6964_v11  ;;  %v4858_v11 = vld [vmem:[%s9704_s1 + $0x228] sm:$0xff]  ;;  %v4895_v62 = vld [vmem:[%s9704_s1 + $0x290] sm:$0xff] }
  0x8b   : > { %5690 = vmatmul.mubr.f32.gmra.mxu0 %v7187_v2  ;;  %5849 = vmatprep.subr.mxu1 %v4905_v60 }
  0x8c   : > { %5792 = vmatpush3.msra.mxu0 %v4860_v48  ;;  %5850 = vmatpush3.msra.mxu1 %v4905_v60  ;;  %v7292_v48 = vld [vmem:[%s6810_s23 + $0x122] sm:$0xff] }
  0x8d   : > { %5692 = vmatprep.mubr.f32.mxu0 %v7195_v4  ;;  %5758 = vmatmul.mubr.f32.gmra.mxu1 %v6974_v14  ;;  %v7225_v14 = vld [vmem:[%s6810_s23 + $0xcc] sm:$0xff]  ;;  %v4853_v60 = vld [vmem:[%s9704_s1 + $0x200] sm:$0xff] }
  0x8e   : > { %5851 = vmatprep.subr.mxu1 %v4904_v63  ;;  %5793 = vmatprep.subr.mxu0 %v4859_v8 }
  0x8f   : > { %5852 = vmatpush3.msra.mxu1 %v4904_v63  ;;  %5693 = vmatmul.mubr.f32.gmra.mxu0 %v7207_v0  ;;  %v7300_v63 = vld [vmem:[%s6810_s23 + $0x12a] sm:$0xff] }
  0x90   : > { %5853 = vmatprep.subr.mxu1 %v4903_v5  ;;  %5794 = vmatpush3.msra.mxu0 %v4859_v8  ;;  %v4894_v8 = vld [vmem:[%s9704_s1 + $0x288] sm:$0xff] }
  0x91   : > { %5760 = vmatprep.mubr.f32.mxu1 %v6992_v19  ;;  %5854 = vmatpush3.msra.mxu1 %v4903_v5  ;;  %v4857_v19 = vld [vmem:[%s9704_s1 + $0x220] sm:$0xff] }
  0x92   : > { %5795 = vmatprep.subr.mxu0 %v4858_v11  ;;  %5761 = vmatmul.mubr.f32.gmra.mxu1 %v6999_v21  ;;  %v4900_v21 = vld [vmem:[%s9704_s1 + $0x2b8] sm:$0xff]  ;;  %v4893_v5 = vld [vmem:[%s9704_s1 + $0x280] sm:$0xff] }
  0x93   : > { %5855 = vmatprep.subr.mxu1 %v4902_v6  ;;  %5695 = vmatprep.mubr.f32.mxu0 %v7222_v9 }
  0x94   : > { %5796 = vmatpush3.msra.mxu0 %v4858_v11  ;;  %5856 = vmatpush3.msra.mxu1 %v4902_v6  ;;  %v4950_v11 = vld [vmem:[%s9704_s1 + $0x378] sm:$0xff]  ;;  %v4949_v6 = vld [vmem:[%s9704_s1 + $0x370] sm:$0xff] }
  0x95   : > { %5696 = vmatmul.mubr.f32.gmra.mxu0 %v7225_v14  ;;  %5857 = vmatprep.subr.mxu1 %v4901_v12 }
  0x96   : > { %5763 = vmatprep.mubr.f32.mxu1 %v7017_v26  ;;  %5797 = vmatprep.subr.mxu0 %v4857_v19  ;;  %v4899_v26 = vld [vmem:[%s9704_s1 + $0x2b0] sm:$0xff] }
  0x97   : > { %5858 = vmatpush3.msra.mxu1 %v4901_v12  ;;  %5798 = vmatpush3.msra.mxu0 %v4857_v19  ;;  %v4982_v12 = vld [vmem:[%s9704_s1 + $0x3b8] sm:$0xff]  ;;  %v4980_v19 = vld [vmem:[%s9704_s1 + $0x3a8] sm:$0xff] }
  0x98   : > { %5764 = vmatmul.mubr.f32.gmra.mxu1 %v7023_v28  ;;  %5859 = vmatprep.subr.mxu1 %v4900_v21  ;;  %v4898_v28 = vld [vmem:[%s9704_s1 + $0x2a8] sm:$0xff] }
  0x99   : > { %5698 = vmatprep.mubr.f32.mxu0 %v7241_v16  ;;  %5860 = vmatpush3.msra.mxu1 %v4900_v21  ;;  %v4937_v21 = vld [vmem:[%s9704_s1 + $0x310] sm:$0xff] }
  0x9a   : > { %5699 = vmatmul.mubr.f32.gmra.mxu0 %v7244_v23  ;;  %5799 = vmatprep.subr.mxu0 %v4856_v42 }
  0x9b   : > { %5861 = vmatprep.subr.mxu1 %v4899_v26  ;;  %5766 = vmatprep.mubr.f32.mxu1 %v7042_v33  ;;  %v4854_v33 = vld [vmem:[%s9704_s1 + $0x208] sm:$0xff] }
  0x9c   : > { %5800 = vmatpush3.msra.mxu0 %v4856_v42  ;;  %5862 = vmatpush3.msra.mxu1 %v4899_v26  ;;  %v7438_v42 = vld [vmem:[%s6810_s23 + $0x123] sm:$0xff]  ;;  %v7441_v26 = vld [vmem:[%s6810_s23 + $0x12b] sm:$0xff] }
  0x9d   : > { %5701 = vmatprep.mubr.f32.mxu0 %v7256_v45  ;;  %5767 = vmatmul.mubr.f32.gmra.mxu1 %v7052_v36  ;;  %v7282_v36 = vld [vmem:[%s6810_s23 + $0x10c] sm:$0xff] }
  0x9e   : > { %5863 = vmatprep.subr.mxu1 %v4898_v28  ;;  %5801 = vmatprep.subr.mxu0 %v4855_v47 }
  0x9f   : > { %5864 = vmatpush3.msra.mxu1 %v4898_v28  ;;  %5702 = vmatmul.mubr.f32.gmra.mxu0 %v7267_v30  ;;  %v7448_v28 = vld [vmem:[%s6810_s23 + $0x124] sm:$0xff] }
  0xa0   : > { %5865 = vmatprep.subr.mxu1 %v4897_v31  ;;  %5802 = vmatpush3.msra.mxu0 %v4855_v47  ;;  %v4935_v47 = vld [vmem:[%s9704_s1 + $0x300] sm:$0xff] }
  0xa1   : > { %5769 = vmatprep.mubr.f32.mxu1 %v7070_v51  ;;  %5866 = vmatpush3.msra.mxu1 %v4897_v31  ;;  %v7456_v31 = vld [vmem:[%s6810_s23 + $0x12c] sm:$0xff] }
  0xa2   : > { %5803 = vmatprep.subr.mxu0 %v4854_v33  ;;  %5770 = vmatmul.mubr.f32.gmra.mxu1 %v7077_v57 }
  0xa3   : > { %5867 = vmatprep.subr.mxu1 %v4896_v34  ;;  %5704 = vmatprep.mubr.f32.mxu0 %v7282_v36 }
  0xa4   : > { %5804 = vmatpush3.msra.mxu0 %v4854_v33  ;;  %5868 = vmatpush3.msra.mxu1 %v4896_v34  ;;  %v4976_v33 = vld [vmem:[%s9704_s1 + $0x388] sm:$0xff]  ;;  %v4911_v34 = vld [vmem:[%s6810_s23 + $0x32] sm:$0xff] }
  0xa5   : > { %5705 = vmatmul.mubr.f32.gmra.mxu0 %v7285_v39  ;;  %5869 = vmatprep.subr.mxu1 %v4895_v62 }
  0xa6   : > { %5772 = vmatprep.mubr.f32.mxu1 %v7292_v48  ;;  %5805 = vmatprep.subr.mxu0 %v4853_v60 }
  0xa7   : > { %5870 = vmatpush3.msra.mxu1 %v4895_v62  ;;  %5806 = vmatpush3.msra.mxu0 %v4853_v60  ;;  %v4912_v62 = vld [vmem:[%s6810_s23 + $0x3a] sm:$0xff] }
  0xa8   : > { %5773 = vmatmul.mubr.f32.gmra.mxu1 %v7300_v63  ;;  %5871 = vmatprep.subr.mxu1 %v4894_v8  ;;  %v4975_v60 = vld [vmem:[%s9704_s1 + $0x380] sm:$0xff] }
  0xa9   : > { %5807 = vmatprep.mubr.f32.mxu0 %v6826_v37  ;;  %5872 = vmatpush3.msra.mxu1 %v4894_v8  ;;  %v4948_v37 = vld [vmem:[%s9704_s1 + $0x368] sm:$0xff]  ;;  %v5030_v8 = vld [vmem:[%s9704_s1 + $0x478] sm:$0xff] }
  0xaa   : > { %5808 = vmatmul.mubr.f32.vlgmr.msra.gmra.mxu0 %v6839_v41  ;;  %5873 = vmatprep.subr.mxu1 %v4893_v5  ;;  %v4947_v41 = vld [vmem:[%s9704_s1 + $0x360] sm:$0xff] }
  0xab   : > { %5911 = vmatprep.subr.mxu0 %v4950_v11  ;;  %5874 = vmatpush3.msra.mxu1 %v4893_v5  ;;  %v4951_v5 = vld [vmem:[%s6810_s23 + $0x33] sm:$0xff] }
  0xac   : > { %5875 = vmatprep.mubr.f32.mxu1 %v7100_v15  ;;  %5912 = vmatpush3.msra.mxu0 %v4950_v11  ;;  %v4941_v15 = vld [vmem:[%s9704_s1 + $0x330] sm:$0xff]  ;;  %v4952_v11 = vld [vmem:[%s6810_s23 + $0x3b] sm:$0xff] }
  0xad   : > { %5876 = vmatmul.mubr.f32.vlgmr.msra.gmra.mxu1 %v7107_v18  ;;  %5810 = vmatprep.mubr.f32.mxu0 %v6846_v43  ;;  %v4946_v43 = vld [vmem:[%s9704_s1 + $0x358] sm:$0xff]  ;;  %v4983_v18 = vld [vmem:[%s9704_s1 + $0x3c0] sm:$0xff] }
  0xae   : > { %5913 = vmatprep.subr.mxu0 %v4949_v6  ;;  %5811 = vmatmul.mubr.f32.gmra.mxu0 %v6858_v46  ;;  %v4945_v46 = vld [vmem:[%s9704_s1 + $0x350] sm:$0xff] }
  0xaf   : > { %5878 = vmatprep.mubr.f32.mxu1 %v7111_v22  ;;  %5914 = vmatpush3.msra.mxu0 %v4949_v6  ;;  %v4913_v6 = vld [vmem:[%s6810_s23 + $0x4a] sm:$0xff] }
  0xb0   : > { %5813 = vmatprep.mubr.f32.mxu0 %v6868_v49  ;;  %5915 = vmatprep.subr.mxu0 %v4948_v37  ;;  %v4944_v49 = vld [vmem:[%s9704_s1 + $0x348] sm:$0xff] }
  0xb1   : > { %5879 = vmatmul.mubr.f32.gmra.mxu1 %v7121_v38  ;;  %5916 = vmatpush3.msra.mxu0 %v4948_v37  ;;  %v5029_v37 = vld [vmem:[%s9704_s1 + $0x470] sm:$0xff] }
  0xb2   : > { %5881 = vmatprep.mubr.f32.mxu1 %v7128_v24  ;;  %5814 = vmatmul.mubr.f32.gmra.mxu0 %v6883_v53  ;;  %v4990_v53 = vld [vmem:[%s9704_s1 + $0x3f8] sm:$0xff] }
  0xb3   : > { %5917 = vmatprep.subr.mxu0 %v4947_v41  ;;  %5816 = vmatprep.mubr.f32.mxu0 %v6890_v55  ;;  %v4989_v55 = vld [vmem:[%s9704_s1 + $0x3f0] sm:$0xff] }
  0xb4   : > { %5918 = vmatpush3.msra.mxu0 %v4947_v41  ;;  %5979 = vmatprep.subr.mxu1 %v4990_v53  ;;  %v4914_v41 = vld [vmem:[%s6810_s23 + $0x52] sm:$0xff] }
  0xb5   : > { %5882 = vmatmul.mubr.f32.gmra.mxu1 %v7137_v29  ;;  %5919 = vmatprep.subr.mxu0 %v4946_v43 }
  0xb6   : > { %5884 = vmatprep.mubr.f32.mxu1 %v7144_v50  ;;  %5920 = vmatpush3.msra.mxu0 %v4946_v43  ;;  %v4953_v43 = vld [vmem:[%s6810_s23 + $0x4b] sm:$0xff] }
  0xb7   : > { %5817 = vmatmul.mubr.f32.gmra.mxu0 %v6902_v58  ;;  %5921 = vmatprep.subr.mxu0 %v4945_v46  ;;  %v4943_v58 = vld [vmem:[%s9704_s1 + $0x340] sm:$0xff] }
  0xb8   : > { %5819 = vmatprep.mubr.f32.mxu0 %v6912_v61  ;;  %5922 = vmatpush3.msra.mxu0 %v4945_v46  ;;  %v4988_v61 = vld [vmem:[%s9704_s1 + $0x3e8] sm:$0xff] }
  0xb9   : > { %5885 = vmatmul.mubr.f32.gmra.mxu1 %v7156_v54  ;;  %5923 = vmatprep.subr.mxu0 %v4944_v49  ;;  %v4915_v46 = vld [vmem:[%s6810_s23 + $0x62] sm:$0xff] }
  0xba   : > { %5887 = vmatprep.mubr.f32.mxu1 %v7160_v56  ;;  %5980 = vmatpush3.msra.mxu1 %v4990_v53  ;;  %v5028_v53 = vld [vmem:[%s9704_s1 + $0x468] sm:$0xff] }
  0xbb   : > { %5820 = vmatmul.mubr.f32.gmra.mxu0 %v6927_v1  ;;  %5981 = vmatprep.subr.mxu1 %v4989_v55  ;;  %v4942_v1 = vld [vmem:[%s9704_s1 + $0x338] sm:$0xff] }
  0xbc   : > { %5822 = vmatprep.mubr.f32.mxu0 %v6934_v3  ;;  %5924 = vmatpush3.msra.mxu0 %v4944_v49  ;;  %v4987_v3 = vld [vmem:[%s9704_s1 + $0x3e0] sm:$0xff]  ;;  %v4954_v49 = vld [vmem:[%s6810_s23 + $0x53] sm:$0xff] }
  0xbd   : > { %5888 = vmatmul.mubr.f32.gmra.mxu1 %v7172_v59  ;;  %5925 = vmatprep.subr.mxu0 %v4943_v58 }
  0xbe   : > { %5890 = vmatprep.mubr.f32.mxu1 %v7180_v40  ;;  %5982 = vmatpush3.msra.mxu1 %v4989_v55  ;;  %v4955_v55 = vld [vmem:[%s6810_s23 + $0x63] sm:$0xff] }
  0xbf   : > { %5823 = vmatmul.mubr.f32.gmra.mxu0 %v6949_v7  ;;  %5983 = vmatprep.subr.mxu1 %v4988_v61  ;;  %v4986_v7 = vld [vmem:[%s9704_s1 + $0x3d8] sm:$0xff] }
  0xc0   : > { %5926 = vmatpush3.msra.mxu0 %v4943_v58  ;;  %5825 = vmatprep.mubr.f32.mxu0 %v6959_v10  ;;  %v4985_v10 = vld [vmem:[%s9704_s1 + $0x3d0] sm:$0xff] }
  0xc1   : > { %5891 = vmatmul.mubr.f32.gmra.mxu1 %v7187_v2  ;;  %5927 = vmatprep.subr.mxu0 %v4942_v1  ;;  %v4916_v58 = vld [vmem:[%s6810_s23 + $0x6a] sm:$0xff] }
  0xc2   : > { %5984 = vmatpush3.msra.mxu1 %v4988_v61  ;;  %5893 = vmatprep.mubr.f32.mxu1 %v7195_v4  ;;  %v5027_v61 = vld [vmem:[%s9704_s1 + $0x460] sm:$0xff] }
  0xc3   : > { %5826 = vmatmul.mubr.f32.gmra.mxu0 %v6970_v13  ;;  %5985 = vmatprep.subr.mxu1 %v4987_v3  ;;  %v4940_v13 = vld [vmem:[%s9704_s1 + $0x328] sm:$0xff] }
  0xc4   : > { %5928 = vmatpush3.msra.mxu0 %v4942_v1  ;;  %5986 = vmatpush3.msra.mxu1 %v4987_v3  ;;  %v4917_v1 = vld [vmem:[%s6810_s23 + $0x7a] sm:$0xff]  ;;  %v4956_v3 = vld [vmem:[%s6810_s23 + $0x6b] sm:$0xff] }
  0xc5   : > { %5828 = vmatprep.mubr.f32.mxu0 %v6985_v17  ;;  %5894 = vmatmul.mubr.f32.gmra.mxu1 %v7207_v0  ;;  %v4984_v17 = vld [vmem:[%s9704_s1 + $0x3c8] sm:$0xff] }
  0xc6   : > { %5987 = vmatprep.subr.mxu1 %v4986_v7  ;;  %5929 = vmatprep.subr.mxu0 %v4941_v15 }
  0xc7   : > { %5988 = vmatpush3.msra.mxu1 %v4986_v7  ;;  %5829 = vmatmul.mubr.f32.gmra.mxu0 %v6996_v20  ;;  %v4939_v20 = vld [vmem:[%s9704_s1 + $0x320] sm:$0xff]  ;;  %v5026_v7 = vld [vmem:[%s9704_s1 + $0x458] sm:$0xff] }
  0xc8   : > { %5989 = vmatprep.subr.mxu1 %v4985_v10  ;;  %5930 = vmatpush3.msra.mxu0 %v4941_v15  ;;  %v4957_v15 = vld [vmem:[%s6810_s23 + $0x7b] sm:$0xff] }
  0xc9   : > { %5896 = vmatprep.mubr.f32.mxu1 %v7222_v9  ;;  %5990 = vmatpush3.msra.mxu1 %v4985_v10  ;;  %v4918_v10 = vld [vmem:[%s6810_s23 + $0x82] sm:$0xff] }
  0xca   : > { %5931 = vmatprep.subr.mxu0 %v4940_v13  ;;  %5897 = vmatmul.mubr.f32.gmra.mxu1 %v7225_v14 }
  0xcb   : > { %5991 = vmatprep.subr.mxu1 %v4984_v17  ;;  %5831 = vmatprep.mubr.f32.mxu0 %v7014_v25  ;;  %v4938_v25 = vld [vmem:[%s9704_s1 + $0x318] sm:$0xff] }
  0xcc   : > { %5932 = vmatpush3.msra.mxu0 %v4940_v13  ;;  %5992 = vmatpush3.msra.mxu1 %v4984_v17  ;;  %v5025_v13 = vld [vmem:[%s9704_s1 + $0x450] sm:$0xff] }
  0xcd   : > { %5832 = vmatmul.mubr.f32.gmra.mxu0 %v7020_v27  ;;  %5993 = vmatprep.subr.mxu1 %v4983_v18  ;;  %v4981_v27 = vld [vmem:[%s9704_s1 + $0x3b0] sm:$0xff] }
  0xce   : > { %5899 = vmatprep.mubr.f32.mxu1 %v7241_v16  ;;  %5933 = vmatprep.subr.mxu0 %v4939_v20  ;;  %v4919_v17 = vld [vmem:[%s6810_s23 + $0x92] sm:$0xff] }
  0xcf   : > { %5994 = vmatpush3.msra.mxu1 %v4983_v18  ;;  %5934 = vmatpush3.msra.mxu0 %v4939_v20  ;;  %v4958_v18 = vld [vmem:[%s6810_s23 + $0x83] sm:$0xff] }
  0xd0   : > { %5900 = vmatmul.mubr.f32.gmra.mxu1 %v7244_v23  ;;  %5995 = vmatprep.subr.mxu1 %v4982_v12  ;;  %v5024_v20 = vld [vmem:[%s9704_s1 + $0x448] sm:$0xff] }
  0xd1   : > { %5834 = vmatprep.mubr.f32.mxu0 %v7039_v32  ;;  %5996 = vmatpush3.msra.mxu1 %v4982_v12  ;;  %v4979_v32 = vld [vmem:[%s9704_s1 + $0x3a0] sm:$0xff]  ;;  %v4959_v12 = vld [vmem:[%s6810_s23 + $0x93] sm:$0xff] }
  0xd2   : > { %5835 = vmatmul.mubr.f32.gmra.mxu0 %v7048_v35  ;;  %5935 = vmatprep.subr.mxu0 %v4938_v25  ;;  %v4936_v35 = vld [vmem:[%s9704_s1 + $0x308] sm:$0xff] }
  0xd3   : > { %5997 = vmatprep.subr.mxu1 %v4981_v27  ;;  %5902 = vmatprep.mubr.f32.mxu1 %v7256_v45 }
  0xd4   : > { %5936 = vmatpush3.msra.mxu0 %v4938_v25  ;;  %5998 = vmatpush3.msra.mxu1 %v4981_v27  ;;  %v4920_v25 = vld [vmem:[%s6810_s23 + $0x9a] sm:$0xff] }
  0xd5   : > { %5837 = vmatprep.mubr.f32.mxu0 %v7063_v44  ;;  %5903 = vmatmul.mubr.f32.gmra.mxu1 %v7267_v30  ;;  %v4978_v44 = vld [vmem:[%s9704_s1 + $0x398] sm:$0xff]  ;;  %v5023_v27 = vld [vmem:[%s9704_s1 + $0x440] sm:$0xff] }
  0xd6   : > { %5999 = vmatprep.subr.mxu1 %v4980_v19  ;;  %5937 = vmatprep.subr.mxu0 %v4937_v21 }
  0xd7   : > { %6000 = vmatpush3.msra.mxu1 %v4980_v19  ;;  %5838 = vmatmul.mubr.f32.gmra.mxu0 %v7074_v52  ;;  %v4977_v52 = vld [vmem:[%s9704_s1 + $0x390] sm:$0xff] }
  0xd8   : > { %6001 = vmatprep.subr.mxu1 %v4979_v32  ;;  %5938 = vmatpush3.msra.mxu0 %v4937_v21  ;;  %v4921_v19 = vld [vmem:[%s6810_s23 + $0xaa] sm:$0xff]  ;;  %v4960_v21 = vld [vmem:[%s6810_s23 + $0x9b] sm:$0xff] }
  0xd9   : > { %5905 = vmatprep.mubr.f32.mxu1 %v7282_v36  ;;  %6002 = vmatpush3.msra.mxu1 %v4979_v32  ;;  %v5022_v32 = vld [vmem:[%s9704_s1 + $0x438] sm:$0xff] }
  0xda   : > { %5939 = vmatprep.subr.mxu0 %v4936_v35  ;;  %5906 = vmatmul.mubr.f32.gmra.mxu1 %v7285_v39 }
  0xdb   : > { %6003 = vmatprep.subr.mxu1 %v4978_v44  ;;  %5840 = vmatprep.mubr.f32.mxu0 %v7438_v42 }
  0xdc   : > { %5940 = vmatpush3.msra.mxu0 %v4936_v35  ;;  %6004 = vmatpush3.msra.mxu1 %v4978_v44  ;;  %v4961_v35 = vld [vmem:[%s6810_s23 + $0xab] sm:$0xff] }
  0xdd   : > { %5841 = vmatmul.mubr.f32.gmra.mxu0 %v7441_v26  ;;  %6005 = vmatprep.subr.mxu1 %v4977_v52  ;;  %v4922_v44 = vld [vmem:[%s6810_s23 + $0xb2] sm:$0xff] }
  0xde   : > { %5908 = vmatprep.mubr.f32.mxu1 %v7448_v28  ;;  %5941 = vmatprep.subr.mxu0 %v4935_v47 }
  0xdf   : > { %6006 = vmatpush3.msra.mxu1 %v4977_v52  ;;  %5942 = vmatpush3.msra.mxu0 %v4935_v47  ;;  %v5021_v52 = vld [vmem:[%s9704_s1 + $0x430] sm:$0xff]  ;;  %v4923_v47 = vld [vmem:[%s6810_s23 + $0xc2] sm:$0xff] }
  0xe0   : > { %5909 = vmatmul.mubr.f32.gmra.mxu1 %v7456_v31  ;;  %6007 = vmatprep.subr.mxu1 %v4976_v33 }
  0xe1   : > { %5943 = vmatprep.mubr.f32.mxu0 %v4911_v34  ;;  %6008 = vmatpush3.msra.mxu1 %v4976_v33  ;;  %v4962_v33 = vld [vmem:[%s6810_s23 + $0xb3] sm:$0xff]  ;;  %v5020_v34 = vld [vmem:[%s9704_s1 + $0x428] sm:$0xff] }
  0xe2   : > { %5944 = vmatmul.mubr.f32.vlgmr.msra.gmra.mxu0 %v4912_v62  ;;  %6009 = vmatprep.subr.mxu1 %v4975_v60  ;;  %v4963_v62 = vld [vmem:[%s6810_s23 + $0xc3] sm:$0xff] }
  0xe3   : > { %6047 = vmatprep.subr.mxu0 %v5030_v8  ;;  %6010 = vmatpush3.msra.mxu1 %v4975_v60  ;;  %v4924_v60 = vld [vmem:[%s6810_s23 + $0xca] sm:$0xff] }
  0xe4   : > { %6011 = vmatprep.mubr.f32.mxu1 %v4951_v5  ;;  %6048 = vmatpush3.msra.mxu0 %v5030_v8  ;;  %v5019_v8 = vld [vmem:[%s9704_s1 + $0x420] sm:$0xff] }
  0xe5   : > { %6012 = vmatmul.mubr.f32.vlgmr.msra.gmra.mxu1 %v4952_v11  ;;  %5946 = vmatprep.mubr.f32.mxu0 %v4913_v6  ;;  %v4925_v5 = vld [vmem:[%s6810_s23 + $0xda] sm:$0xff]  ;;  %v4964_v11 = vld [vmem:[%s6810_s23 + $0xcb] sm:$0xff] }
  0xe6   : > { %6049 = vmatprep.subr.mxu0 %v5029_v37  ;;  %5947 = vmatmul.mubr.f32.gmra.mxu0 %v4914_v41  ;;  %v5018_v6 = vld [vmem:[%s9704_s1 + $0x418] sm:$0xff]  ;;  %v4926_v41 = vld [vmem:[%s6810_s23 + $0xe2] sm:$0xff] }
  0xe7   : > { %6014 = vmatprep.mubr.f32.mxu1 %v4953_v43  ;;  %6050 = vmatpush3.msra.mxu0 %v5029_v37  ;;  %v4965_v37 = vld [vmem:[%s6810_s23 + $0xdb] sm:$0xff]  ;;  %v5017_v43 = vld [vmem:[%s9704_s1 + $0x410] sm:$0xff] }
  0xe8   : > { %5949 = vmatprep.mubr.f32.mxu0 %v4915_v46  ;;  %6051 = vmatprep.subr.mxu0 %v5028_v53 }
  0xe9   : > { %6015 = vmatmul.mubr.f32.gmra.mxu1 %v4954_v49  ;;  %6052 = vmatpush3.msra.mxu0 %v5028_v53  ;;  %v4927_v53 = vld [vmem:[%s6810_s23 + $0xf2] sm:$0xff] }
  0xea   : > { %6017 = vmatprep.mubr.f32.mxu1 %v4955_v55  ;;  %5950 = vmatmul.mubr.f32.gmra.mxu0 %v4916_v58  ;;  %v4966_v58 = vld [vmem:[%s6810_s23 + $0xe3] sm:$0xff] }
  0xeb   : > { %6053 = vmatprep.subr.mxu0 %v5027_v61  ;;  %5952 = vmatprep.mubr.f32.mxu0 %v4917_v1 }
  0xec   : > { %6054 = vmatpush3.msra.mxu0 %v5027_v61  ;;  %v5016_v61 = vld [vmem:[%s9704_s1 + $0x408] sm:$0xff] }
  0xed   : > { %6018 = vmatmul.mubr.f32.gmra.mxu1 %v4956_v3  ;;  %6055 = vmatprep.subr.mxu0 %v5026_v7 }
  0xee   : > { %6020 = vmatprep.mubr.f32.mxu1 %v4957_v15  ;;  %6056 = vmatpush3.msra.mxu0 %v5026_v7  ;;  %v4967_v7 = vld [vmem:[%s6810_s23 + $0xf3] sm:$0xff] }
  0xef   : > { %5953 = vmatmul.mubr.f32.gmra.mxu0 %v4918_v10  ;;  %6057 = vmatprep.subr.mxu0 %v5025_v13  ;;  %v4928_v10 = vld [vmem:[%s6810_s23 + $0xfa] sm:$0xff] }
  0xf0   : > { %5955 = vmatprep.mubr.f32.mxu0 %v4919_v17  ;;  %6058 = vmatpush3.msra.mxu0 %v5025_v13  ;;  %v5015_v13 = vld [vmem:[%s9704_s1 + $0x400] sm:$0xff] }
  0xf1   : > { %6021 = vmatmul.mubr.f32.gmra.mxu1 %v4958_v18  ;;  %6059 = vmatprep.subr.mxu0 %v5024_v20 }
  0xf2   : > { %6023 = vmatprep.mubr.f32.mxu1 %v4959_v12  ;;  %6060 = vmatpush3.msra.mxu0 %v5024_v20  ;;  %v4968_v12 = vld [vmem:[%s6810_s23 + $0xfb] sm:$0xff] }
  0xf3   : > { %5956 = vmatmul.mubr.f32.gmra.mxu0 %v4920_v25  ;;  %6061 = vmatprep.subr.mxu0 %v5023_v27 }
  0xf4   : > { %5958 = vmatprep.mubr.f32.mxu0 %v4921_v19  ;;  %6062 = vmatpush3.msra.mxu0 %v5023_v27  ;;  %v4969_v19 = vld [vmem:[%s6810_s23 + $0x10b] sm:$0xff] }
  0xf5   : > { %6024 = vmatmul.mubr.f32.gmra.mxu1 %v4960_v21  ;;  %6063 = vmatprep.subr.mxu0 %v5022_v32 }
  0xf6   : > { %6026 = vmatprep.mubr.f32.mxu1 %v4961_v35  ;;  %6064 = vmatpush3.msra.mxu0 %v5022_v32 }
  0xf7   : > { %5959 = vmatmul.mubr.f32.gmra.mxu0 %v4922_v44  ;;  %6065 = vmatprep.subr.mxu0 %v5021_v52 }
  0xf8   : > { %5961 = vmatprep.mubr.f32.mxu0 %v4923_v47  ;;  %6066 = vmatpush3.msra.mxu0 %v5021_v52  ;;  %v4970_v52 = vld [vmem:[%s6810_s23 + $0x113] sm:$0xff] }
  0xf9   : > { %6027 = vmatmul.mubr.f32.gmra.mxu1 %v4962_v33  ;;  %6067 = vmatprep.subr.mxu0 %v5020_v34 }
  0xfa   : > { %6029 = vmatprep.mubr.f32.mxu1 %v4963_v62  ;;  %6068 = vmatpush3.msra.mxu0 %v5020_v34 }
  0xfb   : > { %5962 = vmatmul.mubr.f32.gmra.mxu0 %v4924_v60  ;;  %6069 = vmatprep.subr.mxu0 %v5019_v8  ;;  %v5537_v46 = vpop.f32.mrf.mxu0  ;;  %v4933_v60 = vld [vmem:[%s6810_s23 + $0x13a] sm:$0xff] }
  0xfc   : > { %5964 = vmatprep.mubr.f32.mxu0 %v4925_v5  ;;  %6070 = vmatpush3.msra.mxu0 %v5019_v8  ;;  %v5605_v49 = vpop.f32.mrf.mxu1 }
  0xfd   : > { %6030 = vmatmul.mubr.f32.gmra.mxu1 %v4964_v11  ;;  %6071 = vmatprep.subr.mxu0 %v5018_v6  ;;  %v7540_v55 = vadd.f32 %v5605_v49, %v5537_v46  ;;  %v442_v1 = vpop.f32.mrf.mxu0  ;;  %v4974_v46 = vld [vmem:[%s6810_s23 + $0x143] sm:$0xff] }
  0xfe   : > { %6032 = vmatprep.mubr.f32.mxu1 %v4965_v37  ;;  %6072 = vmatpush3.msra.mxu0 %v5018_v6  ;;  %v627_v3 = vpop.f32.mrf.mxu1  ;;  %v4973_v6 = vld [vmem:[%s6810_s23 + $0x13b] sm:$0xff] }
  0xff   : > { %5965 = vmatmul.mubr.f32.gmra.mxu0 %v4926_v41  ;;  %6073 = vmatprep.subr.mxu0 %v5017_v43  ;;  %v7547_v15 = vadd.f32 %v627_v3, %v442_v1  ;;  %v5540_v17 = vpop.f32.mrf.mxu0 }
 0x100   : > { %5967 = vmatprep.mubr.f32.mxu0 %v4927_v53  ;;  %6074 = vmatpush3.msra.mxu0 %v5017_v43  ;;  %v5608_v18 = vpop.f32.mrf.mxu1 }
 0x101   : > { %6033 = vmatmul.mubr.f32.gmra.mxu1 %v4966_v58  ;;  %6075 = vmatprep.subr.mxu0 %v5016_v61  ;;  %v7553_v20 = vadd.f32 %v5608_v18, %v5540_v17  ;;  %v452_v25 = vpop.f32.mrf.mxu0 }
 0x102   : > { %6035 = vmatprep.mubr.f32.mxu1 %v4967_v7  ;;  %6076 = vmatpush3.msra.mxu0 %v5016_v61  ;;  %v637_v27 = vpop.f32.mrf.mxu1 }
 0x103   : > { %5968 = vmatmul.mubr.f32.gmra.mxu0 %v4928_v10  ;;  %6077 = vmatprep.subr.mxu0 %v5015_v13  ;;  %v7557_v21 = vadd.f32 %v637_v27, %v452_v25  ;;  %v5543_v32 = vpop.f32.mrf.mxu0 }
 0x104   : > { %5970 = vmatprep.mubr.f32.mxu0 %v7070_v51  ;;  %6078 = vmatpush3.msra.mxu0 %v5015_v13  ;;  %v5611_v35 = vpop.f32.mrf.mxu1 }
 0x105   : > { %6036 = vmatmul.mubr.f32.gmra.mxu1 %v4968_v12  ;;  %v7560_v44 = vadd.f32 %v5611_v35, %v5543_v32  ;;  %v462_v47 = vpop.f32.mrf.mxu0 }
 0x106   : > { %6038 = vmatprep.mubr.f32.mxu1 %v4969_v19  ;;  %v647_v33 = vpop.f32.mrf.mxu1 }
 0x107   : > { %5971 = vmatmul.mubr.f32.gmra.mxu0 %v7077_v57  ;;  %v7564_v34 = vadd.f32 %v647_v33, %v462_v47  ;;  %v5546_v51 = vpop.f32.mrf.mxu0  ;;  %v4934_v57 = vld [vmem:[%s6810_s23 + $0x142] sm:$0xff] }
 0x108   : > { %5973 = vmatprep.mubr.f32.mxu0 %v7292_v48  ;;  %v5614_v62 = vpop.f32.mrf.mxu1 }
 0x109   : > { %6039 = vmatmul.mubr.f32.gmra.mxu1 %v4970_v52  ;;  %v7568_v8 = vadd.f32 %v5614_v62, %v5546_v51  ;;  %v472_v5 = vpop.f32.mrf.mxu0 }
 0x10a   : > { %6041 = vmatprep.mubr.f32.mxu1 %v7438_v42  ;;  %v657_v11 = vpop.f32.mrf.mxu1 }
 0x10b   : > { %5974 = vmatmul.mubr.f32.gmra.mxu0 %v7300_v63  ;;  %v7573_v37 = vadd.f32 %v657_v11, %v472_v5 }
 0x10c   : > { %5976 = vmatprep.mubr.f32.mxu0 %v4933_v60  ;;  %v5549_v41 = vpop.f32.mrf.mxu0  ;;  %v5617_v48 = vpop.f32.mrf.mxu1 }
 0x10d   : > { %6042 = vmatmul.mubr.f32.gmra.mxu1 %v7441_v26  ;;  %v7577_v43 = vadd.f32 %v5617_v48, %v5549_v41 }
 0x10e   : > { %6044 = vmatprep.mubr.f32.mxu1 %v4973_v6  ;;  %v482_v49 = vpop.f32.mrf.mxu0  ;;  %v667_v53 = vpop.f32.mrf.mxu1 }
 0x10f   : > { %5977 = vmatmul.mubr.f32.gmra.mxu0 %v4934_v57  ;;  %v7580_v42 = vadd.f32 %v667_v53, %v482_v49 }
 0x110   : > { %6079 = vmatprep.mubr.f32.mxu0 %v7111_v22  ;;  %v5552_v63 = vpop.f32.mrf.mxu0  ;;  %v5620_v58 = vpop.f32.mrf.mxu1 }
 0x111   : > { %6045 = vmatmul.mubr.f32.gmra.mxu1 %v4974_v46  ;;  %v7583_v61 = vadd.f32 %v5620_v58, %v5552_v63 }
 0x112   : > { %v492_v1 = vpop.f32.mrf.mxu0  ;;  %v677_v3 = vpop.f32.mrf.mxu1 }
 0x113   : > { %6080 = vmatmul.mubr.f32.vlgmr.msra.gmra.mxu0 %v7121_v38  ;;  %v7586_v26 = vadd.f32 %v677_v3, %v492_v1 }
 0x114   : > { %6082 = vmatprep.mubr.f32.mxu0 %v7128_v24  ;;  %v5555_v7 = vpop.f32.mrf.mxu0  ;;  %v5623_v10 = vpop.f32.mrf.mxu1 }
 0x115   : > { %v7589_v13 = vadd.f32 %v5623_v10, %v5555_v7 }
 0x116   : > { %v502_v17 = vpop.f32.mrf.mxu0  ;;  %v687_v18 = vpop.f32.mrf.mxu1 }
 0x117   : > { %6083 = vmatmul.mubr.f32.gmra.mxu0 %v7137_v29  ;;  %v7592_v22 = vadd.f32 %v687_v18, %v502_v17 }
 0x118   : > { %6085 = vmatprep.mubr.f32.mxu0 %v7144_v50  ;;  %v5558_v12 = vpop.f32.mrf.mxu0  ;;  %v5626_v25 = vpop.f32.mrf.mxu1 }
 0x119   : > { %v7595_v27 = vadd.f32 %v5626_v25, %v5558_v12 }
 0x11a   : > { %v512_v38 = vpop.f32.mrf.mxu0  ;;  %v697_v24 = vpop.f32.mrf.mxu1 }
 0x11b   : > { %6086 = vmatmul.mubr.f32.gmra.mxu0 %v7156_v54  ;;  %v7599_v19 = vadd.f32 %v697_v24, %v512_v38 }
 0x11c   : > { %6088 = vmatprep.mubr.f32.mxu0 %v7160_v56 }
 0x11d   : > { %v5561_v32 = vpop.f32.mrf.mxu0 }
 0x11e   : > { %v5629_v35 = vpop.f32.mrf.mxu1 }
 0x11f   : > { %6089 = vmatmul.mubr.f32.gmra.mxu0 %v7172_v59  ;;  %v7602_v29 = vadd.f32 %v5629_v35, %v5561_v32  ;;  %v522_v50 = vpop.f32.mrf.mxu0 }
 0x120   : > { %6091 = vmatprep.mubr.f32.mxu0 %v7180_v40  ;;  %v707_v52 = vpop.f32.mrf.mxu1 }
 0x121   : > { %v7605_v47 = vadd.f32 %v707_v52, %v522_v50 }
 0x122   : > { %v5564_v54 = vpop.f32.mrf.mxu0 }
 0x123   : > { %6092 = vmatmul.mubr.f32.gmra.mxu0 %v7187_v2  ;;  %v5632_v33 = vpop.f32.mrf.mxu1 }
 0x124   : > { %6094 = vmatprep.mubr.f32.mxu0 %v7195_v4  ;;  %v7609_v56 = vadd.f32 %v5632_v33, %v5564_v54  ;;  %v532_v51 = vpop.f32.mrf.mxu0 }
 0x125   : > { %v717_v62 = vpop.f32.mrf.mxu1 }
 0x126   : > { %v7611_v60 = vadd.f32 %v717_v62, %v532_v51 }
 0x127   : > { %6095 = vmatmul.mubr.f32.gmra.mxu0 %v7207_v0 }
 0x128   : > { %6097 = vmatprep.mubr.f32.mxu0 %v7222_v9  ;;  %v5567_v59 = vpop.f32.mrf.mxu0  ;;  %v5635_v40 = vpop.f32.mrf.mxu1 }
 0x129   : > { %v7615_v5 = vadd.f32 %v5635_v40, %v5567_v59 }
 0x12a   : > { %v542_v11 = vpop.f32.mrf.mxu0  ;;  %v727_v2 = vpop.f32.mrf.mxu1 }
 0x12b   : > { %6098 = vmatmul.mubr.f32.gmra.mxu0 %v7225_v14  ;;  %v7619_v4 = vadd.f32 %v727_v2, %v542_v11 }
 0x12c   : > { %6100 = vmatprep.mubr.f32.mxu0 %v7241_v16 }
 0x12d   : > { %v5570_v6 = vpop.f32.mrf.mxu0 }
 0x12e   : > { %v5638_v57 = vpop.f32.mrf.mxu1 }
 0x12f   : > { %6101 = vmatmul.mubr.f32.gmra.mxu0 %v7244_v23  ;;  %v7622_v41 = vadd.f32 %v5638_v57, %v5570_v6  ;;  %v552_v0 = vpop.f32.mrf.mxu0 }
 0x130   : > { %6103 = vmatprep.mubr.f32.mxu0 %v7256_v45  ;;  %v737_v9 = vpop.f32.mrf.mxu1 }
 0x131   : > { %v7625_v48 = vadd.f32 %v737_v9, %v552_v0 }
 0x132   : > { %v5673_v46 = vpop.f32.mrf.mxu0 }
 0x133   : > { %6104 = vmatmul.mubr.f32.gmra.mxu0 %v7267_v30  ;;  %v973_v14 = vadd.f32 %v5673_v46, %v7540_v55  ;;  %v5013_v55 = vld [vmem:[%s6810_s23 + $0x13c] sm:$0xff] }
 0x134   : > { %6106 = vmatprep.mubr.f32.mxu0 %v7282_v36  ;;  %v853_v16 = vpop.f32.mrf.mxu0 }
 0x135   : > { %v972_v49 = vadd.f32 %v853_v16, %v7547_v15  ;;  %v5741_v23 = vpop.f32.mrf.mxu1 }
 0x136   : > { %v7631_v53 = vadd.f32 %v5741_v23, %v973_v14  ;;  %v5676_v45 = vpop.f32.mrf.mxu0 }
 0x137   : > { %6107 = vmatmul.mubr.f32.gmra.mxu0 %v7285_v39  ;;  %v1106_v63 = vpop.f32.mrf.mxu1  ;;  %v975_v58 = vadd.f32 %v5676_v45, %v7553_v20  ;;  %v5014_v39 = vld [vmem:[%s6810_s23 + $0x144] sm:$0xff] }
 0x138   : > { %6109 = vmatprep.mubr.f32.mxu0 %v7448_v28  ;;  %v7636_v30 = vadd.f32 %v1106_v63, %v972_v49  ;;  %v863_v1 = vpop.f32.mrf.mxu0 }
 0x139   : > { %v5744_v36 = vpop.f32.mrf.mxu1  ;;  %v974_v3 = vadd.f32 %v863_v1, %v7557_v21 }
 0x13a   : > { %v7640_v15 = vadd.f32 %v5744_v36, %v975_v58  ;;  %v5679_v7 = vpop.f32.mrf.mxu0 }
 0x13b   : > { %6110 = vmatmul.mubr.f32.gmra.mxu0 %v7456_v31  ;;  %v1116_v10 = vpop.f32.mrf.mxu1  ;;  %v977_v17 = vadd.f32 %v5679_v7, %v7560_v44 }
 0x13c   : > { %6112 = vmatprep.mubr.f32.mxu0 %v5013_v55  ;;  %v7645_v28 = vadd.f32 %v1116_v10, %v974_v3  ;;  %v873_v20 = vpop.f32.mrf.mxu0 }
 0x13d   : > { %v5747_v18 = vpop.f32.mrf.mxu1  ;;  %v976_v12 = vadd.f32 %v873_v20, %v7564_v34 }
 0x13e   : > { %v7648_v25 = vadd.f32 %v5747_v18, %v977_v17 }
 0x13f   : > { %6113 = vmatmul.mubr.f32.gmra.mxu0 %v5014_v39  ;;  %v5682_v21 = vpop.f32.mrf.mxu0  ;;  %v1126_v38 = vpop.f32.mrf.mxu1 }
 0x140   : > { %v979_v24 = vadd.f32 %v5682_v21, %v7568_v8  ;;  %v7651_v31 = vadd.f32 %v1126_v38, %v976_v12 }
 0x141   : > { %v883_v32 = vpop.f32.mrf.mxu0  ;;  %v5750_v35 = vpop.f32.mrf.mxu1 }
 0x142   : > { %v978_v50 = vadd.f32 %v883_v32, %v7573_v37  ;;  %v7654_v44 = vadd.f32 %v5750_v35, %v979_v24 }
 0x143   : > { %v5685_v52 = vpop.f32.mrf.mxu0  ;;  %v1136_v54 = vpop.f32.mrf.mxu1 }
 0x144   : > { %v981_v33 = vadd.f32 %v5685_v52, %v7577_v43  ;;  %v7657_v34 = vadd.f32 %v1136_v54, %v978_v50 }
 0x145   : > { %v893_v51 = vpop.f32.mrf.mxu0  ;;  %v5753_v62 = vpop.f32.mrf.mxu1 }
 0x146   : > { %v980_v59 = vadd.f32 %v893_v51, %v7580_v42  ;;  %v7660_v40 = vadd.f32 %v5753_v62, %v981_v33 }
 0x147   : > { %v5688_v8 = vpop.f32.mrf.mxu0  ;;  %v1146_v11 = vpop.f32.mrf.mxu1 }
 0x148   : > { %v983_v2 = vadd.f32 %v5688_v8, %v7583_v61  ;;  %v7663_v6 = vadd.f32 %v1146_v11, %v980_v59 }
 0x149   : > { %v903_v37 = vpop.f32.mrf.mxu0  ;;  %v5756_v57 = vpop.f32.mrf.mxu1 }
 0x14a   : > { %v982_v0 = vadd.f32 %v903_v37, %v7586_v26  ;;  %v7666_v9 = vadd.f32 %v5756_v57, %v983_v2 }
 0x14b   : > { %v5691_v43 = vpop.f32.mrf.mxu0  ;;  %v1156_v46 = vpop.f32.mrf.mxu1 }
 0x14c   : > { %v985_v14 = vadd.f32 %v5691_v43, %v7589_v13  ;;  %v7669_v16 = vadd.f32 %v1156_v46, %v982_v0 }
 0x14d   : > { %v913_v42 = vpop.f32.mrf.mxu0  ;;  %v5759_v23 = vpop.f32.mrf.mxu1 }
 0x14e   : > { %v984_v49 = vadd.f32 %v913_v42, %v7592_v22  ;;  %v7672_v45 = vadd.f32 %v5759_v23, %v985_v14 }
 0x14f   : > { %v5694_v61 = vpop.f32.mrf.mxu0  ;;  %v1166_v63 = vpop.f32.mrf.mxu1 }
 0x150   : > { %v987_v58 = vadd.f32 %v5694_v61, %v7595_v27  ;;  %v7675_v55 = vadd.f32 %v1166_v63, %v984_v49 }
 0x151   : > { %v923_v26 = vpop.f32.mrf.mxu0 }
 0x152   : > { %v986_v1 = vadd.f32 %v923_v26, %v7599_v19  ;;  %v5762_v36 = vpop.f32.mrf.mxu1 }
 0x153   : > { %v7678_v3 = vadd.f32 %v5762_v36, %v987_v58 }
 0x154   : > { %v1176_v7 = vpop.f32.mrf.mxu1 }
 0x155   : > { %v5697_v13 = vpop.f32.mrf.mxu0  ;;  %v7681_v22 = vadd.f32 %v1176_v7, %v986_v1 }
 0x156   : > { %v989_v10 = vadd.f32 %v5697_v13, %v7602_v29 }
 0x157   : > { %v933_v39 = vpop.f32.mrf.mxu0 }
 0x158   : > { %v988_v17 = vadd.f32 %v933_v39, %v7605_v47  ;;  %v5765_v20 = vpop.f32.mrf.mxu1 }
 0x159   : > { %v7684_v18 = vadd.f32 %v5765_v20, %v989_v10 }
 0x15a   : > { %v5700_v27 = vpop.f32.mrf.mxu0  ;;  %v1186_v12 = vpop.f32.mrf.mxu1 }
 0x15b   : > { %v991_v21 = vadd.f32 %v5700_v27, %v7609_v56  ;;  %v7687_v19 = vadd.f32 %v1186_v12, %v988_v17 }
 0x15c   : > { %v943_v38 = vpop.f32.mrf.mxu0 }
 0x15d   : > { %v990_v24 = vadd.f32 %v943_v38, %v7611_v60  ;;  %v5768_v32 = vpop.f32.mrf.mxu1 }
 0x15e   : > { %v7690_v35 = vadd.f32 %v5768_v32, %v991_v21 }
 0x15f   : > { %v5703_v29 = vpop.f32.mrf.mxu0  ;;  %v1196_v50 = vpop.f32.mrf.mxu1 }
 0x160   : > { %v993_v52 = vadd.f32 %v5703_v29, %v7615_v5  ;;  %v7693_v47 = vadd.f32 %v1196_v50, %v990_v24 }
 0x161   : > { %v953_v54 = vpop.f32.mrf.mxu0 }
 0x162   : > { %v992_v33 = vadd.f32 %v953_v54, %v7619_v4  ;;  %v5771_v51 = vpop.f32.mrf.mxu1 }
 0x163   : > { %v7696_v62 = vadd.f32 %v5771_v51, %v993_v52 }
 0x164   : > { %v1206_v59 = vpop.f32.mrf.mxu1 }
 0x165   : > { %v5706_v56 = vpop.f32.mrf.mxu0  ;;  %v7699_v60 = vadd.f32 %v1206_v59, %v992_v33 }
 0x166   : > { %v995_v8 = vadd.f32 %v5706_v56, %v7622_v41 }
 0x167   : > { %v963_v11 = vpop.f32.mrf.mxu0 }
 0x168   : > { %v994_v2 = vadd.f32 %v963_v11, %v7625_v48  ;;  %v5774_v37 = vpop.f32.mrf.mxu1 }
 0x169   : > { %v7702_v57 = vadd.f32 %v5774_v37, %v995_v8 }
 0x16a   : > { %v1216_v5 = vpop.f32.mrf.mxu1  ;;  %v5809_v0 = vpop.f32.mrf.mxu0 }
 0x16b   : > { %v7704_v43 = vadd.f32 %v1216_v5, %v994_v2  ;;  %v7707_v4 = vadd.f32 %v5809_v0, %v7631_v53 }
 0x16c   : > { %v1356_v46 = vpop.f32.mrf.mxu0 }
 0x16d   : > { %v7710_v14 = vadd.f32 %v1356_v46, %v7636_v30  ;;  %v7712_v41 = vpop.f32.mrf.mxu1 }
 0x16e   : > { %v5812_v42 = vpop.f32.mrf.mxu0 }
 0x16f   : > { %v7714_v49 = vpop.f32.mrf.mxu1  ;;  %v7717_v48 = vadd.f32 %v5812_v42, %v7640_v15 }
 0x170   : > { %v1366_v23 = vpop.f32.mrf.mxu0 }
 0x171   : > { %v7719_v61 = vpop.f32.mrf.mxu1  ;;  %v7722_v63 = vadd.f32 %v1366_v23, %v7645_v28 }
 0x172   : > { %v5815_v53 = vpop.f32.mrf.mxu0 }
 0x173   : > { %v7724_v58 = vpop.f32.mrf.mxu1  ;;  %v7727_v30 = vadd.f32 %v5815_v53, %v7648_v25 }
 0x174   : > { %v1376_v26 = vpop.f32.mrf.mxu0 }
 0x175   : > { %v7729_v1 = vpop.f32.mrf.mxu1  ;;  %v7732_v36 = vadd.f32 %v1376_v26, %v7651_v31 }
 0x177   : > { %v5818_v15 = vpop.f32.mrf.mxu0  ;;  %v7734_v13 = vpop.f32.mrf.mxu1 }
 0x178   : > { %v7737_v7 = vadd.f32 %v5818_v15, %v7654_v44 }
 0x179   : > { %v1386_v28 = vpop.f32.mrf.mxu0  ;;  %v7739_v10 = vpop.f32.mrf.mxu1 }
 0x17a   : > { %v7742_v39 = vadd.f32 %v1386_v28, %v7657_v34 }
 0x17b   : > { %v5821_v25 = vpop.f32.mrf.mxu0  ;;  %v7744_v17 = vpop.f32.mrf.mxu1 }
 0x17c   : > { %v7747_v20 = vadd.f32 %v5821_v25, %v7660_v40 }
 0x17d   : > { %v1396_v31 = vpop.f32.mrf.mxu0  ;;  %v7749_v27 = vpop.f32.mrf.mxu1 }
 0x17e   : > { %v7752_v12 = vadd.f32 %v1396_v31, %v7663_v6 }
 0x17f   : > { %v5824_v44 = vpop.f32.mrf.mxu0  ;;  %v7754_v21 = vpop.f32.mrf.mxu1 }
 0x180   : > { %v7757_v38 = vadd.f32 %v5824_v44, %v7666_v9 }
 0x181   : > { %v1406_v34 = vpop.f32.mrf.mxu0  ;;  %v7759_v24 = vpop.f32.mrf.mxu1 }
 0x182   : > { %v7762_v32 = vadd.f32 %v1406_v34, %v7669_v16 }
 0x183   : > { %v5827_v40 = vpop.f32.mrf.mxu0  ;;  %v7764_v29 = vpop.f32.mrf.mxu1 }
 0x184   : > { %v7767_v50 = vadd.f32 %v5827_v40, %v7672_v45 }
 0x185   : > { %v1416_v6 = vpop.f32.mrf.mxu0  ;;  %v7772_v54 = vpop.f32.mrf.mxu1 }
 0x186   : > { %v7770_v52 = vadd.f32 %v1416_v6, %v7675_v55 }
 0x187   : > { %v5830_v9 = vpop.f32.mrf.mxu0  ;;  %v7774_v33 = vpop.f32.mrf.mxu1 }
 0x188   : > { %v7777_v51 = vadd.f32 %v5830_v9, %v7678_v3 }
 0x189   : > { %v1426_v16 = vpop.f32.mrf.mxu0 }
 0x18a   : > { %v7780_v56 = vadd.f32 %v1426_v16, %v7681_v22  ;;  %v7782_v59 = vpop.f32.mrf.mxu1 }
 0x18c   : > { %v7784_v8 = vpop.f32.mrf.mxu1 }
 0x18d   : > { %v5833_v45 = vpop.f32.mrf.mxu0 }
 0x18e   : > { %v7787_v55 = vadd.f32 %v5833_v45, %v7684_v18 }
 0x18f   : > { %v1436_v11 = vpop.f32.mrf.mxu0 }
 0x190   : > { %v7790_v2 = vadd.f32 %v1436_v11, %v7687_v19  ;;  %v7792_v37 = vpop.f32.mrf.mxu1 }
 0x192   : > { %v5836_v3 = vpop.f32.mrf.mxu0  ;;  %v7794_v5 = vpop.f32.mrf.mxu1 }
 0x193   : > { %v7797_v22 = vadd.f32 %v5836_v3, %v7690_v35  ;;  %v6592_v3 = vmov 0.0  }
 0x194   : > { %v1446_v0 = vpop.f32.mrf.mxu0  ;;  %2725 = vst [vmem:[#allocation2] sm:$0x3] %v6592_v3  ;;  %2726 = vst [vmem:[#allocation2 + $0x18] sm:$0x3] %v6592_v3 }
 0x195   : > { %v7800_v46 = vadd.f32 %v1446_v0, %v7693_v47  ;;  %v7802_v42 = vpop.f32.mrf.mxu1  ;;  %2727 = vst [vmem:[#allocation2 + $0x30] sm:$0x3] %v6592_v3  ;;  %2728 = vst [vmem:[#allocation2 + $0x48] sm:$0x3] %v6592_v3 }
 0x196   : > { %2729 = vst [vmem:[#allocation2 + $0x60] sm:$0x3] %v6592_v3  ;;  %2730 = vst [vmem:[#allocation2 + $0x78] sm:$0x3] %v6592_v3 }
 0x197   : > { %v5839_v18 = vpop.f32.mrf.mxu0  ;;  %v7804_v23 = vpop.f32.mrf.mxu1  ;;  %2731 = vst [vmem:[#allocation2 + $0x90] sm:$0x3] %v6592_v3  ;;  %2732 = vst [vmem:[#allocation2 + $0xa8] sm:$0x3] %v6592_v3 }
 0x198   : > { %v7807_v19 = vadd.f32 %v5839_v18, %v7696_v62  ;;  %2733 = vst [vmem:[#allocation2 + $0xc0] sm:$0x3] %v6592_v3  ;;  %2734 = vst [vmem:[#allocation2 + $0xd8] sm:$0x3] %v6592_v3 }
 0x199   : > { %v1456_v53 = vpop.f32.mrf.mxu0  ;;  %2735 = vst [vmem:[#allocation2 + $0xf0] sm:$0x3] %v6592_v3  ;;  %2736 = vst [vmem:[#allocation2 + $0x108] sm:$0x3] %v6592_v3 }
 0x19a   : > { %v7810_v26 = vadd.f32 %v1456_v53, %v7699_v60  ;;  %v7812_v15 = vpop.f32.mrf.mxu1  ;;  %2737 = vst [vmem:[#allocation2 + $0x12] sm:$0x3] %v6592_v3  ;;  %2738 = vst [vmem:[#allocation2 + $0x2a] sm:$0x3] %v6592_v3 }
 0x19b   : > { %2739 = vst [vmem:[#allocation2 + $0x42] sm:$0x3] %v6592_v3  ;;  %2740 = vst [vmem:[#allocation2 + $0x5a] sm:$0x3] %v6592_v3 }
 0x19c   : > { %v7814_v28 = vpop.f32.mrf.mxu1  ;;  %2741 = vst [vmem:[#allocation2 + $0x72] sm:$0x3] %v6592_v3  ;;  %2742 = vst [vmem:[#allocation2 + $0x8a] sm:$0x3] %v6592_v3 }
 0x19d   : > { %v5842_v35 = vpop.f32.mrf.mxu0  ;;  %2743 = vst [vmem:[#allocation2 + $0xa2] sm:$0x3] %v6592_v3  ;;  %2744 = vst [vmem:[#allocation2 + $0xba] sm:$0x3] %v6592_v3 }
 0x19e   : > { %v7817_v47 = vadd.f32 %v5842_v35, %v7702_v57  ;;  %2745 = vst [vmem:[#allocation2 + $0xd2] sm:$0x3] %v6592_v3  ;;  %2746 = vst [vmem:[#allocation2 + $0xea] sm:$0x3] %v6592_v3 }
 0x19f   : > { %v1466_v25 = vpop.f32.mrf.mxu0  ;;  %2747 = vst [vmem:[#allocation2 + $0x102] sm:$0x3] %v6592_v3  ;;  %2748 = vst [vmem:[#allocation2 + $0x11a] sm:$0x3] %v6592_v3 }
 0x1a0   : > { %9907 = vst [vmem:[#allocation9_spill] sm:$0xff] %v7817_v47  ;;  %v7820_v31 = vadd.f32 %v1466_v25, %v7704_v43  ;;  %v7822_v44 = vpop.f32.mrf.mxu1 }
 0x1a1   : > { %9909 = vst [vmem:[#allocation11_spill] sm:$0xff] %v7822_v44 }
 0x1a2   : > { %9908 = vst [vmem:[#allocation10_spill] sm:$0xff] %v7820_v31  ;;  %v7824_v62 = vpop.f32.mrf.mxu1  ;;  %v5945_v34 = vpop.f32.mrf.mxu0 }
 0x1a3   : > { %9910 = vst [vmem:[#allocation12_spill] sm:$0xff] %v7824_v62 }
 0x1a4   : > { %v7826_v40 = vpop.f32.mrf.mxu0 }
 0x1a5   : > { %v7828_v60 = vpop.f32.mrf.mxu1 }
 0x1a6   : > { %v7830_v6 = vpop.f32.mrf.mxu0 }
 0x1a7   : > { %v7832_v9 = vpop.f32.mrf.mxu1 }
 0x1a8   : > { %v7834_v16 = vpop.f32.mrf.mxu0 }
 0x1a9   : > { %v7836_v57 = vpop.f32.mrf.mxu1 }
 0x1aa   : > { %v7838_v45 = vpop.f32.mrf.mxu0 }
 0x1ab   : > { %v7840_v43 = vpop.f32.mrf.mxu1 }
 0x1ac   : > { %9911 = vst [vmem:[#allocation13_spill] sm:$0xff] %v7840_v43  ;;  %v7842_v11 = vpop.f32.mrf.mxu0 }
 0x1ad   : > { %v7844_v0 = vpop.f32.mrf.mxu1 }
 0x1ae   : > { %9912 = vst [vmem:[#allocation14_spill] sm:$0xff] %v7844_v0 }
 0x1af   : > { %v7846_v18 = vpop.f32.mrf.mxu0  ;;  %v7850_v35 = vpop.f32.mrf.mxu1 }
 0x1b0   : > { %9913 = vst [vmem:[#allocation15_spill] sm:$0xff] %v7846_v18  ;;  %9915 = vst [vmem:[#allocation17_spill] sm:$0xff] %v7850_v35 }
 0x1b1   : > { %v7848_v53 = vpop.f32.mrf.mxu0  ;;  %v7856_v31 = vpop.f32.mrf.mxu1 }
 0x1b2   : > { %9914 = vst [vmem:[#allocation16_spill] sm:$0xff] %v7848_v53  ;;  %9918 = vst [vmem:[#allocation20_spill] sm:$0xff] %v7856_v31 }
 0x1b3   : > { %v7852_v25 = vpop.f32.mrf.mxu0  ;;  %v7862_v43 = vpop.f32.mrf.mxu1 }
 0x1b4   : > { %9916 = vst [vmem:[#allocation18_spill] sm:$0xff] %v7852_v25  ;;  %9921 = vst [vmem:[#allocation23_spill] sm:$0xff] %v7862_v43 }
 0x1b5   : > { %v7854_v62 = vpop.f32.mrf.mxu0  ;;  %v7868_v18 = vpop.f32.mrf.mxu1 }
 0x1b6   : > { %9917 = vst [vmem:[#allocation19_spill] sm:$0xff] %v7854_v62 }
 0x1b7   : > { %v7858_v44 = vpop.f32.mrf.mxu0  ;;  %v7874_v25 = vpop.f32.mrf.mxu1 }
 0x1b8   : > { %9919 = vst [vmem:[#allocation21_spill] sm:$0xff] %v7858_v44  ;;  %9926 = vst [vmem:[#allocation28_spill] sm:$0xff] %v7874_v25 }
 0x1b9   : > { %v7860_v47 = vpop.f32.mrf.mxu0  ;;  %v7880_v44 = vpop.f32.mrf.mxu1 }
 0x1ba   : > { %9920 = vst [vmem:[#allocation22_spill] sm:$0xff] %v7860_v47  ;;  %9929 = vst [vmem:[#allocation31_spill] sm:$0xff] %v7880_v44 }
 0x1bb   : > { %v7864_v3 = vpop.f32.mrf.mxu0 }
 0x1bc   : > { %9922 = vst [vmem:[#allocation24_spill] sm:$0xff] %v7864_v3  ;;  %v7886_v3 = vpop.f32.mrf.mxu1 }
 0x1bd   : > { %v7866_v0 = vpop.f32.mrf.mxu0 }
 0x1be   : > { %9923 = vst [vmem:[#allocation25_spill] sm:$0xff] %v7866_v0 }
 0x1bf   : > { %v7870_v53 = vpop.f32.mrf.mxu0 }
 0x1c0   : > { %9924 = vst [vmem:[#allocation26_spill] sm:$0xff] %v7870_v53  ;;  %v1726_v53 = vadd.f32 %v7712_v41, %v7707_v4  ;;  %v1729_v41 = vadd.f32 %v7734_v13, %v7732_v36  ;;  %v1735_v13 = vadd.f32 %v7764_v29, %v7762_v32  ;;  %v7954_v32 = vadd.f32 %v7794_v5, %v7790_v2 }
 0x1c1   : > { %v7872_v35 = vpop.f32.mrf.mxu0  ;;  %v7958_v29 = vadd.f32 %v7802_v42, %v7797_v22 }
 0x1c2   : > { %9925 = vst [vmem:[#allocation27_spill] sm:$0xff] %v7872_v35  ;;  %v1979_v25 = vadd.f32 %v5945_v34, %v1726_v53  ;;  %v1982_v2 = vadd.f32 %v7842_v11, %v1729_v41  ;;  %v9935_v34 = vld [vmem:[#allocation9_spill] sm:$0xff]  ;;  %v9942_v41 = vld [vmem:[#allocation20_spill] sm:$0xff] }
 0x1c3   : > { %v7876_v62 = vpop.f32.mrf.mxu0 }
 0x1c4   : > { %9927 = vst [vmem:[#allocation29_spill] sm:$0xff] %v7876_v62  ;;  %v1725_v62 = vadd.f32 %v7714_v49, %v7710_v14  ;;  %v1732_v14 = vadd.f32 %v7739_v10, %v7737_v7  ;;  %v1731_v49 = vadd.f32 %v7744_v17, %v7742_v39  ;;  %v1738_v7 = vadd.f32 %v7772_v54, %v7767_v50 }
 0x1c5   : > { %v7878_v31 = vpop.f32.mrf.mxu0  ;;  %v7931_v10 = vadd.f32 %v7774_v33, %v7770_v52  ;;  %v7935_v39 = vadd.f32 %v7782_v59, %v7777_v51  ;;  %v7963_v54 = vadd.f32 %v7804_v23, %v7800_v46  ;;  %v9934_v46 = vld [vmem:[#allocation13_spill] sm:$0xff] }
 0x1c6   : > { %9928 = vst [vmem:[#allocation30_spill] sm:$0xff] %v7878_v31  ;;  %v7896_v31 = vpop.f32.mrf.mxu1  ;;  %v1978_v4 = vadd.f32 %v7826_v40, %v1725_v62  ;;  %v9937_v40 = vld [vmem:[#allocation10_spill] sm:$0xff] }
 0x1c7   : > { %v7882_v47 = vpop.f32.mrf.mxu0 }
 0x1c8   : > { %9930 = vst [vmem:[#allocation32_spill] sm:$0xff] %v7882_v47  ;;  %v1727_v47 = vadd.f32 %v7724_v58, %v7722_v63  ;;  %v1733_v63 = vadd.f32 %v7754_v21, %v7752_v12  ;;  %v1736_v58 = vadd.f32 %v7759_v24, %v7757_v38  ;;  %v7923_v36 = vpop.f32.mrf.mxu1  ;;  %v2228_v12 = vadd.f32 %v7832_v9, %v1978_v4  ;;  %v9940_v9 = vld [vmem:[#allocation16_spill] sm:$0xff] }
 0x1c9   : > { %v7884_v43 = vpop.f32.mrf.mxu0  ;;  %v7950_v24 = vadd.f32 %v7792_v37, %v7787_v55  ;;  %v7977_v55 = vadd.f32 %v7814_v28, %v7810_v26  ;;  %v9933_v37 = vld [vmem:[#allocation15_spill] sm:$0xff]  ;;  %v9938_v26 = vld [vmem:[#allocation12_spill] sm:$0xff] }
 0x1ca   : > { %9931 = vst [vmem:[#allocation33_spill] sm:$0xff] %v7884_v43  ;;  %v1728_v43 = vadd.f32 %v7719_v61, %v7717_v48  ;;  %v1734_v48 = vadd.f32 %v7749_v27, %v7747_v20  ;;  %v7940_v20 = vld [vmem:[%s9705_s2] ss:$0 sm:$0xff]  ;;  %v7944_v27 = vadd.f32 %v7784_v8, %v7780_v56  ;;  %v1980_v21 = vadd.f32 %v7834_v16, %v1727_v47  ;;  %v7966_v51 = vpop.f32.mrf.mxu1 }
 0x1cb   : > { %v7888_v0 = vpop.f32.mrf.mxu0  ;;  %v7973_v8 = vadd.f32 %v7812_v15, %v7807_v19  ;;  %v1985_v5 = vadd.f32 %v9933_v37, %v1732_v14  ;;  %v9936_v19 = vld [vmem:[#allocation11_spill] sm:$0xff]  ;;  %v7992_v28 = vadd.f32 %v9938_v26, %v9937_v40  ;;  %v1984_v16 = vadd.f32 %v9940_v9, %v1731_v49  ;;  %v9949_v40 = vld [vmem:[#allocation24_spill] sm:$0xff] }
 0x1cc   : > { %9932 = vst [vmem:[#allocation34_spill] sm:$0xff] %v7888_v0  ;;  %v1730_v0 = vadd.f32 %v7729_v1, %v7727_v30  ;;  %v2229_v30 = vadd.f32 %v7828_v60, %v1979_v25  ;;  %v1981_v1 = vadd.f32 %v7830_v6, %v1728_v43  ;;  %v2230_v42 = vadd.f32 %v9934_v46, %v1980_v21  ;;  %v9939_v60 = vld [vmem:[#allocation14_spill] sm:$0xff]  ;;  %v9941_v25 = vld [vmem:[#allocation17_spill] sm:$0xff] }
 0x1cd   : > { %v7892_v35 = vpop.f32.mrf.mxu0  ;;  %v7988_v15 = vadd.f32 %v9936_v19, %v9935_v34  ;;  %v2232_v4 = vadd.f32 %v9941_v25, %v1982_v2  ;;  %v2235_v14 = vadd.f32 %v9942_v41, %v1985_v5  ;;  %v9948_v34 = vld [vmem:[#allocation28_spill] sm:$0xff]  ;;  %v1991_v26 = vadd.f32 %v9949_v40, %v1738_v7 }
 0x1ce   : > { %v1983_v50 = vadd.f32 %v7838_v45, %v1730_v0  ;;  %v2231_v33 = vadd.f32 %v7836_v57, %v1981_v1  ;;  %v7996_v45 = vpop.f32.mrf.mxu1 }
 0x1cf   : > { %v7898_v44 = vpop.f32.mrf.mxu0 }
 0x1d0   : > { %v2233_v6 = vadd.f32 %v9939_v60, %v1983_v50 }
 0x1d1   : > { %v7915_v61 = vpop.f32.mrf.mxu0 }
 0x1d3   : > { %v6081_v17 = vpop.f32.mrf.mxu0 }
 0x1d4   : > { %v2479_v38 = vadd.f32 %v6081_v17, %v2229_v30  ;;  %v9943_v30 = vld [vmem:[#allocation18_spill] sm:$0xff]  ;;  %v9944_v17 = vld [vmem:[#allocation19_spill] sm:$0xff] }
 0x1d5   : > { %v2359_v52 = vpop.f32.mrf.mxu0  ;;  %v1987_v1 = vadd.f32 %v9943_v30, %v1734_v48 }
 0x1d6   : > { %v7969_v56 = vadd.f32 %v7940_v20, %v2479_v38  ;;  %v2478_v59 = vadd.f32 %v2359_v52, %v2228_v12  ;;  %v1986_v12 = vadd.f32 %v9944_v17, %v1733_v63  ;;  %v9945_v52 = vld [vmem:[#allocation23_spill] sm:$0xff] }
 0x1d7   : > { %v6084_v22 = vpop.f32.mrf.mxu0 }
 0x1d8   : > { %v2534_v23 = vsub.f32 0.0, %v7969_v56  ;;  %v7984_v47 = vadd.f32 %v7940_v20, %v2478_v59  ;;  %v2481_v62 = vadd.f32 %v6084_v22, %v2231_v33  ;;  %v2234_v33 = vadd.f32 %v9945_v52, %v1984_v16  ;;  %v9946_v59 = vld [vmem:[#allocation21_spill] sm:$0xff]  ;;  %v9947_v22 = vld [vmem:[#allocation22_spill] sm:$0xff]  ;;  %v9950_v16 = vld [vmem:[#allocation31_spill] sm:$0xff] }
 0x1d9   : > { %v2369_v57 = vpop.f32.mrf.mxu0  ;;  %v1989_v37 = vadd.f32 %v9946_v59, %v1736_v58  ;;  %v1988_v2 = vadd.f32 %v9947_v22, %v1735_v13  ;;  %v2236_v19 = vadd.f32 %v9948_v34, %v1986_v12  ;;  %v9955_v22 = vld [vmem:[#allocation30_spill] sm:$0xff] }
 0x1da   : > { %v2559_v43 = vmul.f32 1.442695, %v2534_v23  ;;  %v2533_v11 = vsub.f32 0.0, %v7984_v47  ;;  %v8000_v0 = vadd.f32 %v7940_v20, %v2481_v62  ;;  %v2480_v53 = vadd.f32 %v2369_v57, %v2230_v42  ;;  %v6037_v42 = vpop.f32.mrf.mxu1 }
 0x1db   : > { %v6087_v21 = vpop.f32.mrf.mxu0  ;;  %v2237_v62 = vadd.f32 %v7868_v18, %v1987_v1  ;;  %v2239_v57 = vadd.f32 %v9950_v16, %v1989_v37  ;;  %v9951_v18 = vld [vmem:[#allocation25_spill] sm:$0xff]  ;;  %v9952_v1 = vld [vmem:[#allocation26_spill] sm:$0xff] }
 0x1dc   : > { %6248 = vpow2.f32 %v2559_v43  ;;  %v2557_v49 = vmul.f32 1.442695, %v2533_v11  ;;  %v2536_v38 = vsub.f32 0.0, %v8000_v0  ;;  %v8008_v50 = vadd.f32 %v7940_v20, %v2480_v53  ;;  %v2189_v25 = vpop.f32.mrf.mxu1  ;;  %v9957_v16 = vld [vmem:[#allocation33_spill] sm:$0xff] }
 0x1dd   : > { %v2483_v46 = vadd.f32 %v6087_v21, %v2233_v6  ;;  %v2379_v5 = vpop.f32.mrf.mxu0  ;;  %v2238_v43 = vadd.f32 %v7886_v3, %v1988_v2  ;;  %v1990_v11 = vadd.f32 %v9951_v18, %v7931_v10  ;;  %v1993_v17 = vadd.f32 %v9952_v1, %v7935_v39  ;;  %v9953_v3 = vld [vmem:[#allocation27_spill] sm:$0xff] }
 0x1de   : > { %6250 = vpow2.f32 %v2557_v49  ;;  %v2563_v48 = vmul.f32 1.442695, %v2536_v38  ;;  %v2535_v63 = vsub.f32 0.0, %v8008_v50  ;;  %v2482_v23 = vadd.f32 %v2379_v5, %v2232_v4 }
 0x1df   : > { %v8018_v60 = vadd.f32 %v7940_v20, %v2483_v46  ;;  %v6090_v58 = vpop.f32.mrf.mxu0  ;;  %v1992_v12 = vadd.f32 %v9953_v3, %v7944_v27  ;;  %v2240_v37 = vadd.f32 %v7923_v36, %v1990_v11  ;;  %v1994_v39 = vadd.f32 %v9955_v22, %v7954_v32  ;;  %v6040_v27 = vpop.f32.mrf.mxu1 }
 0x1e0   : > { %6252 = vpow2.f32 %v2563_v48  ;;  %v2561_v13 = vmul.f32 1.442695, %v2535_v63  ;;  %v8021_v6 = vadd.f32 %v7940_v20, %v2482_v23  ;;  %v2485_v9 = vadd.f32 %v6090_v58, %v2235_v14  ;;  %v9956_v23 = vld [vmem:[#allocation32_spill] sm:$0xff] }
 0x1e1   : > { %v2538_v53 = vsub.f32 0.0, %v8018_v60  ;;  %v2389_v7 = vpop.f32.mrf.mxu0  ;;  %v2241_v14 = vadd.f32 %v7896_v31, %v1991_v26  ;;  %v2243_v63 = vadd.f32 %v7966_v51, %v1993_v17  ;;  %v2242_v36 = vadd.f32 %v7996_v45, %v1992_v12 }
 0x1e2   : > { %6254 = vpow2.f32 %v2561_v13  ;;  %v2537_v4 = vsub.f32 0.0, %v8021_v6  ;;  %v8030_v41 = vadd.f32 %v7940_v20, %v2485_v9  ;;  %v2484_v30 = vadd.f32 %v2389_v7, %v2234_v33  ;;  %v9954_v33 = vld [vmem:[#allocation29_spill] sm:$0xff] }
 0x1e3   : > { %v2567_v10 = vmul.f32 1.442695, %v2538_v53  ;;  %v6093_v21 = vpop.f32.mrf.mxu0  ;;  %v1995_v31 = vadd.f32 %v9954_v33, %v7950_v24  ;;  %v1997_v24 = vadd.f32 %v9956_v23, %v7958_v29  ;;  %v8057_v9 = vadd.f32 %v2189_v25, %v1994_v39  ;;  %v2199_v29 = vpop.f32.mrf.mxu1 }
 0x1e4   : > { %v2565_v49 = vmul.f32 1.442695, %v2537_v4  ;;  %v2540_v38 = vsub.f32 0.0, %v8030_v41  ;;  %v8039_v52 = vadd.f32 %v7940_v20, %v2484_v30  ;;  %v2487_v59 = vadd.f32 %v6093_v21, %v2237_v62 }
 0x1e5   : > { %6256 = vpow2.f32 %v2567_v10  ;;  %v2399_v2 = vpop.f32.mrf.mxu0  ;;  %v8055_v13 = vadd.f32 %v6037_v42, %v1995_v31  ;;  %v1996_v51 = vadd.f32 %v9957_v16, %v7963_v54  ;;  %v8067_v7 = vadd.f32 %v6040_v27, %v1997_v24  ;;  %v9958_v42 = vld [vmem:[#allocation34_spill] sm:$0xff] }
 0x1e6   : > { %6258 = vpow2.f32 %v2565_v49  ;;  %v2571_v46 = vmul.f32 1.442695, %v2540_v38  ;;  %v2539_v5 = vsub.f32 0.0, %v8039_v52  ;;  %v8048_v48 = vadd.f32 %v7940_v20, %v2487_v59  ;;  %v6043_v59 = vpop.f32.mrf.mxu1 }
 0x1e7   : > { %v2486_v62 = vadd.f32 %v2399_v2, %v2236_v19  ;;  %v6096_v34 = vpop.f32.mrf.mxu0  ;;  %v1999_v25 = vadd.f32 %v9958_v42, %v7973_v8  ;;  %v8073_v10 = vadd.f32 %v2199_v29, %v1996_v51 }
 0x1e8   : > { %6260 = vpow2.f32 %v2571_v46  ;;  %v2569_v32 = vmul.f32 1.442695, %v2539_v5  ;;  %v2542_v40 = vsub.f32 0.0, %v8048_v48  ;;  %v2489_v26 = vadd.f32 %v6096_v34, %v2239_v57 }
 0x1e9   : > { %v6249_v58 = vpop.eup %6248  ;;  %v8062_v45 = vadd.f32 %v7940_v20, %v2486_v62  ;;  %v2409_v18 = vpop.f32.mrf.mxu0  ;;  %v8085_v23 = vadd.f32 %v6043_v59, %v1999_v25 }
 0x1ea   : > { %v2606_v19 = vadd.f32 1.0, %v6249_v58  ;;  %6262 = vpow2.f32 %v2569_v32  ;;  %v2575_v11 = vmul.f32 1.442695, %v2542_v40  ;;  %v8065_v53 = vadd.f32 %v7940_v20, %v2489_v26 }
 0x1eb   : > { %v6251_v57 = vpop.eup %6250  ;;  %v2541_v4 = vsub.f32 0.0, %v8062_v45  ;;  %v2488_v54 = vadd.f32 %v2409_v18, %v2238_v43  ;;  %v6099_v30 = vpop.f32.mrf.mxu0 }
 0x1ec   : > { %6264 = vrcp.f32 %v2606_v19  ;;  %v2605_v1 = vadd.f32 1.0, %v6251_v57  ;;  %v2544_v17 = vsub.f32 0.0, %v8065_v53  ;;  %v2491_v3 = vadd.f32 %v6099_v30, %v2241_v14 }
 0x1ed   : > { %v6253_v12 = vpop.eup %6252  ;;  %6266 = vpow2.f32 %v2575_v11  ;;  %v2573_v21 = vmul.f32 1.442695, %v2541_v4  ;;  %v8076_v49 = vadd.f32 %v7940_v20, %v2488_v54  ;;  %v2419_v38 = vpop.f32.mrf.mxu0  ;;  %v1998_v14 = vadd.f32 %v7892_v35, %v7977_v55 }
 0x1ee   : > { %6268 = vrcp.f32 %v2605_v1  ;;  %v2608_v8 = vadd.f32 1.0, %v6253_v12  ;;  %v2579_v33 = vmul.f32 1.442695, %v2544_v17  ;;  %v8079_v43 = vadd.f32 %v7940_v20, %v2491_v3  ;;  %v2209_v35 = vpop.f32.mrf.mxu1 }
 0x1ef   : > { %v6255_v31 = vpop.eup %6254  ;;  %6270 = vpow2.f32 %v2573_v21  ;;  %v2543_v22 = vsub.f32 0.0, %v8076_v49  ;;  %v2490_v39 = vadd.f32 %v2419_v38, %v2240_v37  ;;  %v6102_v2 = vpop.f32.mrf.mxu0  ;;  %v2248_v57 = vadd.f32 %v2209_v35, %v1998_v14 }
 0x1f0   : > { %6272 = vrcp.f32 %v2608_v8  ;;  %v2607_v27 = vadd.f32 1.0, %v6255_v31  ;;  %v2546_v46 = vsub.f32 0.0, %v8079_v43  ;;  %v2493_v5 = vadd.f32 %v6102_v2, %v2243_v63 }
 0x1f1   : > { %6274 = vpow2.f32 %v2579_v33  ;;  %v2577_v24 = vmul.f32 1.442695, %v2543_v22  ;;  %v8088_v62 = vadd.f32 %v7940_v20, %v2490_v39  ;;  %v2429_v34 = vpop.f32.mrf.mxu0  ;;  %v2001_v63 = vadd.f32 %v7898_v44, %v7988_v15  ;;  %v6046_v44 = vpop.f32.mrf.mxu1 }
 0x1f2   : > { %v6257_v32 = vpop.eup %6256  ;;  %6276 = vrcp.f32 %v2607_v27  ;;  %v2583_v55 = vmul.f32 1.442695, %v2546_v46  ;;  %v8091_v37 = vadd.f32 %v7940_v20, %v2493_v5  ;;  %v2492_v40 = vadd.f32 %v2429_v34, %v2242_v36 }
 0x1f3   : > { %v6259_v26 = vpop.eup %6258  ;;  %v2610_v58 = vadd.f32 1.0, %v6257_v32  ;;  %6278 = vpow2.f32 %v2577_v24  ;;  %v2545_v16 = vsub.f32 0.0, %v8088_v62  ;;  %v6105_v51 = vpop.f32.mrf.mxu0  ;;  %v2000_v1 = vadd.f32 %v7915_v61, %v7992_v28 }
 0x1f4   : > { %v2609_v18 = vadd.f32 1.0, %v6259_v26  ;;  %6280 = vpow2.f32 %v2583_v55  ;;  %v2548_v29 = vsub.f32 0.0, %v8091_v37  ;;  %v8098_v19 = vadd.f32 %v7940_v20, %v2492_v40  ;;  %v2219_v14 = vpop.f32.mrf.mxu1 }
 0x1f5   : > { %v6261_v11 = vpop.eup %6260  ;;  %6282 = vrcp.f32 %v2610_v58  ;;  %v2581_v36 = vmul.f32 1.442695, %v2545_v16  ;;  %v2495_v42 = vadd.f32 %v6105_v51, %v8055_v13  ;;  %v2439_v25 = vpop.f32.mrf.mxu0  ;;  %v2251_v8 = vadd.f32 %v6046_v44, %v2001_v63 }
 0x1f6   : > { %6284 = vrcp.f32 %v2609_v18  ;;  %v2612_v15 = vadd.f32 1.0, %v6261_v11  ;;  %v2587_v4 = vmul.f32 1.442695, %v2548_v29  ;;  %v2547_v54 = vsub.f32 0.0, %v8098_v19 }
 0x1f7   : > { %v6263_v30 = vpop.eup %6262  ;;  %6286 = vpow2.f32 %v2581_v36  ;;  %v8105_v17 = vadd.f32 %v7940_v20, %v2495_v42  ;;  %v2494_v3 = vadd.f32 %v2439_v25, %v8057_v9  ;;  %v6108_v12 = vpop.f32.mrf.mxu0 }
 0x1f8   : > { %6288 = vrcp.f32 %v2612_v15  ;;  %v2611_v13 = vadd.f32 1.0, %v6263_v30  ;;  %v2585_v21 = vmul.f32 1.442695, %v2547_v54  ;;  %v2497_v38 = vadd.f32 %v6108_v12, %v8067_v7 }
 0x1f9   : > { %v6265_v59 = vpop.eup %6264  ;;  %6290 = vpow2.f32 %v2587_v4  ;;  %v2550_v33 = vsub.f32 0.0, %v8105_v17  ;;  %v8111_v31 = vadd.f32 %v7940_v20, %v2494_v3  ;;  %v2449_v61 = vpop.f32.mrf.mxu0 }
 0x1fa   : > { %v6267_v28 = vpop.eup %6266  ;;  %v2678_v22 = vmul.f32 %v6265_v59, %v7969_v56  ;;  %6292 = vrcp.f32 %v2611_v13  ;;  %v8115_v9 = vadd.f32 %v7940_v20, %v2497_v38  ;;  %v2496_v39 = vadd.f32 %v2449_v61, %v8073_v10 }
 0x1fb   : > { %v6269_v7 = vpop.eup %6268  ;;  %v2614_v2 = vadd.f32 1.0, %v6267_v28  ;;  %6294 = vpow2.f32 %v2585_v21  ;;  %v2591_v27 = vmul.f32 1.442695, %v2550_v33  ;;  %v2549_v46 = vsub.f32 0.0, %v8111_v31  ;;  %v6111_v5 = vpop.f32.mrf.mxu0 }
 0x1fc   : > { %v6271_v24 = vpop.eup %6270  ;;  %2702 = vst [vmem:[#allocation2 + $0xa] sm:$0xff] %v2678_v22  ;;  %v2677_v34 = vmul.f32 %v6269_v7, %v7984_v47  ;;  %v2552_v32 = vsub.f32 0.0, %v8115_v9  ;;  %v8122_v56 = vadd.f32 %v7940_v20, %v2496_v39  ;;  %v2499_v35 = vadd.f32 %v6111_v5, %v8085_v23 }
 0x1fd   : > { %v6273_v55 = vpop.eup %6272  ;;  %v2250_v10 = vadd.f32 %v2219_v14, %v2000_v1  ;;  %6296 = vrcp.f32 %v2614_v2  ;;  %v2613_v40 = vadd.f32 1.0, %v6271_v24  ;;  %v2589_v26 = vmul.f32 1.442695, %v2549_v46  ;;  %v2459_v63 = vpop.f32.mrf.mxu0 }
 0x1fe   : > { %v6275_v58 = vpop.eup %6274  ;;  %2701 = vst [vmem:[#allocation2 + $0x2] sm:$0xff] %v2677_v34  ;;  %v2680_v16 = vmul.f32 %v6273_v55, %v8000_v0  ;;  %6298 = vpow2.f32 %v2591_v27  ;;  %v2595_v51 = vmul.f32 1.442695, %v2552_v32  ;;  %v2551_v47 = vsub.f32 0.0, %v8122_v56 }
 0x1ff   : > { %v6277_v18 = vpop.eup %6276  ;;  %6300 = vrcp.f32 %v2613_v40  ;;  %v2616_v29 = vadd.f32 1.0, %v6275_v58  ;;  %v8128_v11 = vadd.f32 %v7940_v20, %v2499_v35  ;;  %v2498_v23 = vadd.f32 %v2459_v63, %v2248_v57  ;;  %v6114_v36 = vpop.f32.mrf.mxu0 }
 0x200   : > { %v6279_v42 = vpop.eup %6278  ;;  %2704 = vst [vmem:[#allocation2 + $0x22] sm:$0xff] %v2680_v16  ;;  %v2679_v25 = vmul.f32 %v6277_v18, %v8008_v50  ;;  %6302 = vpow2.f32 %v2589_v26  ;;  %v2593_v44 = vmul.f32 1.442695, %v2551_v47  ;;  %v2501_v15 = vadd.f32 %v6114_v36, %v2251_v8 }
 0x201   : > { %v6281_v0 = vpop.eup %6280  ;;  %6304 = vrcp.f32 %v2616_v29  ;;  %v2615_v4 = vadd.f32 1.0, %v6279_v42  ;;  %v2554_v54 = vsub.f32 0.0, %v8128_v11  ;;  %v8133_v30 = vadd.f32 %v7940_v20, %v2498_v23  ;;  %v2469_v1 = vpop.f32.mrf.mxu0 }
 0x202   : > { %v6283_v3 = vpop.eup %6282  ;;  %2703 = vst [vmem:[#allocation2 + $0x1a] sm:$0xff] %v2679_v25  ;;  %v2618_v57 = vadd.f32 1.0, %v6281_v0  ;;  %6306 = vpow2.f32 %v2595_v51  ;;  %v8136_v12 = vadd.f32 %v7940_v20, %v2501_v15  ;;  %v2500_v50 = vadd.f32 %v2469_v1, %v2250_v10 }
 0x203   : > { %v6285_v13 = vpop.eup %6284  ;;  %v2682_v21 = vmul.f32 %v6283_v3, %v8018_v60  ;;  %6308 = vrcp.f32 %v2615_v4  ;;  %v2599_v38 = vmul.f32 1.442695, %v2554_v54  ;;  %v2553_v59 = vsub.f32 0.0, %v8133_v30 }
 0x204   : > { %v6287_v8 = vpop.eup %6286  ;;  %v2681_v33 = vmul.f32 %v6285_v13, %v8021_v6  ;;  %6310 = vrcp.f32 %v2618_v57  ;;  %v2556_v61 = vsub.f32 0.0, %v8136_v12  ;;  %v8143_v28 = vadd.f32 %v7940_v20, %v2500_v50 }
 0x205   : > { %v6289_v14 = vpop.eup %6288  ;;  %2706 = vst [vmem:[#allocation2 + $0x3a] sm:$0xff] %v2682_v21  ;;  %v2617_v22 = vadd.f32 1.0, %v6287_v8  ;;  %6312 = vpow2.f32 %v2593_v44  ;;  %v2597_v39 = vmul.f32 1.442695, %v2553_v59 }
 0x206   : > { %v6291_v7 = vpop.eup %6290  ;;  %2705 = vst [vmem:[#allocation2 + $0x32] sm:$0xff] %v2681_v33  ;;  %v2684_v60 = vmul.f32 %v6289_v14, %v8030_v41  ;;  %6314 = vpow2.f32 %v2599_v38  ;;  %v2603_v2 = vmul.f32 1.442695, %v2556_v61  ;;  %v2555_v27 = vsub.f32 0.0, %v8143_v28 }
 0x207   : > { %v6293_v6 = vpop.eup %6292  ;;  %6316 = vrcp.f32 %v2617_v22  ;;  %v2620_v46 = vadd.f32 1.0, %v6291_v7 }
 0x208   : > { %v6295_v5 = vpop.eup %6294  ;;  %2708 = vst [vmem:[#allocation2 + $0x52] sm:$0xff] %v2684_v60  ;;  %v2683_v20 = vmul.f32 %v6293_v6, %v8039_v52  ;;  %6318 = vpow2.f32 %v2597_v39  ;;  %v2601_v24 = vmul.f32 1.442695, %v2555_v27 }
 0x209   : > { %6320 = vrcp.f32 %v2620_v46  ;;  %v2619_v34 = vadd.f32 1.0, %v6295_v5 }
 0x20a   : > { %v6297_v32 = vpop.eup %6296  ;;  %2707 = vst [vmem:[#allocation2 + $0x4a] sm:$0xff] %v2683_v20  ;;  %6322 = vpow2.f32 %v2603_v2 }
 0x20b   : > { %v6299_v35 = vpop.eup %6298  ;;  %v2686_v41 = vmul.f32 %v6297_v32, %v8048_v48  ;;  %6324 = vrcp.f32 %v2619_v34 }
 0x20c   : > { %v6301_v55 = vpop.eup %6300  ;;  %v2622_v10 = vadd.f32 1.0, %v6299_v35  ;;  %6326 = vpow2.f32 %v2601_v24 }
 0x20d   : > { %v6303_v40 = vpop.eup %6302  ;;  %2710 = vst [vmem:[#allocation2 + $0x6a] sm:$0xff] %v2686_v41  ;;  %v2685_v26 = vmul.f32 %v6301_v55, %v8062_v45 }
 0x20e   : > { %v6305_v63 = vpop.eup %6304  ;;  %6328 = vrcp.f32 %v2622_v10  ;;  %v2621_v52 = vadd.f32 1.0, %v6303_v40 }
 0x20f   : > { %v6307_v58 = vpop.eup %6306  ;;  %2709 = vst [vmem:[#allocation2 + $0x62] sm:$0xff] %v2685_v26  ;;  %v2688_v16 = vmul.f32 %v6305_v63, %v8065_v53 }
 0x210   : > { %v6309_v51 = vpop.eup %6308  ;;  %6330 = vrcp.f32 %v2621_v52  ;;  %v2624_v47 = vadd.f32 1.0, %v6307_v58 }
 0x211   : > { %v6311_v18 = vpop.eup %6310  ;;  %2712 = vst [vmem:[#allocation2 + $0x82] sm:$0xff] %v2688_v16  ;;  %v2687_v48 = vmul.f32 %v6309_v51, %v8076_v49 }
 0x212   : > { %v6313_v29 = vpop.eup %6312  ;;  %v2690_v23 = vmul.f32 %v6311_v18, %v8079_v43  ;;  %6332 = vrcp.f32 %v2624_v47 }
 0x213   : > { %v6315_v36 = vpop.eup %6314  ;;  %2711 = vst [vmem:[#allocation2 + $0x7a] sm:$0xff] %v2687_v48  ;;  %v2623_v45 = vadd.f32 1.0, %v6313_v29 }
 0x214   : > { %v6317_v42 = vpop.eup %6316  ;;  %2714 = vst [vmem:[#allocation2 + $0x9a] sm:$0xff] %v2690_v23  ;;  %v2626_v25 = vadd.f32 1.0, %v6315_v36 }
 0x215   : > { %v6319_v44 = vpop.eup %6318  ;;  %v2689_v53 = vmul.f32 %v6317_v42, %v8088_v62  ;;  %6334 = vrcp.f32 %v2623_v45 }
 0x216   : > { %v6321_v15 = vpop.eup %6320  ;;  %6336 = vrcp.f32 %v2626_v25  ;;  %v2625_v0 = vadd.f32 1.0, %v6319_v44 }
 0x217   : > { %v6323_v4 = vpop.eup %6322  ;;  %2713 = vst [vmem:[#allocation2 + $0x92] sm:$0xff] %v2689_v53  ;;  %v2692_v49 = vmul.f32 %v6321_v15, %v8091_v37 }
 0x218   : > { %v6325_v54 = vpop.eup %6324  ;;  %6338 = vrcp.f32 %v2625_v0  ;;  %v2628_v43 = vadd.f32 1.0, %v6323_v4 }
 0x219   : > { %v6327_v1 = vpop.eup %6326  ;;  %2716 = vst [vmem:[#allocation2 + $0xb2] sm:$0xff] %v2692_v49  ;;  %v2691_v3 = vmul.f32 %v6325_v54, %v8098_v19 }
 0x21a   : > { %6340 = vrcp.f32 %v2628_v43  ;;  %v2627_v57 = vadd.f32 1.0, %v6327_v1 }
 0x21b   : > { %v6329_v50 = vpop.eup %6328  ;;  %2715 = vst [vmem:[#allocation2 + $0xaa] sm:$0xff] %v2691_v3 }
 0x21c   : > { %v2694_v62 = vmul.f32 %v6329_v50, %v8105_v17  ;;  %6342 = vrcp.f32 %v2627_v57 }
 0x21d   : > { %v6331_v13 = vpop.eup %6330 }
 0x21e   : > { %2718 = vst [vmem:[#allocation2 + $0xca] sm:$0xff] %v2694_v62  ;;  %v2693_v21 = vmul.f32 %v6331_v13, %v8111_v31 }
 0x21f   : > { %v6333_v38 = vpop.eup %6332 }
 0x220   : > { %2717 = vst [vmem:[#allocation2 + $0xc2] sm:$0xff] %v2693_v21  ;;  %v2696_v37 = vmul.f32 %v6333_v38, %v8115_v9 }
 0x222   : > { %v6335_v59 = vpop.eup %6334  ;;  %2720 = vst [vmem:[#allocation2 + $0xe2] sm:$0xff] %v2696_v37 }
 0x223   : > { %v6337_v8 = vpop.eup %6336  ;;  %v2695_v19 = vmul.f32 %v6335_v59, %v8122_v56 }
 0x224   : > { %v2698_v33 = vmul.f32 %v6337_v8, %v8128_v11 }
 0x225   : > { %v6339_v61 = vpop.eup %6338  ;;  %2719 = vst [vmem:[#allocation2 + $0xda] sm:$0xff] %v2695_v19 }
 0x226   : > { %2722 = vst [vmem:[#allocation2 + $0xfa] sm:$0xff] %v2698_v33  ;;  %v2697_v17 = vmul.f32 %v6339_v61, %v8133_v30 }
 0x227   : > { %v6341_v14 = vpop.eup %6340 }
 0x228   : > { %2721 = vst [vmem:[#allocation2 + $0xf2] sm:$0xff] %v2697_v17  ;;  %v2700_v31 = vmul.f32 %v6341_v14, %v8136_v12  ;;  %2752 = sbr.rel (%p5032_p13) target bundleno = 561 (0x231), region = 52 }
 0x229   : > { %v6343_v22 = vpop.eup %6342 }
 0x22a   : > { %2724 = vst [vmem:[#allocation2 + $0x112] sm:$0xff] %v2700_v31  ;;  %v2699_v9 = vmul.f32 %v6343_v22, %v8143_v28 }
 0x22c   : > { %2723 = vst [vmem:[#allocation2 + $0x10a] sm:$0xff] %v2699_v9 }
 0x22d   : > { %v6593_v56 = vmov 0.0  }
 0x22e   : > { %2753 = vst [vmem:[#allocation2] sm:$0xff] %v6593_v56  ;;  %2754 = vst [vmem:[#allocation2 + $0x8] sm:$0xff] %v6593_v56 }
 0x22f   : > { %2755 = vst [vmem:[#allocation2 + $0x10] sm:$0xf] %v6593_v56  ;;  %2756 = vst [vmem:[#allocation2 + $0x18] sm:$0xff] %v6593_v56 }
 0x230   : > { %2757 = vst [vmem:[#allocation2 + $0x20] sm:$0xff] %v6593_v56  ;;  %2758 = vst [vmem:[#allocation2 + $0x28] sm:$0xf] %v6593_v56 }
 0x231 PF: > { %p5033_p0 = scmp.ne.s32.totalorder %s6574_s27, 1 }
 0x233   : > { %2762 = sbr.rel (%p5033_p0) target bundleno = 572 (0x23c), region = 56 }
 0x238   : > { %v6594_v11 = vmov 0.0  }
 0x239   : > { %2764 = vst [vmem:[#allocation2 + $0xf0] sm:$0xff] %v6594_v11  ;;  %2765 = vst [vmem:[#allocation2 + $0xf8] sm:$0xff] %v6594_v11 }
 0x23a   : > { %2766 = vst [vmem:[#allocation2 + $0x100] sm:$0xf] %v6594_v11  ;;  %2767 = vst [vmem:[#allocation2 + $0x108] sm:$0xff] %v6594_v11 }
 0x23b   : > { %2768 = vst [vmem:[#allocation2 + $0x110] sm:$0xff] %v6594_v11  ;;  %2769 = vst [vmem:[#allocation2 + $0x118] sm:$0xf] %v6594_v11 }
 0x23c PF: > { %v4323_v30 = vld [vmem:[%s9708_s5 + $0x78] sm:$0xff]  ;;  %v4322_v12 = vld [vmem:[%s9708_s5 + $0x70] sm:$0xff]  ;;  %v4321_v28 = vld [vmem:[%s9708_s5 + $0x68] sm:$0xff]  ;;  %s5110_s20 = sshll.u32 %s6574_s27, 4  ;;  %s5106_s10 = sshll.u32 %s6578_s28, 5 }
 0x23d   : > { %6115 = vmatprep.subr.mxu1 %v4323_v30  ;;  %v4320_v39 = vld [vmem:[%s9708_s5 + $0x60] sm:$0xff]  ;;  %v4319_v7 = vld [vmem:[%s9708_s5 + $0x58] sm:$0xff]  ;;  %v4318_v27 = vld [vmem:[%s9708_s5 + $0x50] sm:$0xff]  ;;  %s4653_s16 = sadd.s32 %s5110_s20, %s5106_s10  ;;  %s4656_s21 = sshll.u32 %s8165_s22, 4  ;;  %s9646_s21 = int_to_ptr.vmem [resolvable:$true] %s4656_s21 }
 0x23e   : > { %6116 = vmatpush3.msra.mxu1 %v4323_v30  ;;  %v2770_v60 = vld [vmem:[#allocation2] sm:$0xff]  ;;  %v3050_v40 = vld [vmem:[#allocation2 + $0x18] sm:$0xff]  ;;  %v4317_v26 = vld [vmem:[%s9708_s5 + $0x48] sm:$0xff]  ;;  %s5107_s17 = sshll.u32 %s4653_s16, 7  ;;  %s10234_s27 = sand.u32 1, %s6566_s25  }
 0x23f   : > { %6117 = vmatprep.subr.mxu1 %v4322_v12  ;;  %v8187_v2 = vld [vmem:[%s9706_s3] ss:$0 sm:$0xff]  ;;  %v2825_v46 = vld [vmem:[#allocation2 + $0x1] sm:$0xff]  ;;  %v4315_v4 = vld [vmem:[%s9708_s5 + $0x38] sm:$0xff]  ;;  %s9644_s11 = scalar_lea.hbm %s9710_s7, %s5107_s17  ;;  %s9652_s28 = scalar_lea.sflag [#allocation4], %s10234_s27 }
 0x240   : > { %6118 = vmatpush3.msra.mxu1 %v4322_v12  ;;  %9959 = vst [vmem:[#allocation15_spill] sm:$0xff] %v8187_v2  ;;  %v2793_v6 = vmul.f32 %v8187_v2, %v2770_v60  ;;  %v8196_v5 = vld [vmem:[%s9706_s3 + $0x1] ss:$0 sm:$0xff]  ;;  %v2881_v20 = vld [vmem:[#allocation2 + $0x2] sm:$0xff]  ;;  %v3106_v58 = vld [vmem:[#allocation2 + $0x19] sm:$0xff]  ;;  %v2795_v16 = vmul.f32 %v8187_v2, %v3050_v40  ;;  %s6498_s12 = scalar_lea.vmem %s9646_s21, 2048 }
 0x241   : > { %6119 = vmatprep.subr.mxu1 %v4321_v28  ;;  %v2849_v24 = vmul.f32 %v8196_v5, %v2825_v46  ;;  %v8202_v34 = vld [vmem:[%s9706_s3 + $0x2] ss:$0 sm:$0xff]  ;;  %v2937_v32 = vld [vmem:[#allocation2 + $0x3] sm:$0xff]  ;;  %v3162_v47 = vld [vmem:[#allocation2 + $0x1a] sm:$0xff]  ;;  %v2851_v48 = vmul.f32 %v8196_v5, %v3106_v58  ;;  %p6499_p1 = scmp.ne.s32.totalorder %s9646_s21, %s6498_s12 }
 0x242   : > { %6120 = vmatpush3.msra.mxu1 %v4321_v28  ;;  %v8207_v35 = vld [vmem:[%s9706_s3 + $0x3] ss:$0 sm:$0xff]  ;;  %v2905_v41 = vmul.f32 %v8202_v34, %v2881_v20  ;;  %v2993_v55 = vld [vmem:[#allocation2 + $0x4] sm:$0xff]  ;;  %v3218_v18 = vld [vmem:[#allocation2 + $0x1b] sm:$0xff]  ;;  %v2907_v45 = vmul.f32 %v8202_v34, %v3162_v47 }
 0x243   : > { %6121 = vmatprep.subr.mxu1 %v4320_v39  ;;  %v8213_v10 = vld [vmem:[%s9706_s3 + $0x4] ss:$0 sm:$0xff]  ;;  %v2865_v63 = vadd.f32 %v2849_v24, %v2793_v6  ;;  %v2961_v52 = vmul.f32 %v8207_v35, %v2937_v32  ;;  %v8223_v51 = vld [vmem:[%s9706_s3 + $0x5] ss:$0 sm:$0xff]  ;;  %v3274_v36 = vld [vmem:[#allocation2 + $0x1c] sm:$0xff]  ;;  %v2867_v44 = vadd.f32 %v2851_v48, %v2795_v16  ;;  %v2963_v53 = vmul.f32 %v8207_v35, %v3218_v18  ;;  %p6500_p2 = pnand %p6499_p1, %p6689_p3 }
 0x244   : > { %6122 = vmatpush3.msra.mxu1 %v4320_v39  ;;  %v3017_v23 = vmul.f32 %v8213_v10, %v2993_v55  ;;  %v4316_v42 = vld [vmem:[%s9708_s5 + $0x40] sm:$0xff]  ;;  %v3074_v0 = vmul.f32 %v8223_v51, %v3050_v40  ;;  %v3019_v43 = vmul.f32 %v8213_v10, %v3274_v36  ;;  %v8248_v57 = vld [vmem:[#allocation2 + $0x30] sm:$0xff]  ;;  %v8256_v62 = vld [vmem:[%s9706_s3 + $0x8] ss:$0 sm:$0xff] }
 0x245   : > { %6123 = vmatprep.subr.mxu1 %v4319_v7  ;;  %v2921_v29 = vadd.f32 %v2905_v41, %v2865_v63  ;;  %v8234_v25 = vld [vmem:[%s9706_s3 + $0x6] ss:$0 sm:$0xff]  ;;  %v8244_v49 = vld [vmem:[%s9706_s3 + $0x7] ss:$0 sm:$0xff]  ;;  %v2923_v54 = vadd.f32 %v2907_v45, %v2867_v44  ;;  %v4314_v50 = vld [vmem:[%s9708_s5 + $0x30] sm:$0xff]  ;;  %9961 = vst [vmem:[#allocation9_spill] sm:$0xff] %v8256_v62  ;;  %v3076_v38 = vmul.f32 %v8223_v51, %v8248_v57  ;;  %p6501_p4 = pneg %p6500_p2 }
 0x246   : > { %6124 = vmatpush3.msra.mxu1 %v4319_v7  ;;  %9960 = vst [vmem:[#allocation13_spill] sm:$0xff] %v8244_v49  ;;  %v3130_v3 = vmul.f32 %v8234_v25, %v3106_v58  ;;  %v8261_v13 = vld [vmem:[%s9706_s3 + $0x9] ss:$0 sm:$0xff]  ;;  %v3186_v8 = vmul.f32 %v8244_v49, %v3162_v47  ;;  %v8272_v19 = vld [vmem:[%s9706_s3 + $0xa] ss:$0 sm:$0xff]  ;;  %v4312_v61 = vld [vmem:[%s9708_s5 + $0x20] sm:$0xff]  ;;  %v3242_v56 = vmul.f32 %v8256_v62, %v3218_v18 }
 0x247   : > { %6125 = vmatprep.subr.mxu1 %v4318_v27  ;;  %v2977_v15 = vadd.f32 %v2961_v52, %v2921_v29  ;;  %9962 = vst [vmem:[#allocation11_spill] sm:$0xff] %v8261_v13  ;;  %v2979_v21 = vadd.f32 %v2963_v53, %v2923_v54  ;;  %v4313_v37 = vld [vmem:[%s9708_s5 + $0x28] sm:$0xff]  ;;  %v8282_v17 = vld [vmem:[#allocation2 + $0x31] sm:$0xff]  ;;  %v3298_v11 = vmul.f32 %v8261_v13, %v3274_v36 }
 0x248   : > { %6126 = vmatpush3.msra.mxu1 %v4318_v27  ;;  %v8277_v33 = vld [vmem:[%s9706_s3 + $0xb] ss:$0 sm:$0xff]  ;;  %v8287_v14 = vld [vmem:[%s9706_s3 + $0xc] ss:$0 sm:$0xff]  ;;  %v8292_v31 = vld [vmem:[%s9706_s3 + $0xd] ss:$0 sm:$0xff]  ;;  %v3355_v7 = vmul.f32 %v8272_v19, %v8248_v57  ;;  %v3132_v24 = vmul.f32 %v8234_v25, %v8282_v17 }
 0x249   : > { %6127 = vmatprep.subr.mxu1 %v4317_v26  ;;  %v3033_v1 = vadd.f32 %v3017_v23, %v2977_v15  ;;  %9963 = vst [vmem:[#allocation10_spill] sm:$0xff] %v8277_v33  ;;  %9964 = vst [vmem:[#allocation12_spill] sm:$0xff] %v8287_v14  ;;  %v3035_v22 = vadd.f32 %v3019_v43, %v2979_v21  ;;  %v8296_v30 = vld [vmem:[#allocation2 + $0x32] sm:$0xff]  ;;  %v8301_v12 = vld [vmem:[%s9706_s3 + $0xe] ss:$0 sm:$0xff]  ;;  %v8315_v60 = vmul.f32 %v8277_v33, %v8282_v17 }
 0x24a   : > { %6128 = vmatpush3.msra.mxu1 %v4317_v26  ;;  %9965 = vst [vmem:[#allocation14_spill] sm:$0xff] %v8301_v12  ;;  %v8306_v28 = vld [vmem:[%s9706_s3 + $0xf] ss:$0 sm:$0xff]  ;;  %v4311_v39 = vld [vmem:[%s9708_s5 + $0x18] sm:$0xff]  ;;  %v8327_v41 = vmul.f32 %v8287_v14, %v8296_v30  ;;  %v8338_v26 = vld [vmem:[%s9706_s3 + $0x10] ss:$0 sm:$0xff]  ;;  %v3188_v52 = vmul.f32 %v8244_v49, %v8296_v30 }
 0x24b   : > { %6129 = vmatprep.subr.mxu1 %v4316_v42  ;;  %v3090_v59 = vadd.f32 %v3074_v0, %v3033_v1  ;;  %9966 = vst [vmem:[#allocation16_spill] sm:$0xff] %v8306_v28  ;;  %v8317_v27 = vld [vmem:[#allocation2 + $0x33] sm:$0xff]  ;;  %v8321_v46 = vld [vmem:[#allocation2 + $0x48] sm:$0xff]  ;;  %v3092_v20 = vadd.f32 %v3076_v38, %v3035_v22  ;;  %v8343_v63 = vld [vmem:[%s9706_s3 + $0x11] ss:$0 sm:$0xff] }
 0x24c   : > { %6130 = vmatpush3.msra.mxu1 %v4316_v42  ;;  %9967 = vst [vmem:[#allocation17_spill] sm:$0xff] %v8317_v27  ;;  %v8319_v6 = vld [vmem:[#allocation2 + $0x34] sm:$0xff]  ;;  %9969 = vst [vmem:[#allocation18_spill] sm:$0xff] %v8321_v46  ;;  %v8331_v55 = vmul.f32 %v8292_v31, %v8317_v27  ;;  %v8333_v40 = vld [vmem:[#allocation2 + $0x49] sm:$0xff]  ;;  %v8356_v47 = vmul.f32 %v8306_v28, %v8321_v46  ;;  %v8365_v23 = vmul.f32 %v8256_v62, %v8317_v27 }
 0x24d   : > { %6131 = vmatprep.subr.mxu1 %v4315_v4  ;;  %v3146_v9 = vadd.f32 %v3130_v3, %v3090_v59  ;;  %9968 = vst [vmem:[#allocation20_spill] sm:$0xff] %v8319_v6  ;;  %9970 = vst [vmem:[#allocation19_spill] sm:$0xff] %v8333_v40  ;;  %v4310_v58 = vld [vmem:[%s9708_s5 + $0x10] sm:$0xff]  ;;  %v8352_v16 = vmul.f32 %v8301_v12, %v8319_v6  ;;  %v2771_v48 = vld [vmem:[#allocation2 + $0x8] sm:$0xff]  ;;  %v8369_v36 = vmul.f32 %v8261_v13, %v8319_v6 }
 0x24e   : > { %6132 = vmatpush3.msra.mxu1 %v4315_v4  ;;  %v8361_v18 = vld [vmem:[%s9706_s3 + $0x12] ss:$0 sm:$0xff]  ;;  %v2826_v29 = vld [vmem:[#allocation2 + $0x9] sm:$0xff]  ;;  %v8374_v42 = vld [vmem:[%s9706_s3 + $0x13] ss:$0 sm:$0xff]  ;;  %v2794_v44 = vmul.f32 %v8187_v2, %v2771_v48  ;;  %v8380_v4 = vmul.f32 %v8272_v19, %v8321_v46  ;;  %v8384_v54 = vmul.f32 %v8338_v26, %v8333_v40  ;;  %v3148_v21 = vadd.f32 %v3132_v24, %v3092_v20 }
 0x24f   : > { %6133 = vmatprep.subr.mxu1 %v4314_v50  ;;  %v3202_v32 = vadd.f32 %v3186_v8, %v3146_v9  ;;  %9971 = vst [vmem:[#allocation23_spill] sm:$0xff] %v8361_v18  ;;  %9972 = vst [vmem:[#allocation21_spill] sm:$0xff] %v8374_v42  ;;  %v2850_v53 = vmul.f32 %v8196_v5, %v2826_v29  ;;  %v2882_v15 = vld [vmem:[#allocation2 + $0xa] sm:$0xff]  ;;  %v8393_v38 = vmul.f32 %v8277_v33, %v8333_v40  ;;  %v8400_v8 = vld [vmem:[%s9706_s3 + $0x14] ss:$0 sm:$0xff] }
 0x250   : > { %6134 = vmatpush3.msra.mxu1 %v4314_v50  ;;  %v2938_v0 = vld [vmem:[#allocation2 + $0xb] sm:$0xff]  ;;  %v2906_v3 = vmul.f32 %v8202_v34, %v2882_v15  ;;  %9976 = vst [vmem:[#allocation31_spill] sm:$0xff] %v8400_v8  ;;  %v8427_v48 = vld [vmem:[#allocation2 + $0x60] sm:$0xff] }
 0x251   : > { %6135 = vmatprep.subr.mxu1 %v4313_v37  ;;  %v3258_v45 = vadd.f32 %v3242_v56, %v3202_v32  ;;  %v8386_v43 = vld [vmem:[#allocation2 + $0x4a] sm:$0xff]  ;;  %v2866_v22 = vadd.f32 %v2850_v53, %v2794_v44  ;;  %v2962_v9 = vmul.f32 %v8207_v35, %v2938_v0  ;;  %9978 = vst [vmem:[#allocation26_spill] sm:$0xff] %v8427_v48  ;;  %v8438_v44 = vld [vmem:[%s9706_s3 + $0x16] ss:$0 sm:$0xff]  ;;  %v8443_v53 = vld [vmem:[%s9706_s3 + $0x17] ss:$0 sm:$0xff] }
 0x252   : > { %6136 = vmatpush3.msra.mxu1 %v4313_v37  ;;  %9973 = vst [vmem:[#allocation22_spill] sm:$0xff] %v8386_v43  ;;  %v8388_v1 = vld [vmem:[#allocation2 + $0x4b] sm:$0xff]  ;;  %v8410_v56 = vmul.f32 %v8287_v14, %v8386_v43  ;;  %v8417_v20 = vmul.f32 %v8343_v63, %v8386_v43  ;;  %9980 = vst [vmem:[#allocation29_spill] sm:$0xff] %v8438_v44  ;;  %v8471_v40 = vld [vmem:[#allocation2 + $0x62] sm:$0xff] }
 0x253   : > { %6137 = vmatprep.subr.mxu1 %v4312_v61  ;;  %9974 = vst [vmem:[#allocation28_spill] sm:$0xff] %v8388_v1  ;;  %v2994_v50 = vld [vmem:[#allocation2 + $0xc] sm:$0xff]  ;;  %v3314_v37 = vadd.f32 %v3298_v11, %v3258_v45  ;;  %v8421_v24 = vmul.f32 %v8361_v18, %v8388_v1  ;;  %v8433_v45 = vld [vmem:[#allocation2 + $0x61] sm:$0xff]  ;;  %9981 = vst [vmem:[#allocation30_spill] sm:$0xff] %v8443_v53  ;;  %v2922_v15 = vadd.f32 %v2906_v3, %v2866_v22 }
 0x254   : > { %6138 = vmatpush3.msra.mxu1 %v4312_v61  ;;  %v8395_v59 = vld [vmem:[#allocation2 + $0x4c] sm:$0xff]  ;;  %v8405_v61 = vld [vmem:[%s9706_s3 + $0x15] ss:$0 sm:$0xff]  ;;  %9979 = vst [vmem:[#allocation27_spill] sm:$0xff] %v8433_v45  ;;  %v3018_v0 = vmul.f32 %v8213_v10, %v2994_v50  ;;  %v8464_v3 = vld [vmem:[%s9706_s3 + $0x18] ss:$0 sm:$0xff]  ;;  %v3204_v22 = vadd.f32 %v3188_v52, %v3148_v21  ;;  %v8478_v27 = vmul.f32 %v8338_v26, %v8433_v45 }
 0x255   : > { %6139 = vmatprep.subr.mxu1 %v4311_v39  ;;  %9975 = vst [vmem:[#allocation24_spill] sm:$0xff] %v8395_v59  ;;  %9977 = vst [vmem:[#allocation25_spill] sm:$0xff] %v8405_v61  ;;  %v4309_v11 = vld [vmem:[%s9708_s5 + $0x8] sm:$0xff]  ;;  %v8425_v32 = vmul.f32 %v8374_v42, %v8395_v59  ;;  %v3371_v29 = vadd.f32 %v3355_v7, %v3314_v37  ;;  %v4308_v7 = vld [vmem:[%s9708_s5] sm:$0xff]  ;;  %v8455_v37 = vmul.f32 %v8400_v8, %v8427_v48 }
 0x256   : > { %6140 = vmatpush3.msra.mxu1 %v4311_v39  ;;  %v8431_v39 = vmul.f32 %v8292_v31, %v8388_v1  ;;  %v8448_v1 = vmul.f32 %v8301_v12, %v8395_v59  ;;  %v8459_v43 = vmul.f32 %v8405_v61, %v8433_v45  ;;  %9984 = vst [vmem:[#allocation34_spill] sm:$0xff] %v8464_v3  ;;  %v3051_v50 = vld [vmem:[#allocation2 + $0x20] sm:$0xff]  ;;  %9985 = vst [vmem:[#allocation35_spill] sm:$0xff] %v8471_v40 }
 0x257   : > { %6141 = vmatprep.subr.mxu1 %v4310_v58  ;;  %9982 = vst [vmem:[#allocation32_spill] sm:$0xff] %v8455_v37  ;;  %v3427_v59 = vadd.f32 %v8315_v60, %v3371_v29  ;;  %v8473_v46 = vld [vmem:[#allocation2 + $0x63] sm:$0xff]  ;;  %v2978_v6 = vadd.f32 %v2962_v9, %v2922_v15  ;;  %9987 = vst [vmem:[#allocation37_spill] sm:$0xff] %v8478_v27  ;;  %v8482_v52 = vmul.f32 %v8438_v44, %v8471_v40 }
 0x258   : > { %6142 = vmatpush3.msra.mxu1 %v4310_v58  ;;  %9983 = vst [vmem:[#allocation33_spill] sm:$0xff] %v8459_v43  ;;  %v8468_v58 = vmul.f32 %v8306_v28, %v8427_v48  ;;  %9986 = vst [vmem:[#allocation36_spill] sm:$0xff] %v8473_v46  ;;  %v3075_v43 = vmul.f32 %v8223_v51, %v3051_v50  ;;  %v8486_v21 = vmul.f32 %v8443_v53, %v8473_v46  ;;  %v8488_v60 = vld [vmem:[#allocation2 + $0x64] sm:$0xff] }
 0x259   : > { %6143 = vmatprep.subr.mxu1 %v4309_v11  ;;  %9988 = vst [vmem:[#allocation38_spill] sm:$0xff] %v8482_v52  ;;  %9990 = vst [vmem:[#allocation40_spill] sm:$0xff] %v8488_v60  ;;  %v3107_v29 = vld [vmem:[#allocation2 + $0x21] sm:$0xff]  ;;  %v8492_v9 = vmul.f32 %v8343_v63, %v8471_v40  ;;  %v8496_v15 = vmul.f32 %v8361_v18, %v8473_v46  ;;  %v8501_v45 = vmul.f32 %v8464_v3, %v8488_v60 }
 0x25a   : > { %6144 = vmatpush3.msra.mxu1 %v4309_v11  ;;  %9989 = vst [vmem:[#allocation39_spill] sm:$0xff] %v8486_v21  ;;  %v3483_v11 = vadd.f32 %v8327_v41, %v3427_v59  ;;  %v3034_v48 = vadd.f32 %v3018_v0, %v2978_v6  ;;  %v3131_v21 = vmul.f32 %v8234_v25, %v3107_v29  ;;  %v3163_v52 = vld [vmem:[#allocation2 + $0x22] sm:$0xff] }
 0x25b   : > { %9991 = vst [vmem:[#allocation41_spill] sm:$0xff] %v8492_v9  ;;  %9992 = vst [vmem:[#allocation42_spill] sm:$0xff] %v8496_v15  ;;  %6145 = vmatprep.subr.mxu1 %v4308_v7  ;;  %v3187_v27 = vmul.f32 %v8244_v49, %v3163_v52  ;;  %v3219_v40 = vld [vmem:[#allocation2 + $0x23] sm:$0xff]  ;;  %v3260_v37 = vadd.f32 %v8365_v23, %v3204_v22  ;;  %v8508_v46 = vmul.f32 %v8374_v42, %v8488_v60  ;;  %v8519_v15 = vld [vmem:[#allocation2 + $0x39] sm:$0xff] }
 0x25c   : > { %9993 = vst [vmem:[#allocation43_spill] sm:$0xff] %v8501_v45  ;;  %6146 = vmatpush3.msra.mxu1 %v4308_v7  ;;  %v3275_v9 = vld [vmem:[#allocation2 + $0x24] sm:$0xff]  ;;  %v8512_v41 = vmul.f32 %v8187_v2, %v8248_v57  ;;  %v3539_v6 = vadd.f32 %v8331_v55, %v3483_v11  ;;  %v3091_v59 = vadd.f32 %v3075_v43, %v3034_v48  ;;  %v8517_v45 = vld [vmem:[#allocation2 + $0x38] sm:$0xff] }
 0x25d   : > { %9994 = vst [vmem:[#allocation44_spill] sm:$0xff] %v8508_v46  ;;  %v3243_v0 = vmul.f32 %v8256_v62, %v3219_v40  ;;  %v3299_v7 = vmul.f32 %v8261_v13, %v3275_v9  ;;  %v3316_v23 = vadd.f32 %v8369_v36, %v3260_v37  ;;  %v2796_v22 = vmul.f32 %v8187_v2, %v3051_v50  ;;  %v8530_v11 = vld [vmem:[#allocation2 + $0x3a] sm:$0xff] }
 0x25e   : > { %v2852_v60 = vmul.f32 %v8196_v5, %v3107_v29  ;;  %v2908_v57 = vmul.f32 %v8202_v34, %v3163_v52  ;;  %v3595_v46 = vadd.f32 %v8352_v16, %v3539_v6  ;;  %v3147_v55 = vadd.f32 %v3131_v21, %v3091_v59  ;;  %v8534_v37 = vld [vmem:[#allocation2 + $0x3b] sm:$0xff] }
 0x25f   : > { %v3356_v43 = vmul.f32 %v8272_v19, %v8517_v45  ;;  %v3412_v48 = vmul.f32 %v8277_v33, %v8519_v15  ;;  %v3468_v36 = vmul.f32 %v8287_v14, %v8530_v11  ;;  %v8536_v50 = vld [vmem:[#allocation2 + $0x3c] sm:$0xff]  ;;  %v3373_v52 = vadd.f32 %v8380_v4, %v3316_v23  ;;  %v8547_v14 = vld [vmem:[#allocation2 + $0x50] sm:$0xff] }
 0x260   : > { %v2868_v29 = vadd.f32 %v2852_v60, %v2796_v22  ;;  %v2964_v16 = vmul.f32 %v8207_v35, %v3219_v40  ;;  %v3652_v21 = vadd.f32 %v8356_v47, %v3595_v46  ;;  %v3203_v6 = vadd.f32 %v3187_v27, %v3147_v55  ;;  %9995 = vst [vmem:[#allocation45_spill] sm:$0xff] %v8547_v14  ;;  %v8553_v4 = vld [vmem:[#allocation2 + $0x51] sm:$0xff] }
 0x261   : > { %v3524_v59 = vmul.f32 %v8292_v31, %v8534_v37  ;;  %v8545_v2 = vmul.f32 %v8301_v12, %v8536_v50  ;;  %v8551_v33 = vmul.f32 %v8306_v28, %v8547_v14  ;;  %9996 = vst [vmem:[#allocation46_spill] sm:$0xff] %v8553_v4  ;;  %v8555_v60 = vld [vmem:[#allocation2 + $0x52] sm:$0xff]  ;;  %v3429_v46 = vadd.f32 %v8393_v38, %v3373_v52 }
 0x262   : > { %9997 = vst [vmem:[#allocation47_spill] sm:$0xff] %v8555_v60  ;;  %v2924_v27 = vadd.f32 %v2908_v57, %v2868_v29  ;;  %v3020_v40 = vmul.f32 %v8213_v10, %v3275_v9  ;;  %v3708_v47 = vadd.f32 %v8384_v54, %v3652_v21  ;;  %v3259_v23 = vadd.f32 %v3243_v0, %v3203_v6  ;;  %v8568_v28 = vld [vmem:[#allocation2 + $0x53] sm:$0xff]  ;;  %v8576_v9 = vld [vmem:[#allocation2 + $0x68] sm:$0xff] }
 0x263   : > { %v8562_v22 = vmul.f32 %v8338_v26, %v8553_v4  ;;  %v8566_v55 = vmul.f32 %v8343_v63, %v8555_v60  ;;  %9998 = vst [vmem:[#allocation48_spill] sm:$0xff] %v8568_v28  ;;  %v8572_v12 = vmul.f32 %v8361_v18, %v8568_v28  ;;  %v8574_v38 = vld [vmem:[#allocation2 + $0x54] sm:$0xff]  ;;  %v3485_v54 = vadd.f32 %v8410_v56, %v3429_v46  ;;  %v8590_v18 = vld [vmem:[#allocation2 + $0x69] sm:$0xff] }
 0x264   : > { %v2980_v0 = vadd.f32 %v2964_v16, %v2924_v27  ;;  %v3077_v57 = vmul.f32 %v8223_v51, %v8517_v45  ;;  %v3764_v52 = vadd.f32 %v8417_v20, %v3708_v47  ;;  %v3315_v29 = vadd.f32 %v3299_v7, %v3259_v23  ;;  %v8596_v16 = vld [vmem:[#allocation2 + $0x6a] sm:$0xff] }
 0x265   : > { %v8584_v21 = vmul.f32 %v8374_v42, %v8574_v38  ;;  %v8588_v6 = vmul.f32 %v8400_v8, %v8576_v9  ;;  %v8594_v56 = vmul.f32 %v8405_v61, %v8590_v18  ;;  %10001 = vst [vmem:[#allocation51_spill] sm:$0xff] %v8596_v16  ;;  %v8598_v46 = vld [vmem:[#allocation2 + $0x6b] sm:$0xff]  ;;  %v3541_v20 = vadd.f32 %v8431_v39, %v3485_v54  ;;  %v8619_v54 = vld [vmem:[#allocation2 + $0x78] sm:$0xff] }
 0x266   : > { %10002 = vst [vmem:[#allocation52_spill] sm:$0xff] %v8598_v46  ;;  %v3036_v7 = vadd.f32 %v3020_v40, %v2980_v0  ;;  %v3133_v27 = vmul.f32 %v8234_v25, %v8519_v15  ;;  %v3820_v47 = vadd.f32 %v8421_v24, %v3764_v52  ;;  %v3372_v23 = vadd.f32 %v3356_v43, %v3315_v29 }
 0x267   : > { %9999 = vst [vmem:[#allocation49_spill] sm:$0xff] %v8588_v6  ;;  %10000 = vst [vmem:[#allocation50_spill] sm:$0xff] %v8594_v56  ;;  %v8606_v42 = vmul.f32 %v8438_v44, %v8596_v16  ;;  %v8610_v56 = vmul.f32 %v8443_v53, %v8598_v46  ;;  %v8612_v6 = vld [vmem:[#allocation2 + $0x6c] sm:$0xff]  ;;  %v3597_v40 = vadd.f32 %v8448_v1, %v3541_v20 }
 0x268   : > { %10005 = vst [vmem:[#allocation55_spill] sm:$0xff] %v8612_v6  ;;  %v8616_v39 = vmul.f32 %v8464_v3, %v8612_v6  ;;  %10007 = vst [vmem:[#allocation57_spill] sm:$0xff] %v8619_v54  ;;  %v3093_v24 = vadd.f32 %v3077_v57, %v3036_v7  ;;  %v3189_v43 = vmul.f32 %v8244_v49, %v8530_v11  ;;  %v10009_v7 = vld [vmem:[#allocation32_spill] sm:$0xff] }
 0x269   : > { %10003 = vst [vmem:[#allocation53_spill] sm:$0xff] %v8606_v42  ;;  %10004 = vst [vmem:[#allocation54_spill] sm:$0xff] %v8610_v56  ;;  %v3876_v0 = vadd.f32 %v8425_v32, %v3820_v47  ;;  %v3428_v52 = vadd.f32 %v3412_v48, %v3372_v23  ;;  %v3919_v29 = vmul.f32 %v8400_v8, %v8619_v54  ;;  %v10010_v54 = vld [vmem:[#allocation37_spill] sm:$0xff] }
 0x26a   : > { %10006 = vst [vmem:[#allocation56_spill] sm:$0xff] %v8616_v39  ;;  %v3245_v56 = vmul.f32 %v8256_v62, %v8534_v37  ;;  %v3654_v6 = vadd.f32 %v8468_v58, %v3597_v40  ;;  %v8629_v39 = vld [vmem:[#allocation2 + $0x79] sm:$0xff]  ;;  %v3149_v1 = vadd.f32 %v3133_v27, %v3093_v24  ;;  %v2853_v57 = vmul.f32 %v8196_v5, %v8282_v17 }
 0x26b   : > { %10008 = vst [vmem:[#allocation58_spill] sm:$0xff] %v8629_v39  ;;  %v2909_v20 = vmul.f32 %v8202_v34, %v8296_v30  ;;  %v3933_v32 = vadd.f32 %v10009_v7, %v3876_v0  ;;  %v3484_v48 = vadd.f32 %v3468_v36, %v3428_v52  ;;  %v3975_v47 = vmul.f32 %v8405_v61, %v8629_v39  ;;  %v8641_v40 = vld [vmem:[#allocation2 + $0x7a] sm:$0xff]  ;;  %v10028_v61 = vld [vmem:[#allocation22_spill] sm:$0xff] }
 0x26c   : > { %v3301_v23 = vmul.f32 %v8261_v13, %v8536_v50  ;;  %v3710_v58 = vadd.f32 %v10010_v54, %v3654_v6  ;;  %10011 = vst [vmem:[#allocation32_spill] sm:$0xff] %v8641_v40  ;;  %v3205_v27 = vadd.f32 %v3189_v43, %v3149_v1  ;;  %v2869_v24 = vadd.f32 %v2853_v57, %v8512_v41  ;;  %v10012_v17 = vld [vmem:[#allocation17_spill] sm:$0xff]  ;;  %v10016_v1 = vld [vmem:[#allocation20_spill] sm:$0xff]  ;;  %v10017_v57 = vld [vmem:[#allocation38_spill] sm:$0xff] }
 0x26d   : > { %v2965_v8 = vmul.f32 %v8207_v35, %v10012_v17  ;;  %v10013_v30 = vld [vmem:[#allocation33_spill] sm:$0xff]  ;;  %v3540_v0 = vadd.f32 %v3524_v59, %v3484_v48  ;;  %v4031_v36 = vmul.f32 %v8438_v44, %v8641_v40  ;;  %v3358_v52 = vmul.f32 %v8272_v19, %v8547_v14  ;;  %v10018_v48 = vld [vmem:[#allocation10_spill] sm:$0xff] }
 0x26e   : > { %v3989_v42 = vadd.f32 %v10013_v30, %v3933_v32  ;;  %v10014_v7 = vld [vmem:[#allocation41_spill] sm:$0xff]  ;;  %v3261_v54 = vadd.f32 %v3245_v56, %v3205_v27  ;;  %v2925_v43 = vadd.f32 %v2909_v20, %v2869_v24  ;;  %v3021_v41 = vmul.f32 %v8213_v10, %v10016_v1  ;;  %v10019_v40 = vld [vmem:[#allocation42_spill] sm:$0xff]  ;;  %v10022_v24 = vld [vmem:[#allocation39_spill] sm:$0xff] }
 0x26f   : > { %v3766_v39 = vadd.f32 %v10014_v7, %v3710_v58  ;;  %v8652_v6 = vld [vmem:[#allocation2 + $0x7b] sm:$0xff]  ;;  %v3596_v32 = vadd.f32 %v8545_v2, %v3540_v0  ;;  %v3414_v30 = vmul.f32 %v10018_v48, %v8553_v4  ;;  %v10021_v20 = vld [vmem:[#allocation18_spill] sm:$0xff] }
 0x270   : > { %10015 = vst [vmem:[#allocation37_spill] sm:$0xff] %v8652_v6  ;;  %v4045_v17 = vadd.f32 %v10017_v57, %v3989_v42  ;;  %v4087_v59 = vmul.f32 %v8443_v53, %v8652_v6  ;;  %v8663_v58 = vld [vmem:[#allocation2 + $0x7c] sm:$0xff]  ;;  %v3317_v7 = vadd.f32 %v3301_v23, %v3261_v54  ;;  %v2981_v56 = vadd.f32 %v2965_v8, %v2925_v43  ;;  %v10025_v43 = vld [vmem:[#allocation19_spill] sm:$0xff] }
 0x271   : > { %v3822_v44 = vadd.f32 %v10019_v40, %v3766_v39  ;;  %10020 = vst [vmem:[#allocation17_spill] sm:$0xff] %v8663_v58  ;;  %v3078_v27 = vmul.f32 %v8223_v51, %v10021_v20  ;;  %v3653_v42 = vadd.f32 %v8551_v33, %v3596_v32  ;;  %v4143_v2 = vmul.f32 %v8464_v3, %v8663_v58  ;;  %v10023_v0 = vld [vmem:[#allocation12_spill] sm:$0xff]  ;;  %v8676_v39 = vld [vmem:[%s9707_s4] ss:$0 sm:$0xff]  ;;  %v10027_v20 = vld [vmem:[#allocation14_spill] sm:$0xff] }
 0x272   : > { %v4101_v1 = vadd.f32 %v10022_v24, %v4045_v17  ;;  %v3470_v57 = vmul.f32 %v10023_v0, %v8555_v60  ;;  %v10024_v23 = vld [vmem:[#allocation44_spill] sm:$0xff]  ;;  %v3374_v40 = vadd.f32 %v3358_v52, %v3317_v7  ;;  %v3037_v54 = vadd.f32 %v3021_v41, %v2981_v56  ;;  %v10026_v24 = vld [vmem:[#allocation43_spill] sm:$0xff] }
 0x273   : > { %v3878_v8 = vadd.f32 %v10024_v23, %v3822_v44  ;;  %v3134_v17 = vmul.f32 %v8234_v25, %v10025_v43  ;;  %v3709_v32 = vadd.f32 %v8562_v22, %v3653_v42  ;;  %v3526_v58 = vmul.f32 %v8292_v31, %v8568_v28  ;;  %v10030_v7 = vld [vmem:[#allocation16_spill] sm:$0xff] }
 0x274   : > { %v4157_v33 = vadd.f32 %v10026_v24, %v4101_v1  ;;  %v3582_v6 = vmul.f32 %v10027_v20, %v8574_v38  ;;  %v3430_v53 = vadd.f32 %v3414_v30, %v3374_v40  ;;  %v3094_v60 = vadd.f32 %v3078_v27, %v3037_v54 }
 0x275   : > { %v3935_v3 = vadd.f32 %v3919_v29, %v3878_v8  ;;  %v3190_v44 = vmul.f32 %v8244_v49, %v10028_v61  ;;  %v3765_v41 = vadd.f32 %v8566_v55, %v3709_v32  ;;  %v3639_v22 = vmul.f32 %v10030_v7, %v8576_v9  ;;  %v10031_v29 = vld [vmem:[#allocation28_spill] sm:$0xff]  ;;  %v10033_v61 = vld [vmem:[#allocation26_spill] sm:$0xff] }
 0x276   : > { %v8690_v52 = vadd.f32 %v8676_v39, %v4157_v33  ;;  %v3695_v56 = vmul.f32 %v8338_v26, %v8590_v18  ;;  %v3486_v42 = vadd.f32 %v3470_v57, %v3430_v53  ;;  %v3150_v23 = vadd.f32 %v3134_v17, %v3094_v60  ;;  %v10032_v55 = vld [vmem:[#allocation24_spill] sm:$0xff] }
 0x277   : > { %v3991_v1 = vadd.f32 %v3975_v47, %v3935_v3  ;;  %v3246_v30 = vmul.f32 %v8256_v62, %v10031_v29  ;;  %v3821_v8 = vadd.f32 %v8572_v12, %v3765_v41  ;;  %v3751_v40 = vmul.f32 %v8343_v63, %v8596_v16  ;;  %v10034_v47 = vld [vmem:[#allocation27_spill] sm:$0xff] }
 0x278   : > { %10029 = vst [vmem:[#allocation33_spill] sm:$0xff] %v8690_v52  ;;  %v4196_v27 = vsub.f32 0.0, %v8690_v52  ;;  %v3302_v54 = vmul.f32 %v8261_v13, %v10032_v55  ;;  %v3542_v33 = vadd.f32 %v3526_v58, %v3486_v42  ;;  %v3206_v32 = vadd.f32 %v3190_v44, %v3150_v23  ;;  %v10035_v12 = vld [vmem:[#allocation15_spill] sm:$0xff]  ;;  %v10036_v58 = vld [vmem:[#allocation49_spill] sm:$0xff] }
 0x279   : > { %v4047_v24 = vadd.f32 %v4031_v36, %v3991_v1  ;;  %v3359_v53 = vmul.f32 %v8272_v19, %v10033_v61  ;;  %v3877_v60 = vadd.f32 %v8584_v21, %v3821_v8  ;;  %v3415_v57 = vmul.f32 %v10018_v48, %v10034_v47 }
 0x27a   : > { %v4212_v3 = vmul.f32 1.442695, %v4196_v27  ;;  %v2798_v17 = vmul.f32 %v10035_v12, %v8517_v45  ;;  %v3598_v52 = vadd.f32 %v3582_v6, %v3542_v33  ;;  %v3262_v16 = vadd.f32 %v3246_v30, %v3206_v32  ;;  %v10037_v45 = vld [vmem:[#allocation50_spill] sm:$0xff]  ;;  %v10038_v6 = vld [vmem:[#allocation23_spill] sm:$0xff] }
 0x27b   : > { %v4103_v41 = vadd.f32 %v4087_v59, %v4047_v24  ;;  %v2854_v36 = vmul.f32 %v8196_v5, %v8519_v15  ;;  %v3934_v44 = vadd.f32 %v10036_v58, %v3877_v60  ;;  %v2910_v1 = vmul.f32 %v8202_v34, %v8530_v11  ;;  %v10039_v24 = vld [vmem:[#allocation35_spill] sm:$0xff]  ;;  %v10044_v60 = vld [vmem:[#allocation36_spill] sm:$0xff]  ;;  %v8737_v58 = vld [vmem:[#allocation2 + $0x80] sm:$0xff] }
 0x27c   : > { %6344 = vpow2.f32 %v4212_v3  ;;  %v2966_v21 = vmul.f32 %v8207_v35, %v8534_v37  ;;  %v3655_v23 = vadd.f32 %v3639_v22, %v3598_v52  ;;  %v3318_v27 = vadd.f32 %v3302_v54, %v3262_v16  ;;  %v10041_v52 = vld [vmem:[#allocation53_spill] sm:$0xff]  ;;  %v10042_v22 = vld [vmem:[#allocation55_spill] sm:$0xff]  ;;  %10045 = vst [vmem:[#allocation20_spill] sm:$0xff] %v8737_v58 }
 0x27d   : > { %v4159_v42 = vadd.f32 %v4143_v2, %v4103_v41  ;;  %v2870_v8 = vadd.f32 %v2854_v36, %v2798_v17  ;;  %v3990_v59 = vadd.f32 %v10037_v45, %v3934_v44  ;;  %v3807_v30 = vmul.f32 %v10038_v6, %v8598_v46  ;;  %v10043_v54 = vld [vmem:[#allocation21_spill] sm:$0xff] }
 0x27e   : > { %v3471_v15 = vmul.f32 %v10023_v0, %v10039_v24  ;;  %v3022_v33 = vmul.f32 %v8213_v10, %v8536_v50  ;;  %v3711_v32 = vadd.f32 %v3695_v56, %v3655_v23  ;;  %v3375_v37 = vadd.f32 %v3359_v53, %v3318_v27  ;;  %v10046_v53 = vld [vmem:[#allocation54_spill] sm:$0xff]  ;;  %v10048_v27 = vld [vmem:[#allocation40_spill] sm:$0xff]  ;;  %v10056_v24 = vld [vmem:[#allocation47_spill] sm:$0xff] }
 0x27f   : > { %v8727_v11 = vadd.f32 %v8676_v39, %v4159_v42  ;;  %v2926_v2 = vadd.f32 %v2910_v1, %v2870_v8  ;;  %v4046_v16 = vadd.f32 %v10041_v52, %v3990_v59  ;;  %v3863_v3 = vmul.f32 %v10043_v54, %v10042_v22  ;;  %v10047_v42 = vld [vmem:[#allocation31_spill] sm:$0xff] }
 0x280   : > { %v3527_v17 = vmul.f32 %v8292_v31, %v10044_v60  ;;  %v3079_v41 = vmul.f32 %v8223_v51, %v8547_v14  ;;  %v3767_v50 = vadd.f32 %v3751_v40, %v3711_v32  ;;  %v3431_v44 = vadd.f32 %v3415_v57, %v3375_v37  ;;  %v8746_v14 = vld [vmem:[#allocation2 + $0x81] sm:$0xff] }
 0x281   : > { %10040 = vst [vmem:[#allocation41_spill] sm:$0xff] %v8727_v11  ;;  %v4198_v36 = vsub.f32 0.0, %v8727_v11  ;;  %v2982_v56 = vadd.f32 %v2966_v21, %v2926_v2  ;;  %v4102_v1 = vadd.f32 %v10046_v53, %v4046_v16  ;;  %v3920_v23 = vmul.f32 %v10047_v42, %v8737_v58  ;;  %10049 = vst [vmem:[#allocation38_spill] sm:$0xff] %v8746_v14  ;;  %v8748_v40 = vld [vmem:[#allocation2 + $0x82] sm:$0xff]  ;;  %v10051_v21 = vld [vmem:[#allocation56_spill] sm:$0xff] }
 0x282   : > { %v3583_v8 = vmul.f32 %v10027_v20, %v10048_v27  ;;  %v3135_v45 = vmul.f32 %v8234_v25, %v8553_v4  ;;  %v3823_v52 = vadd.f32 %v3807_v30, %v3767_v50  ;;  %10050 = vst [vmem:[#allocation10_spill] sm:$0xff] %v8748_v40  ;;  %v3487_v32 = vadd.f32 %v3471_v15, %v3431_v44  ;;  %v10052_v2 = vld [vmem:[#allocation25_spill] sm:$0xff]  ;;  %v10058_v44 = vld [vmem:[#allocation30_spill] sm:$0xff] }
 0x283   : > { %v4216_v59 = vmul.f32 1.442695, %v4198_v36  ;;  %v3038_v57 = vadd.f32 %v3022_v33, %v2982_v56  ;;  %v4158_v37 = vadd.f32 %v10051_v21, %v4102_v1  ;;  %v3976_v16 = vmul.f32 %v10052_v2, %v8746_v14  ;;  %v10053_v53 = vld [vmem:[#allocation29_spill] sm:$0xff]  ;;  %v10059_v1 = vld [vmem:[#allocation58_spill] sm:$0xff] }
 0x284   : > { %v4032_v11 = vmul.f32 %v10053_v53, %v8748_v40  ;;  %v10054_v27 = vld [vmem:[#allocation57_spill] sm:$0xff]  ;;  %v3879_v4 = vadd.f32 %v3863_v3, %v3823_v52  ;;  %v3543_v30 = vadd.f32 %v3527_v17, %v3487_v32  ;;  %v3191_v15 = vmul.f32 %v8244_v49, %v10056_v24  ;;  %v10061_v32 = vld [vmem:[#allocation34_spill] sm:$0xff] }
 0x285   : > { %v3640_v60 = vmul.f32 %v10030_v7, %v10054_v27  ;;  %v8757_v36 = vld [vmem:[#allocation2 + $0x83] sm:$0xff]  ;;  %v3095_v50 = vadd.f32 %v3079_v41, %v3038_v57  ;;  %v8762_v33 = vadd.f32 %v8676_v39, %v4158_v37  ;;  %6346 = vpow2.f32 %v4216_v59  ;;  %v10062_v59 = vld [vmem:[#allocation32_spill] sm:$0xff] }
 0x286   : > { %10055 = vst [vmem:[#allocation42_spill] sm:$0xff] %v8757_v36  ;;  %v4088_v56 = vmul.f32 %v10058_v44, %v8757_v36  ;;  %v3696_v21 = vmul.f32 %v8338_v26, %v10059_v1  ;;  %v3936_v40 = vadd.f32 %v3920_v23, %v3879_v4  ;;  %v8768_v27 = vld [vmem:[#allocation2 + $0x84] sm:$0xff]  ;;  %v3599_v3 = vadd.f32 %v3583_v8, %v3543_v30 }
 0x287   : > { %10057 = vst [vmem:[#allocation39_spill] sm:$0xff] %v8762_v33  ;;  %10060 = vst [vmem:[#allocation12_spill] sm:$0xff] %v8768_v27  ;;  %v3151_v52 = vadd.f32 %v3135_v45, %v3095_v50  ;;  %v3247_v17 = vmul.f32 %v8256_v62, %v8568_v28  ;;  %v4197_v41 = vsub.f32 0.0, %v8762_v33  ;;  %v4144_v57 = vmul.f32 %v10061_v32, %v8768_v27  ;;  %v10063_v24 = vld [vmem:[#allocation37_spill] sm:$0xff]  ;;  %v10064_v33 = vld [vmem:[#allocation18_spill] sm:$0xff] }
 0x288   : > { %v3752_v37 = vmul.f32 %v8343_v63, %v10062_v59  ;;  %v3808_v49 = vmul.f32 %v10038_v6, %v10063_v24  ;;  %v3992_v4 = vadd.f32 %v3976_v16, %v3936_v40  ;;  %v3656_v23 = vadd.f32 %v3640_v60, %v3599_v3  ;;  %v10065_v60 = vld [vmem:[#allocation17_spill] sm:$0xff] }
 0x289   : > { %v6345_v1 = vpop.eup %6344  ;;  %v3207_v36 = vadd.f32 %v3191_v15, %v3151_v52  ;;  %v3303_v8 = vmul.f32 %v8261_v13, %v8574_v38  ;;  %v4214_v30 = vmul.f32 1.442695, %v4197_v41  ;;  %v3360_v50 = vmul.f32 %v8272_v19, %v8576_v9  ;;  %v10066_v15 = vld [vmem:[#allocation22_spill] sm:$0xff] }
 0x28a   : > { %v4244_v45 = vadd.f32 1.0, %v6345_v1  ;;  %v2799_v28 = vmul.f32 %v10035_v12, %v10064_v33  ;;  %v4048_v62 = vadd.f32 %v4032_v11, %v3992_v4  ;;  %v3712_v59 = vadd.f32 %v3696_v21, %v3656_v23  ;;  %v8793_v33 = vld [vmem:[#allocation2 + $0x90] sm:$0xff] }
 0x28b   : > { %v3263_v27 = vadd.f32 %v3247_v17, %v3207_v36  ;;  %v2855_v24 = vmul.f32 %v8196_v5, %v10025_v43  ;;  %v3864_v40 = vmul.f32 %v10043_v54, %v10065_v60  ;;  %v3416_v16 = vmul.f32 %v10018_v48, %v8590_v18  ;;  %v8799_v4 = vld [vmem:[#allocation2 + $0x91] sm:$0xff] }
 0x28c   : > { %6348 = vrcp.f32 %v4244_v45  ;;  %v2911_v1 = vmul.f32 %v8202_v34, %v10066_v15  ;;  %v4104_v3 = vadd.f32 %v4088_v56, %v4048_v62  ;;  %v3768_v52 = vadd.f32 %v3752_v37, %v3712_v59  ;;  %v8801_v23 = vld [vmem:[#allocation2 + $0x92] sm:$0xff] }
 0x28d   : > { %6350 = vpow2.f32 %v4214_v30  ;;  %v3319_v11 = vadd.f32 %v3303_v8, %v3263_v27  ;;  %v3921_v36 = vmul.f32 %v10047_v42, %v8793_v33  ;;  %v2871_v43 = vadd.f32 %v2855_v24, %v2799_v28  ;;  %v10067_v30 = vld [vmem:[#allocation51_spill] sm:$0xff] }
 0x28e   : > { %v2967_v21 = vmul.f32 %v8207_v35, %v10031_v29  ;;  %v4160_v17 = vadd.f32 %v4144_v57, %v4104_v3  ;;  %v3824_v41 = vadd.f32 %v3808_v49, %v3768_v52  ;;  %v3472_v62 = vmul.f32 %v10023_v0, %v10067_v30  ;;  %v8814_v57 = vld [vmem:[#allocation2 + $0x93] sm:$0xff] }
 0x28f   : > { %v3376_v45 = vadd.f32 %v3360_v50, %v3319_v11  ;;  %v3977_v27 = vmul.f32 %v10052_v2, %v8799_v4  ;;  %v4033_v56 = vmul.f32 %v10053_v53, %v8801_v23  ;;  %v2927_v28 = vadd.f32 %v2911_v1, %v2871_v43  ;;  %10069 = vst [vmem:[#allocation19_spill] sm:$0xff] %v8814_v57  ;;  %v8816_v59 = vld [vmem:[#allocation2 + $0x94] sm:$0xff] }
 0x290   : > { %v3023_v29 = vmul.f32 %v8213_v10, %v10032_v55  ;;  %v8812_v49 = vadd.f32 %v8676_v39, %v4160_v17  ;;  %v3880_v24 = vadd.f32 %v3864_v40, %v3824_v41  ;;  %10070 = vst [vmem:[#allocation43_spill] sm:$0xff] %v8816_v59  ;;  %v3528_v8 = vmul.f32 %v8292_v31, %v8598_v46 }
 0x291   : > { %v3432_v37 = vadd.f32 %v3416_v16, %v3376_v45  ;;  %v4089_v50 = vmul.f32 %v10058_v44, %v8814_v57  ;;  %v4145_v15 = vmul.f32 %v10061_v32, %v8816_v59  ;;  %v2983_v1 = vadd.f32 %v2967_v21, %v2927_v28  ;;  %v10071_v59 = vld [vmem:[#allocation10_spill] sm:$0xff] }
 0x292   : > { %10068 = vst [vmem:[#allocation44_spill] sm:$0xff] %v8812_v49  ;;  %v3080_v55 = vmul.f32 %v8223_v51, %v10033_v61  ;;  %v6347_v3 = vpop.eup %6346  ;;  %v4199_v40 = vsub.f32 0.0, %v8812_v49  ;;  %v3937_v52 = vadd.f32 %v3921_v36, %v3880_v24  ;;  %v3584_v16 = vmul.f32 %v10027_v20, %v10042_v22  ;;  %v10072_v24 = vld [vmem:[#allocation42_spill] sm:$0xff]  ;;  %v10073_v22 = vld [vmem:[#allocation35_spill] sm:$0xff] }
 0x293   : > { %v3488_v11 = vadd.f32 %v3472_v62, %v3432_v37  ;;  %v3641_v43 = vmul.f32 %v10030_v7, %v8737_v58  ;;  %v3697_v17 = vmul.f32 %v8338_v26, %v8746_v14  ;;  %v3039_v41 = vadd.f32 %v3023_v29, %v2983_v1  ;;  %v10074_v58 = vld [vmem:[#allocation13_spill] sm:$0xff]  ;;  %v10075_v1 = vld [vmem:[#allocation12_spill] sm:$0xff] }
 0x294   : > { %v3136_v21 = vmul.f32 %v8234_v25, %v10034_v47  ;;  %v4218_v45 = vmul.f32 1.442695, %v4199_v40  ;;  %v3993_v61 = vadd.f32 %v3977_v27, %v3937_v52  ;;  %v3753_v36 = vmul.f32 %v8343_v63, %v10071_v59  ;;  %v10076_v27 = vld [vmem:[#allocation36_spill] sm:$0xff]  ;;  %v10079_v59 = vld [vmem:[#allocation45_spill] sm:$0xff] }
 0x295   : > { %v3544_v28 = vadd.f32 %v3528_v8, %v3488_v11  ;;  %v4246_v62 = vadd.f32 1.0, %v6347_v3  ;;  %v3809_v37 = vmul.f32 %v10038_v6, %v10072_v24  ;;  %v3096_v49 = vadd.f32 %v3080_v55, %v3039_v41  ;;  %v10077_v8 = vld [vmem:[#allocation9_spill] sm:$0xff]  ;;  %v10078_v11 = vld [vmem:[#allocation40_spill] sm:$0xff] }
 0x296   : > { %v3192_v46 = vmul.f32 %v10074_v58, %v10073_v22  ;;  %6352 = vpow2.f32 %v4218_v45  ;;  %v4049_v14 = vadd.f32 %v4033_v56, %v3993_v61  ;;  %v3865_v47 = vmul.f32 %v10043_v54, %v10075_v1  ;;  %v10080_v22 = vld [vmem:[#allocation46_spill] sm:$0xff] }
 0x297   : > { %v3600_v29 = vadd.f32 %v3584_v16, %v3544_v28  ;;  %v3152_v40 = vadd.f32 %v3136_v21, %v3096_v49  ;;  %v3248_v52 = vmul.f32 %v10077_v8, %v10076_v27  ;;  %v3304_v3 = vmul.f32 %v8261_v13, %v10078_v11  ;;  %v10081_v16 = vld [vmem:[#allocation47_spill] sm:$0xff]  ;;  %v10082_v49 = vld [vmem:[#allocation33_spill] sm:$0xff]  ;;  %v10083_v27 = vld [vmem:[#allocation48_spill] sm:$0xff] }
 0x298   : > { %v2800_v24 = vmul.f32 %v10035_v12, %v10079_v59  ;;  %v4105_v41 = vadd.f32 %v4089_v50, %v4049_v14  ;;  %v2856_v56 = vmul.f32 %v8196_v5, %v10080_v22  ;;  %v2912_v45 = vmul.f32 %v8202_v34, %v10081_v16  ;;  %v8856_v12 = vld [vmem:[#allocation2 + $0x98] sm:$0xff]  ;;  %v10085_v34 = vld [vmem:[#allocation57_spill] sm:$0xff] }
 0x299   : > { %v6349_v55 = vpop.eup %6348  ;;  %v3657_v6 = vadd.f32 %v3641_v43, %v3600_v29  ;;  %6354 = vrcp.f32 %v4246_v62  ;;  %v3208_v28 = vadd.f32 %v3192_v46, %v3152_v40  ;;  %v2968_v11 = vmul.f32 %v8207_v35, %v10083_v27  ;;  %10084 = vst [vmem:[#allocation14_spill] sm:$0xff] %v8856_v12  ;;  %v10090_v16 = vld [vmem:[#allocation32_spill] sm:$0xff]  ;;  %v10091_v27 = vld [vmem:[#allocation37_spill] sm:$0xff] }
 0x29a   : > { %v6351_v61 = vpop.eup %6350  ;;  %v4292_v21 = vmul.f32 %v6349_v55, %v10082_v49  ;;  %v4161_v13 = vadd.f32 %v4145_v15, %v4105_v41  ;;  %v2872_v14 = vadd.f32 %v2856_v56, %v2800_v24  ;;  %v3922_v5 = vmul.f32 %v10047_v42, %v8856_v12 }
 0x29b   : > { %v4245_v1 = vadd.f32 1.0, %v6351_v61  ;;  %v3713_v59 = vadd.f32 %v3697_v17, %v3657_v6  ;;  %v3264_v50 = vadd.f32 %v3248_v52, %v3208_v28  ;;  %v3361_v43 = vmul.f32 %v8272_v19, %v10085_v34  ;;  %v8867_v6 = vld [vmem:[#allocation2 + $0x99] sm:$0xff]  ;;  %v10087_v52 = vld [vmem:[#allocation58_spill] sm:$0xff] }
 0x29c   : > { %6147 = vmatprep.mubr.f32.mxu1 %v4292_v21  ;;  %v3024_v46 = vmul.f32 %v8213_v10, %v8574_v38  ;;  %v8865_v35 = vadd.f32 %v8676_v39, %v4161_v13  ;;  %v8869_v17 = vld [vmem:[#allocation2 + $0x9a] sm:$0xff]  ;;  %v2928_v62 = vadd.f32 %v2912_v45, %v2872_v14  ;;  %v3978_v24 = vmul.f32 %v10052_v2, %v8867_v6 }
 0x29d   : > { %6356 = vrcp.f32 %v4245_v1  ;;  %v3769_v15 = vadd.f32 %v3753_v36, %v3713_v59  ;;  %v4034_v29 = vmul.f32 %v10053_v53, %v8869_v17  ;;  %v3320_v40 = vadd.f32 %v3304_v3, %v3264_v50  ;;  %v8878_v1 = vld [vmem:[#allocation2 + $0x9b] sm:$0xff] }
 0x29e   : > { %10086 = vst [vmem:[#allocation16_spill] sm:$0xff] %v8865_v35  ;;  %v3417_v10 = vmul.f32 %v10018_v48, %v10087_v52  ;;  %v4200_v38 = vsub.f32 0.0, %v8865_v35  ;;  %10088 = vst [vmem:[#allocation28_spill] sm:$0xff] %v8878_v1  ;;  %v8880_v36 = vld [vmem:[#allocation2 + $0x9c] sm:$0xff]  ;;  %v2984_v55 = vadd.f32 %v2968_v11, %v2928_v62  ;;  %v3081_v41 = vmul.f32 %v8223_v51, %v8576_v9 }
 0x29f   : > { %v3825_v13 = vadd.f32 %v3809_v37, %v3769_v15  ;;  %10089 = vst [vmem:[#allocation24_spill] sm:$0xff] %v8880_v36  ;;  %v4090_v22 = vmul.f32 %v10058_v44, %v8878_v1  ;;  %v4146_v3 = vmul.f32 %v10061_v32, %v8880_v36  ;;  %v3377_v56 = vadd.f32 %v3361_v43, %v3320_v40  ;;  %v2778_v50 = vld [vmem:[#allocation2 + $0x60] sm:$0xff]  ;;  %v10092_v15 = vld [vmem:[#allocation23_spill] sm:$0xff] }
 0x2a0   : > { %v3473_v45 = vmul.f32 %v10023_v0, %v10090_v16  ;;  %v4220_v61 = vmul.f32 1.442695, %v4200_v38  ;;  %v3040_v49 = vadd.f32 %v3024_v46, %v2984_v55  ;;  %v3137_v21 = vmul.f32 %v8234_v25, %v8590_v18  ;;  %v2833_v40 = vld [vmem:[#allocation2 + $0x61] sm:$0xff] }
 0x2a1   : > { %v3881_v37 = vadd.f32 %v3865_v47, %v3825_v13  ;;  %v3433_v28 = vadd.f32 %v3417_v10, %v3377_v56  ;;  %v3529_v51 = vmul.f32 %v8292_v31, %v10091_v27  ;;  %v3585_v9 = vmul.f32 %v10027_v20, %v10065_v60  ;;  %v10093_v13 = vld [vmem:[#allocation52_spill] sm:$0xff]  ;;  %v2945_v35 = vld [vmem:[#allocation2 + $0x63] sm:$0xff] }
 0x2a2   : > { %v3642_v11 = vmul.f32 %v10030_v7, %v8793_v33  ;;  %6358 = vpow2.f32 %v4220_v61  ;;  %v3097_v14 = vadd.f32 %v3081_v41, %v3040_v49  ;;  %v3193_v47 = vmul.f32 %v10074_v58, %v10067_v30  ;;  %v2889_v30 = vld [vmem:[#allocation2 + $0x62] sm:$0xff]  ;;  %v10094_v41 = vld [vmem:[#allocation43_spill] sm:$0xff] }
 0x2a3   : > { %v3938_v59 = vadd.f32 %v3922_v5, %v3881_v37  ;;  %v6353_v43 = vpop.eup %6352  ;;  %v3489_v46 = vadd.f32 %v3473_v45, %v3433_v28  ;;  %v3698_v25 = vmul.f32 %v8338_v26, %v8799_v4  ;;  %v3754_v18 = vmul.f32 %v8343_v63, %v8801_v23  ;;  %v10095_v45 = vld [vmem:[#allocation55_spill] sm:$0xff] }
 0x2a4   : > { %v8906_v62 = vmul.f32 %v10092_v15, %v8814_v57  ;;  %v4247_v10 = vadd.f32 1.0, %v6353_v43  ;;  %v3153_v38 = vadd.f32 %v3137_v21, %v3097_v14  ;;  %v3249_v58 = vmul.f32 %v10077_v8, %v10093_v13  ;;  %v10096_v61 = vld [vmem:[#allocation11_spill] sm:$0xff]  ;;  %v8922_v8 = vld [vmem:[%s9706_s3 + $0x1] ss:$0 sm:$0xff] }
 0x2a5   : > { %v3994_v5 = vadd.f32 %v3978_v24, %v3938_v59  ;;  %v3545_v55 = vadd.f32 %v3529_v51, %v3489_v46  ;;  %v8912_v56 = vmul.f32 %v10043_v54, %v10094_v41  ;;  %v3305_v37 = vmul.f32 %v10096_v61, %v10095_v45  ;;  %v10097_v49 = vld [vmem:[#allocation15_spill] sm:$0xff]  ;;  %v8917_v24 = vld [vmem:[#allocation2 + $0xa8] sm:$0xff]  ;;  %v10100_v45 = vld [vmem:[#allocation41_spill] sm:$0xff] }
 0x2a6   : > { %v2801_v28 = vmul.f32 %v10097_v49, %v2778_v50  ;;  %v6355_v57 = vpop.eup %6354  ;;  %6360 = vrcp.f32 %v4247_v10  ;;  %10098 = vst [vmem:[#allocation26_spill] sm:$0xff] %v8917_v24  ;;  %v3209_v21 = vadd.f32 %v3193_v47, %v3153_v38  ;;  %v2857_v51 = vmul.f32 %v8922_v8, %v2833_v40  ;;  %v3001_v59 = vld [vmem:[#allocation2 + $0x64] sm:$0xff]  ;;  %v10099_v50 = vld [vmem:[#allocation20_spill] sm:$0xff] }
 0x2a7   : > { %v4050_v43 = vadd.f32 %v4034_v29, %v3994_v5  ;;  %v3601_v14 = vadd.f32 %v3585_v9, %v3545_v55  ;;  %v8927_v46 = vmul.f32 %v10047_v42, %v8917_v24  ;;  %v3362_v10 = vmul.f32 %v8272_v19, %v10099_v50  ;;  %v8934_v29 = vld [vmem:[%s9706_s3 + $0x2] ss:$0 sm:$0xff]  ;;  %v8940_v9 = vld [vmem:[%s9706_s3 + $0x3] ss:$0 sm:$0xff]  ;;  %v10101_v49 = vld [vmem:[#allocation38_spill] sm:$0xff] }
 0x2a8   : > { %v2913_v47 = vmul.f32 %v8934_v29, %v2889_v30  ;;  %v3265_v38 = vadd.f32 %v3249_v58, %v3209_v21  ;;  %v2873_v13 = vadd.f32 %v2857_v51, %v2801_v28  ;;  %v2969_v40 = vmul.f32 %v8940_v9, %v2945_v35  ;;  %v10102_v30 = vld [vmem:[#allocation39_spill] sm:$0xff] }
 0x2a9   : > { %v4106_v5 = vadd.f32 %v4090_v22, %v4050_v43  ;;  %v4294_v19 = vmul.f32 %v6355_v57, %v10100_v45  ;;  %v3658_v61 = vadd.f32 %v3642_v11, %v3601_v14  ;;  %v3418_v24 = vmul.f32 %v10018_v48, %v10101_v49  ;;  %v8949_v22 = vld [vmem:[%s9706_s3 + $0x4] ss:$0 sm:$0xff]  ;;  %v8953_v21 = vld [vmem:[#allocation2 + $0xa9] sm:$0xff] }
 0x2aa   : > { %v6357_v55 = vpop.eup %6356  ;;  %v3025_v58 = vmul.f32 %v8949_v22, %v3001_v59  ;;  %10103 = vst [vmem:[#allocation27_spill] sm:$0xff] %v8953_v21  ;;  %v8955_v35 = vld [vmem:[#allocation2 + $0xaa] sm:$0xff]  ;;  %v3321_v51 = vadd.f32 %v3305_v37, %v3265_v38  ;;  %v2929_v57 = vadd.f32 %v2913_v47, %v2873_v13  ;;  %v3979_v48 = vmul.f32 %v10052_v2, %v8953_v21  ;;  %v8975_v47 = vld [vmem:[%s9706_s3 + $0x5] ss:$0 sm:$0xff] }
 0x2ab   : > { %v4293_v28 = vmul.f32 %v6357_v55, %v10102_v30  ;;  %v4162_v43 = vadd.f32 %v4146_v3, %v4106_v5  ;;  %10104 = vst [vmem:[#allocation49_spill] sm:$0xff] %v8955_v35  ;;  %v3714_v11 = vadd.f32 %v3698_v25, %v3658_v61  ;;  %v8961_v14 = vmul.f32 %v10053_v53, %v8955_v35  ;;  %v10105_v45 = vld [vmem:[#allocation10_spill] sm:$0xff] }
 0x2ac   : > { %v3474_v59 = vmul.f32 %v10023_v0, %v10105_v45  ;;  %v8968_v5 = vld [vmem:[#allocation2 + $0xab] sm:$0xff]  ;;  %v3378_v37 = vadd.f32 %v3362_v10, %v3321_v51  ;;  %v2985_v25 = vadd.f32 %v2969_v40, %v2929_v57  ;;  %v3082_v38 = vmul.f32 %v8975_v47, %v10085_v34  ;;  %v8993_v34 = vld [vmem:[%s9706_s3 + $0x6] ss:$0 sm:$0xff]  ;;  %v10110_v57 = vld [vmem:[#allocation12_spill] sm:$0xff] }
 0x2ad   : > { %6148 = vmatmul.mubr.f32.vlgmr.msra.gmra.mxu1 %v4293_v28  ;;  %v8966_v3 = vadd.f32 %v8676_v39, %v4162_v43  ;;  %10107 = vst [vmem:[#allocation53_spill] sm:$0xff] %v8968_v5  ;;  %v8970_v55 = vld [vmem:[#allocation2 + $0xac] sm:$0xff]  ;;  %v3770_v0 = vadd.f32 %v3754_v18, %v3714_v11  ;;  %v8981_v13 = vmul.f32 %v10058_v44, %v8968_v5 }
 0x2ae   : > { %10108 = vst [vmem:[#allocation21_spill] sm:$0xff] %v8970_v55  ;;  %6150 = vmatprep.mubr.f32.mxu1 %v4294_v19  ;;  %v8985_v61 = vmul.f32 %v10061_v32, %v8970_v55  ;;  %v10109_v10 = vld [vmem:[#allocation42_spill] sm:$0xff]  ;;  %v3434_v28 = vadd.f32 %v3418_v24, %v3378_v37  ;;  %v3041_v43 = vadd.f32 %v3025_v58, %v2985_v25  ;;  %v9005_v24 = vld [vmem:[%s9706_s3 + $0x7] ss:$0 sm:$0xff] }
 0x2af   : > { %10106 = vst [vmem:[#allocation50_spill] sm:$0xff] %v8966_v3  ;;  %v3530_v40 = vmul.f32 %v8292_v31, %v10109_v10  ;;  %v4201_v30 = vsub.f32 0.0, %v8966_v3  ;;  %v3138_v18 = vmul.f32 %v8993_v34, %v10087_v52  ;;  %v6359_v19 = vpop.eup %6358  ;;  %v3826_v51 = vadd.f32 %v8906_v62, %v3770_v0  ;;  %v2779_v55 = vld [vmem:[#allocation2 + $0x68] sm:$0xff] }
 0x2b0   : > { %v3586_v11 = vmul.f32 %v10027_v20, %v10110_v57  ;;  %v3643_v31 = vmul.f32 %v10030_v7, %v8856_v12  ;;  %v3194_v58 = vmul.f32 %v9005_v24, %v10090_v16  ;;  %v4248_v37 = vadd.f32 1.0, %v6359_v19  ;;  %v2834_v12 = vld [vmem:[#allocation2 + $0x69] sm:$0xff] }
 0x2b1   : > { %v4222_v25 = vmul.f32 1.442695, %v4201_v30  ;;  %v3490_v52 = vadd.f32 %v3474_v59, %v3434_v28  ;;  %v3098_v3 = vadd.f32 %v3082_v38, %v3041_v43  ;;  %v3882_v62 = vadd.f32 %v8912_v56, %v3826_v51  ;;  %v9019_v59 = vld [vmem:[%s9706_s3 + $0x8] ss:$0 sm:$0xff]  ;;  %v2890_v38 = vld [vmem:[#allocation2 + $0x6a] sm:$0xff]  ;;  %v10113_v28 = vld [vmem:[#allocation44_spill] sm:$0xff] }
 0x2b2   : > { %v3699_v20 = vmul.f32 %v8338_v26, %v8867_v6  ;;  %v3755_v7 = vmul.f32 %v8343_v63, %v8869_v17  ;;  %v3811_v0 = vmul.f32 %v10092_v15, %v8878_v1  ;;  %6362 = vrcp.f32 %v4248_v37  ;;  %10111 = vst [vmem:[#allocation54_spill] sm:$0xff] %v9019_v59  ;;  %v9027_v15 = vld [vmem:[%s9706_s3 + $0x9] ss:$0 sm:$0xff]  ;;  %v2946_v30 = vld [vmem:[#allocation2 + $0x6b] sm:$0xff] }
 0x2b3   : > { %v3546_v57 = vadd.f32 %v3530_v40, %v3490_v52  ;;  %v3154_v16 = vadd.f32 %v3138_v18, %v3098_v3  ;;  %v3250_v56 = vmul.f32 %v9019_v59, %v10091_v27  ;;  %v6361_v26 = vpop.eup %6360  ;;  %6364 = vpow2.f32 %v4222_v25  ;;  %10112 = vst [vmem:[#allocation31_spill] sm:$0xff] %v9027_v15  ;;  %v9034_v40 = vld [vmem:[%s9706_s3] ss:$0 sm:$0xff]  ;;  %v3002_v52 = vld [vmem:[#allocation2 + $0x6c] sm:$0xff] }
 0x2b4   : > { %v3939_v63 = vadd.f32 %v8927_v46, %v3882_v62  ;;  %v3306_v3 = vmul.f32 %v9027_v15, %v10065_v60  ;;  %v2802_v27 = vmul.f32 %v9034_v40, %v2779_v55  ;;  %v4295_v43 = vmul.f32 %v6361_v26, %v10113_v28  ;;  %v9044_v60 = vld [vmem:[%s9706_s3 + $0xa] ss:$0 sm:$0xff] }
 0x2b5   : > { %v3602_v18 = vadd.f32 %v3586_v11, %v3546_v57  ;;  %v3210_v46 = vadd.f32 %v3194_v58, %v3154_v16  ;;  %v2858_v19 = vmul.f32 %v8922_v8, %v2834_v12  ;;  %v3867_v37 = vmul.f32 %v10043_v54, %v8880_v36  ;;  %10114 = vst [vmem:[#allocation56_spill] sm:$0xff] %v9044_v60  ;;  %v9049_v11 = vld [vmem:[#allocation2 + $0xb0] sm:$0xff] }
 0x2b6   : > { %v3995_v51 = vadd.f32 %v3979_v48, %v3939_v63  ;;  %v3363_v25 = vmul.f32 %v9044_v60, %v8793_v33  ;;  %v2914_v55 = vmul.f32 %v8934_v29, %v2890_v38  ;;  %6151 = vmatmul.mubr.f32.gmra.mxu1 %v4295_v43  ;;  %10115 = vst [vmem:[#allocation25_spill] sm:$0xff] %v9049_v11  ;;  %v9051_v12 = vld [vmem:[#allocation2 + $0xb1] sm:$0xff] }
 0x2b7   : > { %v3659_v57 = vadd.f32 %v3643_v31, %v3602_v18  ;;  %10116 = vst [vmem:[#allocation29_spill] sm:$0xff] %v9051_v12  ;;  %v3266_v48 = vadd.f32 %v3250_v56, %v3210_v46  ;;  %v2874_v58 = vadd.f32 %v2858_v19, %v2802_v27  ;;  %v2970_v54 = vmul.f32 %v8940_v9, %v2946_v30  ;;  %v9062_v31 = vld [vmem:[%s9706_s3 + $0xb] ss:$0 sm:$0xff]  ;;  %v9066_v63 = vld [vmem:[#allocation2 + $0xb2] sm:$0xff] }
 0x2b8   : > { %v4051_v62 = vadd.f32 %v8961_v14, %v3995_v51  ;;  %v3924_v16 = vmul.f32 %v10047_v42, %v9049_v11  ;;  %v3980_v26 = vmul.f32 %v10052_v2, %v9051_v12  ;;  %v3419_v38 = vmul.f32 %v9062_v31, %v8799_v4  ;;  %10117 = vst [vmem:[#allocation30_spill] sm:$0xff] %v9066_v63  ;;  %v9068_v27 = vld [vmem:[#allocation2 + $0xb3] sm:$0xff] }
 0x2b9   : > { %v3715_v56 = vadd.f32 %v3699_v20, %v3659_v57  ;;  %10118 = vst [vmem:[#allocation34_spill] sm:$0xff] %v9068_v27  ;;  %v3322_v14 = vadd.f32 %v3306_v3, %v3266_v48  ;;  %v2930_v30 = vadd.f32 %v2914_v55, %v2874_v58  ;;  %v3026_v42 = vmul.f32 %v8949_v22, %v3002_v52  ;;  %v9081_v20 = vld [vmem:[%s9706_s3 + $0xc] ss:$0 sm:$0xff]  ;;  %v9085_v46 = vld [vmem:[#allocation2 + $0xb4] sm:$0xff]  ;;  %v9097_v55 = vld [vmem:[%s9706_s3 + $0xd] ss:$0 sm:$0xff] }
 0x2ba   : > { %v4107_v28 = vadd.f32 %v8981_v13, %v4051_v62  ;;  %v4036_v2 = vmul.f32 %v10053_v53, %v9066_v63  ;;  %v9076_v43 = vmul.f32 %v10058_v44, %v9068_v27  ;;  %v3475_v3 = vmul.f32 %v9081_v20, %v8801_v23  ;;  %10119 = vst [vmem:[#allocation18_spill] sm:$0xff] %v9085_v46  ;;  %v10120_v52 = vld [vmem:[#allocation19_spill] sm:$0xff]  ;;  %v10122_v62 = vld [vmem:[#allocation26_spill] sm:$0xff] }
 0x2bb   : > { %v3771_v18 = vadd.f32 %v3755_v7, %v3715_v56  ;;  %v3379_v19 = vadd.f32 %v3363_v25, %v3322_v14  ;;  %v2986_v13 = vadd.f32 %v2970_v54, %v2930_v30  ;;  %v3083_v53 = vmul.f32 %v8975_v47, %v10099_v50  ;;  %v9104_v25 = vld [vmem:[%s9706_s3 + $0xe] ss:$0 sm:$0xff]  ;;  %v9116_v54 = vld [vmem:[%s9706_s3 + $0xf] ss:$0 sm:$0xff] }
 0x2bc   : > { %v4163_v51 = vadd.f32 %v8985_v61, %v4107_v28  ;;  %v9092_v44 = vmul.f32 %v10061_v32, %v9085_v46  ;;  %v3531_v7 = vmul.f32 %v9097_v55, %v10120_v52  ;;  %v3587_v50 = vmul.f32 %v9104_v25, %v10094_v41  ;;  %v2947_v52 = vld [vmem:[#allocation2 + $0x7b] sm:$0xff] }
 0x2bd   : > { %v3827_v61 = vadd.f32 %v3811_v0, %v3771_v18  ;;  %v3435_v57 = vadd.f32 %v3419_v38, %v3379_v19  ;;  %v3042_v32 = vadd.f32 %v3026_v42, %v2986_v13  ;;  %v3139_v48 = vmul.f32 %v8993_v34, %v10101_v49  ;;  %v9123_v0 = vld [vmem:[%s9706_s3 + $0x10] ss:$0 sm:$0xff]  ;;  %v9130_v49 = vld [vmem:[%s9706_s3 + $0x11] ss:$0 sm:$0xff]  ;;  %v2780_v19 = vld [vmem:[#allocation2 + $0x78] sm:$0xff] }
 0x2be   : > { %v9111_v58 = vadd.f32 %v8676_v39, %v4163_v51  ;;  %v3644_v56 = vmul.f32 %v9116_v54, %v10122_v62  ;;  %10123 = vst [vmem:[#allocation22_spill] sm:$0xff] %v9123_v0  ;;  %v3700_v38 = vmul.f32 %v9123_v0, %v8953_v21  ;;  %10124 = vst [vmem:[#allocation51_spill] sm:$0xff] %v9130_v49  ;;  %v2835_v13 = vld [vmem:[#allocation2 + $0x79] sm:$0xff]  ;;  %v9140_v21 = vld [vmem:[%s9706_s3 + $0x12] ss:$0 sm:$0xff] }
 0x2bf   : > { %v3756_v14 = vmul.f32 %v9130_v49, %v8955_v35  ;;  %v3883_v30 = vadd.f32 %v3867_v37, %v3827_v61  ;;  %v3491_v42 = vadd.f32 %v3475_v3, %v3435_v57  ;;  %v3099_v28 = vadd.f32 %v3083_v53, %v3042_v32  ;;  %v6363_v51 = vpop.eup %6362  ;;  %10125 = vst [vmem:[#allocation35_spill] sm:$0xff] %v9140_v21  ;;  %v10126_v3 = vld [vmem:[#allocation12_spill] sm:$0xff]  ;;  %v10128_v0 = vld [vmem:[#allocation14_spill] sm:$0xff] }
 0x2c0   : > { %10121 = vst [vmem:[#allocation17_spill] sm:$0xff] %v9111_v58  ;;  %v3195_v18 = vmul.f32 %v9005_v24, %v10105_v45  ;;  %v4202_v46 = vsub.f32 0.0, %v9111_v58  ;;  %v3812_v62 = vmul.f32 %v9140_v21, %v8968_v5  ;;  %v3251_v37 = vmul.f32 %v9019_v59, %v10109_v10  ;;  %v2891_v45 = vld [vmem:[#allocation2 + $0x7a] sm:$0xff]  ;;  %v6365_v61 = vpop.eup %6364 }
 0x2c1   : > { %v3307_v53 = vmul.f32 %v9027_v15, %v10126_v3  ;;  %v10127_v57 = vld [vmem:[#allocation16_spill] sm:$0xff]  ;;  %v3940_v35 = vadd.f32 %v3924_v16, %v3883_v30  ;;  %v3547_v58 = vadd.f32 %v3531_v7, %v3491_v42  ;;  %v3155_v41 = vadd.f32 %v3139_v48, %v3099_v28  ;;  %v9155_v42 = vld [vmem:[#allocation2 + $0xc0] sm:$0xff] }
 0x2c2   : > { %v4296_v32 = vmul.f32 %v6363_v51, %v10127_v57  ;;  %v4249_v27 = vadd.f32 1.0, %v6365_v61  ;;  %v4224_v49 = vmul.f32 1.442695, %v4202_v46  ;;  %v2803_v63 = vmul.f32 %v9034_v40, %v2780_v19  ;;  %v3003_v15 = vld [vmem:[#allocation2 + $0x7c] sm:$0xff]  ;;  %10129 = vst [vmem:[#allocation13_spill] sm:$0xff] %v9155_v42 }
 0x2c3   : > { %v2859_v5 = vmul.f32 %v8922_v8, %v2835_v13  ;;  %v3996_v21 = vadd.f32 %v3980_v26, %v3940_v35  ;;  %v3603_v10 = vadd.f32 %v3587_v50, %v3547_v58  ;;  %v3211_v59 = vadd.f32 %v3195_v18, %v3155_v41  ;;  %v9160_v41 = vld [vmem:[%s9706_s3 + $0x13] ss:$0 sm:$0xff]  ;;  %v10130_v35 = vld [vmem:[#allocation21_spill] sm:$0xff]  ;;  %v9205_v57 = vld [vmem:[%s9706_s3 + $0x17] ss:$0 sm:$0xff] }
 0x2c4   : > { %6153 = vmatprep.mubr.f32.mxu1 %v4296_v32  ;;  %v2915_v3 = vmul.f32 %v8934_v29, %v2891_v45  ;;  %6366 = vrcp.f32 %v4249_v27  ;;  %v3364_v16 = vmul.f32 %v9044_v60, %v10128_v0  ;;  %v2971_v48 = vmul.f32 %v8940_v9, %v2947_v52  ;;  %v9173_v52 = vld [vmem:[#allocation2 + $0xc1] sm:$0xff] }
 0x2c5   : > { %v2875_v7 = vadd.f32 %v2859_v5, %v2803_v63  ;;  %6368 = vpow2.f32 %v4224_v49  ;;  %v4052_v46 = vadd.f32 %v4036_v2, %v3996_v21  ;;  %v3660_v30 = vadd.f32 %v3644_v56, %v3603_v10  ;;  %v9167_v5 = vld [vmem:[%s9706_s3 + $0x14] ss:$0 sm:$0xff]  ;;  %10131 = vst [vmem:[#allocation36_spill] sm:$0xff] %v9173_v52  ;;  %v9175_v50 = vld [vmem:[#allocation2 + $0xc2] sm:$0xff]  ;;  %v9182_v49 = vld [vmem:[%s9706_s3 + $0x15] ss:$0 sm:$0xff] }
 0x2c6   : > { %v3267_v28 = vadd.f32 %v3251_v37, %v3211_v59  ;;  %v3868_v26 = vmul.f32 %v9160_v41, %v10130_v35  ;;  %v3925_v21 = vmul.f32 %v9167_v5, %v9155_v42  ;;  %v3027_v27 = vmul.f32 %v8949_v22, %v3003_v15  ;;  %10132 = vst [vmem:[#allocation9_spill] sm:$0xff] %v9175_v50  ;;  %v9189_v15 = vld [vmem:[%s9706_s3 + $0x16] ss:$0 sm:$0xff]  ;;  %v9196_v37 = vld [vmem:[#allocation2 + $0xc3] sm:$0xff] }
 0x2c7   : > { %v2931_v63 = vadd.f32 %v2915_v3, %v2875_v7  ;;  %v4108_v59 = vadd.f32 %v9076_v43, %v4052_v46  ;;  %v3716_v2 = vadd.f32 %v3700_v38, %v3660_v30  ;;  %v3420_v56 = vmul.f32 %v9062_v31, %v8867_v6  ;;  %10133 = vst [vmem:[#allocation40_spill] sm:$0xff] %v9196_v37 }
 0x2c8   : > { %v3323_v58 = vadd.f32 %v3307_v53, %v3267_v28  ;;  %v3981_v18 = vmul.f32 %v9182_v49, %v9173_v52  ;;  %v4037_v43 = vmul.f32 %v9189_v15, %v9175_v50  ;;  %v3084_v19 = vmul.f32 %v8975_v47, %v8793_v33  ;;  %v9198_v53 = vld [vmem:[#allocation2 + $0xc4] sm:$0xff]  ;;  %v9212_v33 = vld [vmem:[%s9706_s3 + $0x18] ss:$0 sm:$0xff] }
 0x2c9   : > { %v2987_v38 = vadd.f32 %v2971_v48, %v2931_v63  ;;  %v4164_v13 = vadd.f32 %v9092_v44, %v4108_v59  ;;  %v3772_v51 = vadd.f32 %v3756_v14, %v3716_v2  ;;  %10134 = vst [vmem:[#allocation45_spill] sm:$0xff] %v9198_v53  ;;  %v3476_v61 = vmul.f32 %v9081_v20, %v8869_v17 }
 0x2ca   : > { %v3380_v45 = vadd.f32 %v3364_v16, %v3323_v58  ;;  %v4093_v32 = vmul.f32 %v9205_v57, %v9196_v37  ;;  %10135 = vst [vmem:[#allocation46_spill] sm:$0xff] %v9212_v33  ;;  %v4149_v44 = vmul.f32 %v9212_v33, %v9198_v53  ;;  %v3140_v10 = vmul.f32 %v8993_v34, %v8799_v4  ;;  %v2781_v58 = vld [vmem:[#allocation2 + $0x80] sm:$0xff]  ;;  %v10140_v53 = vld [vmem:[#allocation34_spill] sm:$0xff]  ;;  %v10141_v37 = vld [vmem:[#allocation35_spill] sm:$0xff] }
 0x2cb   : > { %v3043_v14 = vadd.f32 %v3027_v27, %v2987_v38  ;;  %v9219_v3 = vadd.f32 %v8676_v39, %v4164_v13  ;;  %v3828_v16 = vadd.f32 %v3812_v62, %v3772_v51  ;;  %v3532_v48 = vmul.f32 %v9097_v55, %v8878_v1  ;;  %v10137_v62 = vld [vmem:[#allocation22_spill] sm:$0xff]  ;;  %v10139_v51 = vld [vmem:[#allocation51_spill] sm:$0xff] }
 0x2cc   : > { %v3436_v7 = vadd.f32 %v3420_v56, %v3380_v45  ;;  %v3588_v46 = vmul.f32 %v9104_v25, %v8880_v36  ;;  %v3645_v30 = vmul.f32 %v9116_v54, %v9049_v11  ;;  %v3196_v63 = vmul.f32 %v9005_v24, %v8801_v23  ;;  %v2836_v56 = vld [vmem:[#allocation2 + $0x81] sm:$0xff] }
 0x2cd   : > { %10136 = vst [vmem:[#allocation47_spill] sm:$0xff] %v9219_v3  ;;  %v3100_v28 = vadd.f32 %v3084_v19, %v3043_v14  ;;  %v4203_v4 = vsub.f32 0.0, %v9219_v3  ;;  %v3884_v27 = vadd.f32 %v3868_v26, %v3828_v16  ;;  %v3701_v2 = vmul.f32 %v10137_v62, %v9051_v12  ;;  %v2892_v38 = vld [vmem:[#allocation2 + $0x82] sm:$0xff]  ;;  %v10142_v14 = vld [vmem:[#allocation19_spill] sm:$0xff] }
 0x2ce   : > { %v3492_v59 = vadd.f32 %v3476_v61, %v3436_v7  ;;  %v10138_v13 = vld [vmem:[#allocation30_spill] sm:$0xff]  ;;  %v3813_v11 = vmul.f32 %v10141_v37, %v10140_v53  ;;  %v10144_v61 = vld [vmem:[#allocation43_spill] sm:$0xff]  ;;  %v2804_v62 = vmul.f32 %v9034_v40, %v2781_v58  ;;  %v2860_v52 = vmul.f32 %v8922_v8, %v2836_v56 }
 0x2cf   : > { %v3757_v45 = vmul.f32 %v10139_v51, %v10138_v13  ;;  %v3156_v19 = vadd.f32 %v3140_v10, %v3100_v28  ;;  %v10143_v36 = vld [vmem:[#allocation54_spill] sm:$0xff]  ;;  %v4226_v1 = vmul.f32 1.442695, %v4203_v4  ;;  %v3941_v3 = vadd.f32 %v3925_v21, %v3884_v27  ;;  %v10145_v16 = vld [vmem:[#allocation31_spill] sm:$0xff] }
 0x2d0   : > { %v3252_v23 = vmul.f32 %v10143_v36, %v10142_v14  ;;  %v3548_v26 = vadd.f32 %v3532_v48, %v3492_v59  ;;  %v3308_v7 = vmul.f32 %v10145_v16, %v10144_v61  ;;  %v2948_v12 = vld [vmem:[#allocation2 + $0x83] sm:$0xff]  ;;  %v2916_v13 = vmul.f32 %v8934_v29, %v2892_v38 }
 0x2d1   : > { %v3212_v50 = vadd.f32 %v3196_v63, %v3156_v19  ;;  %v6367_v51 = vpop.eup %6366  ;;  %6370 = vpow2.f32 %v4226_v1  ;;  %v3997_v10 = vadd.f32 %v3981_v18, %v3941_v3  ;;  %v10146_v53 = vld [vmem:[#allocation26_spill] sm:$0xff]  ;;  %v2876_v61 = vadd.f32 %v2860_v52, %v2804_v62  ;;  %v10150_v3 = vld [vmem:[#allocation27_spill] sm:$0xff] }
 0x2d2   : > { %v3604_v28 = vadd.f32 %v3588_v46, %v3548_v26  ;;  %v3365_v4 = vmul.f32 %v9044_v60, %v10146_v53  ;;  %v3004_v21 = vld [vmem:[#allocation2 + $0x84] sm:$0xff]  ;;  %v6369_v48 = vpop.eup %6368  ;;  %v2972_v63 = vmul.f32 %v8940_v9, %v2948_v12  ;;  %v3421_v46 = vmul.f32 %v9062_v31, %v10150_v3 }
 0x2d3   : > { %v10147_v27 = vld [vmem:[#allocation50_spill] sm:$0xff]  ;;  %v3268_v14 = vadd.f32 %v3252_v23, %v3212_v50  ;;  %v4250_v58 = vadd.f32 1.0, %v6369_v48  ;;  %v4053_v19 = vadd.f32 %v4037_v43, %v3997_v10  ;;  %v2932_v26 = vadd.f32 %v2916_v13, %v2876_v61  ;;  %v10153_v23 = vld [vmem:[#allocation49_spill] sm:$0xff] }
 0x2d4   : > { %v4297_v59 = vmul.f32 %v6367_v51, %v10147_v27  ;;  %v3661_v56 = vadd.f32 %v3645_v30, %v3604_v28  ;;  %v10148_v37 = vld [vmem:[#allocation18_spill] sm:$0xff]  ;;  %v3028_v51 = vmul.f32 %v8949_v22, %v3004_v21  ;;  %v3085_v13 = vmul.f32 %v8975_v47, %v10128_v0 }
 0x2d5   : > { %v3869_v38 = vmul.f32 %v9160_v41, %v10148_v37  ;;  %v9249_v1 = vld [vmem:[#allocation2 + $0xc8] sm:$0xff]  ;;  %v3324_v18 = vadd.f32 %v3308_v7, %v3268_v14  ;;  %6372 = vrcp.f32 %v4250_v58  ;;  %v4109_v52 = vadd.f32 %v4093_v32, %v4053_v19 }
 0x2d6   : > { %6154 = vmatmul.mubr.f32.gmra.mxu1 %v4297_v59  ;;  %10149 = vst [vmem:[#allocation33_spill] sm:$0xff] %v9249_v1  ;;  %v3717_v50 = vadd.f32 %v3701_v2, %v3661_v56  ;;  %v3926_v12 = vmul.f32 %v9167_v5, %v9249_v1  ;;  %v9256_v43 = vld [vmem:[#allocation2 + $0xc9] sm:$0xff]  ;;  %v3477_v7 = vmul.f32 %v9081_v20, %v10153_v23  ;;  %v10156_v59 = vld [vmem:[#allocation53_spill] sm:$0xff] }
 0x2d7   : > { %10151 = vst [vmem:[#allocation48_spill] sm:$0xff] %v9256_v43  ;;  %v9258_v30 = vld [vmem:[#allocation2 + $0xca] sm:$0xff]  ;;  %v3381_v62 = vadd.f32 %v3365_v4, %v3324_v18  ;;  %v2988_v10 = vadd.f32 %v2972_v63, %v2932_v26  ;;  %v4165_v28 = vadd.f32 %v4149_v44, %v4109_v52  ;;  %v3982_v32 = vmul.f32 %v9182_v49, %v9256_v43 }
 0x2d8   : > { %10152 = vst [vmem:[#allocation57_spill] sm:$0xff] %v9258_v30  ;;  %v3773_v21 = vadd.f32 %v3757_v45, %v3717_v50  ;;  %v4038_v2 = vmul.f32 %v9189_v15, %v9258_v30  ;;  %v9268_v48 = vld [vmem:[#allocation2 + $0xcb] sm:$0xff]  ;;  %v3533_v14 = vmul.f32 %v9097_v55, %v10156_v59  ;;  %v3141_v0 = vmul.f32 %v8993_v34, %v8867_v6 }
 0x2d9   : > { %10154 = vst [vmem:[#allocation58_spill] sm:$0xff] %v9268_v48  ;;  %v9270_v27 = vld [vmem:[#allocation2 + $0xcc] sm:$0xff]  ;;  %v3437_v4 = vadd.f32 %v3421_v46, %v3381_v62  ;;  %v3044_v61 = vadd.f32 %v3028_v51, %v2988_v10  ;;  %v9277_v44 = vadd.f32 %v8676_v39, %v4165_v28  ;;  %v4094_v63 = vmul.f32 %v9205_v57, %v9268_v48 }
 0x2da   : > { %10155 = vst [vmem:[#allocation32_spill] sm:$0xff] %v9270_v27  ;;  %v3829_v45 = vadd.f32 %v3813_v11, %v3773_v21  ;;  %v4150_v58 = vmul.f32 %v9212_v33, %v9270_v27  ;;  %v3589_v56 = vmul.f32 %v9104_v25, %v10130_v35  ;;  %v3197_v46 = vmul.f32 %v9005_v24, %v8869_v17  ;;  %v10158_v11 = vld [vmem:[#allocation36_spill] sm:$0xff]  ;;  %v10159_v51 = vld [vmem:[#allocation22_spill] sm:$0xff]  ;;  %v2782_v50 = vld [vmem:[#allocation2 + $0x90] sm:$0xff] }
 0x2db   : > { %10157 = vst [vmem:[#allocation37_spill] sm:$0xff] %v9277_v44  ;;  %v3493_v19 = vadd.f32 %v3477_v7, %v3437_v4  ;;  %v3101_v18 = vadd.f32 %v3085_v13, %v3044_v61  ;;  %v4204_v6 = vsub.f32 0.0, %v9277_v44  ;;  %v3646_v39 = vmul.f32 %v9116_v54, %v9155_v42  ;;  %v2837_v62 = vld [vmem:[#allocation2 + $0x91] sm:$0xff]  ;;  %v10160_v7 = vld [vmem:[#allocation9_spill] sm:$0xff] }
 0x2dc   : > { %v3885_v26 = vadd.f32 %v3869_v38, %v3829_v45  ;;  %v3702_v52 = vmul.f32 %v10159_v51, %v10158_v11  ;;  %v10161_v28 = vld [vmem:[#allocation51_spill] sm:$0xff]  ;;  %v10162_v13 = vld [vmem:[#allocation28_spill] sm:$0xff]  ;;  %v10164_v42 = vld [vmem:[#allocation25_spill] sm:$0xff] }
 0x2dd   : > { %v3549_v10 = vadd.f32 %v3533_v14, %v3493_v19  ;;  %v3758_v21 = vmul.f32 %v10161_v28, %v10160_v7  ;;  %v3157_v4 = vadd.f32 %v3141_v0, %v3101_v18  ;;  %v3253_v61 = vmul.f32 %v10143_v36, %v10162_v13  ;;  %v2893_v17 = vld [vmem:[#allocation2 + $0x92] sm:$0xff] }
 0x2de   : > { %v4228_v27 = vmul.f32 1.442695, %v4204_v6  ;;  %v3942_v44 = vadd.f32 %v3926_v12, %v3885_v26  ;;  %v10163_v38 = vld [vmem:[#allocation24_spill] sm:$0xff]  ;;  %v3366_v35 = vmul.f32 %v9044_v60, %v10164_v42  ;;  %v6371_v48 = vpop.eup %6370  ;;  %v2805_v19 = vmul.f32 %v9034_v40, %v2782_v50 }
 0x2df   : > { %v3309_v45 = vmul.f32 %v10145_v16, %v10163_v38  ;;  %v2949_v11 = vld [vmem:[#allocation2 + $0x93] sm:$0xff]  ;;  %v3605_v30 = vadd.f32 %v3589_v56, %v3549_v10  ;;  %v3213_v14 = vadd.f32 %v3197_v46, %v3157_v4  ;;  %v2861_v0 = vmul.f32 %v8922_v8, %v2837_v62  ;;  %v10167_v10 = vld [vmem:[#allocation29_spill] sm:$0xff] }
 0x2e0   : > { %v4251_v18 = vadd.f32 1.0, %v6371_v48  ;;  %6374 = vpow2.f32 %v4228_v27  ;;  %v3998_v13 = vadd.f32 %v3982_v32, %v3942_v44  ;;  %v2917_v6 = vmul.f32 %v8934_v29, %v2893_v17  ;;  %v3005_v12 = vld [vmem:[#allocation2 + $0x94] sm:$0xff]  ;;  %v10168_v4 = vld [vmem:[#allocation17_spill] sm:$0xff]  ;;  %v10170_v17 = vld [vmem:[#allocation30_spill] sm:$0xff] }
 0x2e1   : > { %v3662_v26 = vadd.f32 %v3646_v39, %v3605_v30  ;;  %v3269_v7 = vadd.f32 %v3253_v61, %v3213_v14  ;;  %v2877_v38 = vadd.f32 %v2861_v0, %v2805_v19  ;;  %v2973_v16 = vmul.f32 %v8940_v9, %v2949_v11  ;;  %v10165_v60 = vld [vmem:[#allocation40_spill] sm:$0xff]  ;;  %v10166_v56 = vld [vmem:[#allocation35_spill] sm:$0xff]  ;;  %v10169_v61 = vld [vmem:[#allocation45_spill] sm:$0xff] }
 0x2e2   : > { %6376 = vrcp.f32 %v4251_v18  ;;  %v4054_v42 = vadd.f32 %v4038_v2, %v3998_v13  ;;  %v3814_v46 = vmul.f32 %v10166_v56, %v10165_v60  ;;  %v3422_v50 = vmul.f32 %v9062_v31, %v10167_v10  ;;  %v6373_v62 = vpop.eup %6372  ;;  %v9314_v19 = vld [vmem:[#allocation2 + $0xd8] sm:$0xff]  ;;  %v10173_v13 = vld [vmem:[#allocation34_spill] sm:$0xff] }
 0x2e3   : > { %v3718_v48 = vadd.f32 %v3702_v52, %v3662_v26  ;;  %v3325_v27 = vadd.f32 %v3309_v45, %v3269_v7  ;;  %v2933_v32 = vadd.f32 %v2917_v6, %v2877_v38  ;;  %v3029_v44 = vmul.f32 %v8949_v22, %v3005_v12  ;;  %10171 = vst [vmem:[#allocation23_spill] sm:$0xff] %v9314_v19  ;;  %v9316_v0 = vld [vmem:[#allocation2 + $0xd9] sm:$0xff] }
 0x2e4   : > { %v4298_v30 = vmul.f32 %v6373_v62, %v10168_v4  ;;  %v4110_v39 = vadd.f32 %v4094_v63, %v4054_v42  ;;  %v3870_v11 = vmul.f32 %v9160_v41, %v10169_v61  ;;  %v3478_v2 = vmul.f32 %v9081_v20, %v10170_v17  ;;  %10172 = vst [vmem:[#allocation52_spill] sm:$0xff] %v9316_v0  ;;  %v9326_v12 = vld [vmem:[#allocation2 + $0xda] sm:$0xff] }
 0x2e5   : > { %v3774_v14 = vadd.f32 %v3758_v21, %v3718_v48  ;;  %v3382_v18 = vadd.f32 %v3366_v35, %v3325_v27  ;;  %v2989_v52 = vadd.f32 %v2973_v16, %v2933_v32  ;;  %v3086_v7 = vmul.f32 %v8975_v47, %v10146_v53  ;;  %10174 = vst [vmem:[#allocation55_spill] sm:$0xff] %v9326_v12  ;;  %v9328_v26 = vld [vmem:[#allocation2 + $0xdb] sm:$0xff] }
 0x2e6   : > { %6156 = vmatprep.mubr.f32.mxu1 %v4298_v30  ;;  %v4166_v45 = vadd.f32 %v4150_v58, %v4110_v39  ;;  %v3927_v42 = vmul.f32 %v9167_v5, %v9314_v19  ;;  %v3983_v63 = vmul.f32 %v9182_v49, %v9316_v0  ;;  %v3534_v21 = vmul.f32 %v9097_v55, %v10173_v13  ;;  %v9335_v58 = vld [vmem:[%s9707_s4] ss:$0 sm:$0xff] }
 0x2e7   : > { %v3830_v6 = vadd.f32 %v3814_v46, %v3774_v14  ;;  %10175 = vst [vmem:[#allocation11_spill] sm:$0xff] %v9328_v26  ;;  %v3438_v35 = vadd.f32 %v3422_v50, %v3382_v18  ;;  %v3045_v16 = vadd.f32 %v3029_v44, %v2989_v52  ;;  %v3142_v53 = vmul.f32 %v8993_v34, %v10150_v3  ;;  %v9346_v27 = vld [vmem:[#allocation2 + $0xdc] sm:$0xff] }
 0x2e8   : > { %v9338_v38 = vadd.f32 %v9335_v58, %v4166_v45  ;;  %v4039_v46 = vmul.f32 %v9189_v15, %v9326_v12  ;;  %v4095_v62 = vmul.f32 %v9205_v57, %v9328_v26  ;;  %v3590_v50 = vmul.f32 %v9104_v25, %v10148_v37  ;;  %10177 = vst [vmem:[#allocation20_spill] sm:$0xff] %v9346_v27  ;;  %v2783_v18 = vld [vmem:[#allocation2 + $0x98] sm:$0xff]  ;;  %v10180_v26 = vld [vmem:[#allocation21_spill] sm:$0xff] }
 0x2e9   : > { %v3886_v48 = vadd.f32 %v3870_v11, %v3830_v6  ;;  %v3494_v3 = vadd.f32 %v3478_v2, %v3438_v35  ;;  %v3102_v32 = vadd.f32 %v3086_v7, %v3045_v16  ;;  %v3198_v44 = vmul.f32 %v9005_v24, %v10153_v23  ;;  %v2838_v7 = vld [vmem:[#allocation2 + $0x99] sm:$0xff] }
 0x2ea   : > { %10176 = vst [vmem:[#allocation15_spill] sm:$0xff] %v9338_v38  ;;  %v4205_v4 = vsub.f32 0.0, %v9338_v38  ;;  %v4151_v30 = vmul.f32 %v9212_v33, %v9346_v27  ;;  %v3647_v39 = vmul.f32 %v9116_v54, %v9249_v1  ;;  %v3703_v14 = vmul.f32 %v10159_v51, %v9256_v43  ;;  %v2894_v23 = vld [vmem:[#allocation2 + $0x9a] sm:$0xff]  ;;  %v10179_v38 = vld [vmem:[#allocation58_spill] sm:$0xff]  ;;  %v10181_v1 = vld [vmem:[#allocation31_spill] sm:$0xff] }
 0x2eb   : > { %v3943_v11 = vadd.f32 %v3927_v42, %v3886_v48  ;;  %v3550_v52 = vadd.f32 %v3534_v21, %v3494_v3  ;;  %v3158_v45 = vadd.f32 %v3142_v53, %v3102_v32  ;;  %v3254_v2 = vmul.f32 %v10143_v36, %v10156_v59  ;;  %v10178_v35 = vld [vmem:[#allocation57_spill] sm:$0xff] }
 0x2ec   : > { %v4230_v6 = vmul.f32 1.442695, %v4205_v4  ;;  %v3759_v16 = vmul.f32 %v10161_v28, %v10178_v35  ;;  %v3815_v27 = vmul.f32 %v10166_v56, %v10179_v38  ;;  %v3310_v37 = vmul.f32 %v10181_v1, %v10180_v26  ;;  %v2950_v48 = vld [vmem:[#allocation2 + $0x9b] sm:$0xff] }
 0x2ed   : > { %v6375_v43 = vpop.eup %6374  ;;  %v3999_v13 = vadd.f32 %v3983_v63, %v3943_v11  ;;  %v3606_v42 = vadd.f32 %v3590_v50, %v3550_v52  ;;  %v3214_v21 = vadd.f32 %v3198_v44, %v3158_v45  ;;  %v2806_v53 = vmul.f32 %v9034_v40, %v2783_v18  ;;  %v10182_v56 = vld [vmem:[#allocation13_spill] sm:$0xff]  ;;  %v10183_v28 = vld [vmem:[#allocation56_spill] sm:$0xff]  ;;  %v10184_v63 = vld [vmem:[#allocation47_spill] sm:$0xff] }
 0x2ee   : > { %v4252_v59 = vadd.f32 1.0, %v6375_v43  ;;  %6378 = vpow2.f32 %v4230_v6  ;;  %v2862_v3 = vmul.f32 %v8922_v8, %v2838_v7  ;;  %v2918_v32 = vmul.f32 %v8934_v29, %v2894_v23  ;;  %v3006_v1 = vld [vmem:[#allocation2 + $0x9c] sm:$0xff] }
 0x2ef   : > { %v6377_v4 = vpop.eup %6376  ;;  %v4055_v35 = vadd.f32 %v4039_v46, %v3999_v13  ;;  %v3663_v36 = vadd.f32 %v3647_v39, %v3606_v42  ;;  %v3270_v38 = vadd.f32 %v3254_v2, %v3214_v21  ;;  %v3367_v26 = vmul.f32 %v10183_v28, %v10182_v56  ;;  %v10185_v45 = vld [vmem:[#allocation36_spill] sm:$0xff]  ;;  %v9377_v42 = vld [vmem:[#allocation2 + $0xe0] sm:$0xff] }
 0x2f0   : > { %v4299_v50 = vmul.f32 %v6377_v4, %v10184_v63  ;;  %6380 = vrcp.f32 %v4252_v59  ;;  %v2878_v44 = vadd.f32 %v2862_v3, %v2806_v53  ;;  %v2974_v18 = vmul.f32 %v8940_v9, %v2950_v48  ;;  %v10186_v13 = vld [vmem:[#allocation32_spill] sm:$0xff]  ;;  %10187 = vst [vmem:[#allocation41_spill] sm:$0xff] %v9377_v42  ;;  %v9379_v21 = vld [vmem:[#allocation2 + $0xe1] sm:$0xff] }
 0x2f1   : > { %v4111_v43 = vadd.f32 %v4095_v62, %v4055_v35  ;;  %v3719_v11 = vadd.f32 %v3703_v14, %v3663_v36  ;;  %v3326_v52 = vadd.f32 %v3310_v37, %v3270_v38  ;;  %v3423_v7 = vmul.f32 %v9062_v31, %v10185_v45  ;;  %10188 = vst [vmem:[#allocation38_spill] sm:$0xff] %v9379_v21  ;;  %v10189_v62 = vld [vmem:[#allocation9_spill] sm:$0xff] }
 0x2f2   : > { %6157 = vmatmul.mubr.f32.gmra.mxu1 %v4299_v50  ;;  %v3871_v46 = vmul.f32 %v9160_v41, %v10186_v13  ;;  %v2934_v39 = vadd.f32 %v2918_v32, %v2878_v44  ;;  %v3030_v2 = vmul.f32 %v8949_v22, %v3006_v1  ;;  %v3479_v36 = vmul.f32 %v9081_v20, %v10189_v62  ;;  %v10190_v35 = vld [vmem:[#allocation25_spill] sm:$0xff] }
 0x2f3   : > { %v4167_v23 = vadd.f32 %v4151_v30, %v4111_v43  ;;  %v3775_v6 = vadd.f32 %v3759_v16, %v3719_v11  ;;  %v3383_v53 = vadd.f32 %v3367_v26, %v3326_v52  ;;  %v3928_v37 = vmul.f32 %v9167_v5, %v9377_v42  ;;  %v9392_v48 = vld [vmem:[#allocation2 + $0xe2] sm:$0xff] }
 0x2f4   : > { %v3984_v38 = vmul.f32 %v9182_v49, %v9379_v21  ;;  %v2990_v14 = vadd.f32 %v2974_v18, %v2934_v39  ;;  %v3087_v1 = vmul.f32 %v8975_v47, %v10190_v35  ;;  %10192 = vst [vmem:[#allocation10_spill] sm:$0xff] %v9392_v48  ;;  %v9394_v59 = vld [vmem:[#allocation2 + $0xe3] sm:$0xff]  ;;  %v3535_v32 = vmul.f32 %v9097_v55, %v10165_v60  ;;  %v10195_v35 = vld [vmem:[#allocation51_spill] sm:$0xff] }
 0x2f5   : > { %v9390_v30 = vadd.f32 %v9335_v58, %v4167_v23  ;;  %v3831_v16 = vadd.f32 %v3815_v27, %v3775_v6  ;;  %10193 = vst [vmem:[#allocation42_spill] sm:$0xff] %v9394_v59  ;;  %v3439_v3 = vadd.f32 %v3423_v7, %v3383_v53  ;;  %v4040_v4 = vmul.f32 %v9189_v15, %v9392_v48  ;;  %v9405_v18 = vld [vmem:[#allocation2 + $0xe4] sm:$0xff] }
 0x2f6   : > { %v4096_v26 = vmul.f32 %v9205_v57, %v9394_v59  ;;  %v3046_v63 = vadd.f32 %v3030_v2, %v2990_v14  ;;  %v3143_v50 = vmul.f32 %v8993_v34, %v10167_v10  ;;  %10194 = vst [vmem:[#allocation44_spill] sm:$0xff] %v9405_v18  ;;  %v3591_v11 = vmul.f32 %v9104_v25, %v10169_v61  ;;  %v2784_v10 = vld [vmem:[#allocation2 + $0xa8] sm:$0xff] }
 0x2f7   : > { %10191 = vst [vmem:[#allocation39_spill] sm:$0xff] %v9390_v30  ;;  %v4206_v27 = vsub.f32 0.0, %v9390_v30  ;;  %v3887_v44 = vadd.f32 %v3871_v46, %v3831_v16  ;;  %v3495_v43 = vadd.f32 %v3479_v36, %v3439_v3  ;;  %v4152_v52 = vmul.f32 %v9212_v33, %v9405_v18  ;;  %v2839_v36 = vld [vmem:[#allocation2 + $0xa9] sm:$0xff] }
 0x2f8   : > { %v3648_v7 = vmul.f32 %v9116_v54, %v9314_v19  ;;  %v3103_v39 = vadd.f32 %v3087_v1, %v3046_v63  ;;  %v3199_v2 = vmul.f32 %v9005_v24, %v10170_v17  ;;  %v3704_v53 = vmul.f32 %v10159_v51, %v9316_v0  ;;  %v2895_v14 = vld [vmem:[#allocation2 + $0xaa] sm:$0xff] }
 0x2f9   : > { %v4232_v23 = vmul.f32 1.442695, %v4206_v27  ;;  %v3944_v6 = vadd.f32 %v3928_v37, %v3887_v44  ;;  %v3551_v46 = vadd.f32 %v3535_v32, %v3495_v43  ;;  %v3760_v16 = vmul.f32 %v10195_v35, %v9326_v12  ;;  %v10196_v30 = vld [vmem:[#allocation34_spill] sm:$0xff]  ;;  %v10199_v63 = vld [vmem:[#allocation31_spill] sm:$0xff] }
 0x2fa   : > { %v3159_v3 = vadd.f32 %v3143_v50, %v3103_v39  ;;  %v10197_v18 = vld [vmem:[#allocation54_spill] sm:$0xff]  ;;  %v2807_v27 = vmul.f32 %v9034_v40, %v2784_v10  ;;  %v2863_v0 = vmul.f32 %v8922_v8, %v2839_v36  ;;  %v2919_v12 = vmul.f32 %v8934_v29, %v2895_v14  ;;  %v10204_v14 = vld [vmem:[#allocation20_spill] sm:$0xff] }
 0x2fb   : > { %v3255_v59 = vmul.f32 %v10197_v18, %v10196_v30  ;;  %v10198_v1 = vld [vmem:[#allocation18_spill] sm:$0xff]  ;;  %v6379_v61 = vpop.eup %6378  ;;  %6382 = vpow2.f32 %v4232_v23  ;;  %v4000_v37 = vadd.f32 %v3984_v38, %v3944_v6  ;;  %v3607_v32 = vadd.f32 %v3591_v11, %v3551_v46  ;;  %v10200_v30 = vld [vmem:[#allocation33_spill] sm:$0xff]  ;;  %v10202_v6 = vld [vmem:[#allocation11_spill] sm:$0xff] }
 0x2fc   : > { %v3311_v19 = vmul.f32 %v10199_v63, %v10198_v1  ;;  %v2951_v17 = vld [vmem:[#allocation2 + $0xab] sm:$0xff]  ;;  %v4253_v44 = vadd.f32 1.0, %v6379_v61  ;;  %v3215_v43 = vadd.f32 %v3199_v2, %v3159_v3  ;;  %v3368_v18 = vmul.f32 %v10183_v28, %v10200_v30  ;;  %v10201_v23 = vld [vmem:[#allocation37_spill] sm:$0xff] }
 0x2fd   : > { %v6381_v50 = vpop.eup %6380  ;;  %v4056_v39 = vadd.f32 %v4040_v4, %v4000_v37  ;;  %v3664_v60 = vadd.f32 %v3648_v7, %v3607_v32  ;;  %v2975_v1 = vmul.f32 %v8940_v9, %v2951_v17  ;;  %v3007_v63 = vld [vmem:[#allocation2 + $0xac] sm:$0xff]  ;;  %v2879_v10 = vadd.f32 %v2863_v0, %v2807_v27  ;;  %v10205_v37 = vld [vmem:[#allocation48_spill] sm:$0xff] }
 0x2fe   : > { %v4300_v38 = vmul.f32 %v6381_v50, %v10201_v23  ;;  %6384 = vrcp.f32 %v4253_v44  ;;  %v3271_v11 = vadd.f32 %v3255_v59, %v3215_v43  ;;  %v10203_v46 = vld [vmem:[#allocation35_spill] sm:$0xff]  ;;  %v3872_v4 = vmul.f32 %v9160_v41, %v10204_v14 }
 0x2ff   : > { %v4112_v61 = vadd.f32 %v4096_v26, %v4056_v39  ;;  %v3720_v2 = vadd.f32 %v3704_v53, %v3664_v60  ;;  %v3816_v36 = vmul.f32 %v10203_v46, %v10202_v6  ;;  %v9434_v7 = vld [vmem:[#allocation2 + $0xf0] sm:$0xff]  ;;  %v3424_v32 = vmul.f32 %v9062_v31, %v10205_v37 }
 0x300   : > { %6159 = vmatprep.mubr.f32.mxu1 %v4300_v38  ;;  %v9436_v3 = vld [vmem:[#allocation2 + $0xf1] sm:$0xff]  ;;  %v3327_v17 = vadd.f32 %v3311_v19, %v3271_v11  ;;  %v2935_v44 = vadd.f32 %v2919_v12, %v2879_v10  ;;  %v3031_v0 = vmul.f32 %v8949_v22, %v3007_v63  ;;  %v3929_v26 = vmul.f32 %v9167_v5, %v9434_v7  ;;  %v10208_v19 = vld [vmem:[#allocation57_spill] sm:$0xff]  ;;  %v10211_v10 = vld [vmem:[#allocation58_spill] sm:$0xff] }
 0x301   : > { %v4168_v59 = vadd.f32 %v4152_v52, %v4112_v61  ;;  %v3776_v60 = vadd.f32 %v3760_v16, %v3720_v2  ;;  %v3985_v53 = vmul.f32 %v9182_v49, %v9436_v3  ;;  %v9445_v27 = vld [vmem:[#allocation2 + $0xf2] sm:$0xff]  ;;  %v3480_v39 = vmul.f32 %v9081_v20, %v10208_v19 }
 0x302   : > { %10206 = vst [vmem:[#allocation12_spill] sm:$0xff] %v9445_v27  ;;  %v9447_v43 = vld [vmem:[#allocation2 + $0xf3] sm:$0xff]  ;;  %v3384_v50 = vadd.f32 %v3368_v18, %v3327_v17  ;;  %v2991_v23 = vadd.f32 %v2975_v1, %v2935_v44  ;;  %v3088_v12 = vmul.f32 %v8975_v47, %v10182_v56  ;;  %v4041_v63 = vmul.f32 %v9189_v15, %v9445_v27 }
 0x303   : > { %10207 = vst [vmem:[#allocation16_spill] sm:$0xff] %v9447_v43  ;;  %v9454_v52 = vadd.f32 %v9335_v58, %v4168_v59  ;;  %v3832_v16 = vadd.f32 %v3816_v36, %v3776_v60  ;;  %v4097_v38 = vmul.f32 %v9205_v57, %v9447_v43  ;;  %v9460_v11 = vld [vmem:[#allocation2 + $0xf4] sm:$0xff]  ;;  %v3536_v61 = vmul.f32 %v9097_v55, %v10211_v10 }
 0x304   : > { %10210 = vst [vmem:[#allocation19_spill] sm:$0xff] %v9460_v11  ;;  %v3440_v18 = vadd.f32 %v3424_v32, %v3384_v50  ;;  %v3047_v1 = vadd.f32 %v3031_v0, %v2991_v23  ;;  %v3144_v56 = vmul.f32 %v8993_v34, %v10185_v45  ;;  %v4153_v36 = vmul.f32 %v9212_v33, %v9460_v11  ;;  %v2785_v50 = vld [vmem:[#allocation2 + $0xb0] sm:$0xff]  ;;  %v10212_v27 = vld [vmem:[#allocation40_spill] sm:$0xff] }
 0x305   : > { %10209 = vst [vmem:[#allocation14_spill] sm:$0xff] %v9454_v52  ;;  %v4207_v2 = vsub.f32 0.0, %v9454_v52  ;;  %v3888_v17 = vadd.f32 %v3872_v4, %v3832_v16  ;;  %v3592_v44 = vmul.f32 %v9104_v25, %v10186_v13  ;;  %v3649_v32 = vmul.f32 %v9116_v54, %v9377_v42  ;;  %v2840_v52 = vld [vmem:[#allocation2 + $0xb1] sm:$0xff]  ;;  %v10213_v42 = vld [vmem:[#allocation54_spill] sm:$0xff] }
 0x306   : > { %v3496_v59 = vadd.f32 %v3480_v39, %v3440_v18  ;;  %v3104_v60 = vadd.f32 %v3088_v12, %v3047_v1  ;;  %v3200_v0 = vmul.f32 %v9005_v24, %v10189_v62  ;;  %v3705_v4 = vmul.f32 %v10159_v51, %v9379_v21  ;;  %v2896_v11 = vld [vmem:[#allocation2 + $0xb2] sm:$0xff]  ;;  %v10214_v1 = vld [vmem:[#allocation45_spill] sm:$0xff] }
 0x307   : > { %v4234_v23 = vmul.f32 1.442695, %v4207_v2  ;;  %v3945_v45 = vadd.f32 %v3929_v26, %v3888_v17  ;;  %v3761_v16 = vmul.f32 %v10195_v35, %v9392_v48  ;;  %v3256_v12 = vmul.f32 %v10213_v42, %v10212_v27  ;;  %v10215_v33 = vld [vmem:[#allocation31_spill] sm:$0xff] }
 0x308   : > { %v6383_v43 = vpop.eup %6382  ;;  %v3552_v39 = vadd.f32 %v3536_v61, %v3496_v59  ;;  %v3160_v18 = vadd.f32 %v3144_v56, %v3104_v60  ;;  %v3312_v62 = vmul.f32 %v10215_v33, %v10214_v1  ;;  %v2952_v13 = vld [vmem:[#allocation2 + $0xb3] sm:$0xff]  ;;  %v2808_v17 = vmul.f32 %v9034_v40, %v2785_v50 }
 0x309   : > { %v4254_v2 = vadd.f32 1.0, %v6383_v43  ;;  %6386 = vpow2.f32 %v4234_v23  ;;  %v4001_v26 = vadd.f32 %v3985_v53, %v3945_v45  ;;  %v2864_v48 = vmul.f32 %v8922_v8, %v2840_v52  ;;  %v10216_v59 = vld [vmem:[#allocation23_spill] sm:$0xff]  ;;  %v10219_v52 = vld [vmem:[#allocation52_spill] sm:$0xff] }
 0x30a   : > { %v3608_v21 = vadd.f32 %v3592_v44, %v3552_v39  ;;  %v3216_v51 = vadd.f32 %v3200_v0, %v3160_v18  ;;  %v2920_v35 = vmul.f32 %v8934_v29, %v2896_v11  ;;  %v3369_v27 = vmul.f32 %v10183_v28, %v10216_v59  ;;  %v3008_v1 = vld [vmem:[#allocation2 + $0xb4] sm:$0xff]  ;;  %v10218_v0 = vld [vmem:[#allocation42_spill] sm:$0xff] }
 0x30b   : > { %v6385_v61 = vpop.eup %6384  ;;  %6388 = vrcp.f32 %v4254_v2  ;;  %v4057_v56 = vadd.f32 %v4041_v63, %v4001_v26  ;;  %v2976_v60 = vmul.f32 %v8940_v9, %v2952_v13  ;;  %v10217_v43 = vld [vmem:[#allocation15_spill] sm:$0xff]  ;;  %v2880_v40 = vadd.f32 %v2864_v48, %v2808_v17  ;;  %v10220_v13 = vld [vmem:[#allocation44_spill] sm:$0xff] }
 0x30c   : > { %v4301_v23 = vmul.f32 %v6385_v61, %v10217_v43  ;;  %v3665_v53 = vadd.f32 %v3649_v32, %v3608_v21  ;;  %v3272_v45 = vadd.f32 %v3256_v12, %v3216_v51  ;;  %v3817_v8 = vmul.f32 %v10203_v46, %v10218_v0  ;;  %v10221_v21 = vld [vmem:[#allocation55_spill] sm:$0xff]  ;;  %v9519_v59 = vld [vmem:[#allocation2 + $0xfa] sm:$0xff] }
 0x30d   : > { %v4113_v44 = vadd.f32 %v4097_v38, %v4057_v56  ;;  %v3425_v29 = vmul.f32 %v9062_v31, %v10219_v52  ;;  %v2936_v50 = vadd.f32 %v2920_v35, %v2880_v40  ;;  %v3032_v39 = vmul.f32 %v8949_v22, %v3008_v1  ;;  %v9499_v38 = vld [vmem:[#allocation2 + $0xf8] sm:$0xff] }
 0x30e   : > { %6160 = vmatmul.mubr.f32.gmra.mxu1 %v4301_v23  ;;  %v3721_v63 = vadd.f32 %v3705_v4, %v3665_v53  ;;  %v3328_v11 = vadd.f32 %v3312_v62, %v3272_v45  ;;  %v3873_v18 = vmul.f32 %v9160_v41, %v10220_v13  ;;  %v3481_v51 = vmul.f32 %v9081_v20, %v10221_v21  ;;  %v9510_v62 = vld [vmem:[#allocation2 + $0xf9] sm:$0xff] }
 0x30f   : > { %v4169_v9 = vadd.f32 %v4153_v36, %v4113_v44  ;;  %v2992_v12 = vadd.f32 %v2976_v60, %v2936_v50  ;;  %v3089_v2 = vmul.f32 %v8975_v47, %v10200_v30  ;;  %v3930_v22 = vmul.f32 %v9167_v5, %v9499_v38  ;;  %v9527_v53 = vld [vmem:[#allocation2 + $0xfb] sm:$0xff] }
 0x310   : > { %v3777_v48 = vadd.f32 %v3761_v16, %v3721_v63  ;;  %v3385_v32 = vadd.f32 %v3369_v27, %v3328_v11  ;;  %v3537_v35 = vmul.f32 %v9097_v55, %v10202_v6  ;;  %v3145_v17 = vmul.f32 %v8993_v34, %v10205_v37  ;;  %v10223_v50 = vld [vmem:[#allocation32_spill] sm:$0xff] }
 0x311   : > { %v9504_v4 = vadd.f32 %v9335_v58, %v4169_v9  ;;  %v3048_v26 = vadd.f32 %v3032_v39, %v2992_v12  ;;  %v3986_v47 = vmul.f32 %v9182_v49, %v9510_v62  ;;  %v3593_v30 = vmul.f32 %v9104_v25, %v10204_v14  ;;  %v10224_v9 = vld [vmem:[#allocation39_spill] sm:$0xff]  ;;  %v10226_v21 = vld [vmem:[#allocation12_spill] sm:$0xff] }
 0x312   : > { %v3833_v36 = vadd.f32 %v3817_v8, %v3777_v48  ;;  %v3441_v16 = vadd.f32 %v3425_v29, %v3385_v32  ;;  %v3201_v60 = vmul.f32 %v9005_v24, %v10208_v19  ;;  %v4042_v34 = vmul.f32 %v9189_v15, %v9519_v59  ;;  %v10222_v19 = vld [vmem:[#allocation22_spill] sm:$0xff] }
 0x313   : > { %v4208_v61 = vsub.f32 0.0, %v9504_v4  ;;  %v3105_v27 = vadd.f32 %v3089_v2, %v3048_v26  ;;  %v3650_v37 = vmul.f32 %v9116_v54, %v9434_v7  ;;  %v3257_v40 = vmul.f32 %v10213_v42, %v10211_v10  ;;  %v9535_v7 = vld [vmem:[#allocation2 + $0xfc] sm:$0xff]  ;;  %v10225_v42 = vld [vmem:[#allocation46_spill] sm:$0xff] }
 0x314   : > { %v3889_v56 = vadd.f32 %v3873_v18, %v3833_v36  ;;  %v3497_v6 = vadd.f32 %v3481_v51, %v3441_v16  ;;  %v4098_v24 = vmul.f32 %v9205_v57, %v9527_v53  ;;  %v3706_v8 = vmul.f32 %v10222_v19, %v9436_v3  ;;  %v10227_v51 = vld [vmem:[#allocation51_spill] sm:$0xff]  ;;  %v10228_v2 = vld [vmem:[#allocation41_spill] sm:$0xff]  ;;  %v3907_v26 = vld [vmem:[#allocation2 + $0x108] sm:$0xff] }
 0x315   : > { %v4236_v1 = vmul.f32 1.442695, %v4208_v61  ;;  %v3161_v45 = vadd.f32 %v3145_v17, %v3105_v27  ;;  %v3313_v39 = vmul.f32 %v10215_v33, %v10223_v50  ;;  %v4154_v10 = vmul.f32 %v10225_v42, %v9535_v7  ;;  %v10230_v61 = vld [vmem:[#allocation38_spill] sm:$0xff] }
 0x316   : > { %v6387_v43 = vpop.eup %6386  ;;  %v3946_v23 = vadd.f32 %v3930_v22, %v3889_v56  ;;  %v3553_v14 = vadd.f32 %v3537_v35, %v3497_v6  ;;  %v3762_v48 = vmul.f32 %v10227_v51, %v10226_v21  ;;  %v3370_v22 = vmul.f32 %v10183_v28, %v10228_v2  ;;  %v10229_v35 = vld [vmem:[#allocation16_spill] sm:$0xff] }
 0x317   : > { %v4255_v44 = vadd.f32 1.0, %v6387_v43  ;;  %6390 = vpow2.f32 %v4236_v1  ;;  %v3217_v11 = vadd.f32 %v3201_v60, %v3161_v45  ;;  %v3818_v36 = vmul.f32 %v10203_v46, %v10229_v35  ;;  %v3963_v60 = vld [vmem:[#allocation2 + $0x109] sm:$0xff] }
 0x318   : > { %v6389_v52 = vpop.eup %6388  ;;  %v4002_v29 = vadd.f32 %v3986_v47, %v3946_v23  ;;  %v3609_v63 = vadd.f32 %v3593_v30, %v3553_v14  ;;  %v3426_v47 = vmul.f32 %v9062_v31, %v10230_v61  ;;  %v10231_v30 = vld [vmem:[#allocation19_spill] sm:$0xff]  ;;  %v3538_v31 = vmul.f32 %v9097_v55, %v10218_v0 }
 0x319   : > { %v4302_v18 = vmul.f32 %v6389_v52, %v10224_v9  ;;  %6392 = vrcp.f32 %v4255_v44  ;;  %v3273_v12 = vadd.f32 %v3257_v40, %v3217_v11  ;;  %v3874_v56 = vmul.f32 %v9160_v41, %v10231_v30  ;;  %v4019_v14 = vld [vmem:[#allocation2 + $0x10a] sm:$0xff] }
 0x31a   : > { %v4058_v32 = vadd.f32 %v4042_v34, %v4002_v29  ;;  %v3666_v3 = vadd.f32 %v3650_v37, %v3609_v63  ;;  %v10232_v34 = vld [vmem:[#allocation10_spill] sm:$0xff]  ;;  %v3931_v37 = vmul.f32 %v9167_v5, %v3907_v26  ;;  %v3987_v40 = vmul.f32 %v9182_v49, %v3963_v60  ;;  %v4132_v60 = vld [vmem:[#allocation2 + $0x114] sm:$0xff] }
 0x31b   : > { %6162 = vmatprep.mubr.f32.mxu1 %v4302_v18  ;;  %v3329_v17 = vadd.f32 %v3313_v39, %v3273_v12  ;;  %v3482_v28 = vmul.f32 %v9081_v20, %v10232_v34  ;;  %v3594_v20 = vmul.f32 %v9104_v25, %v10220_v13  ;;  %v4043_v29 = vmul.f32 %v9189_v15, %v4019_v14  ;;  %v4131_v18 = vld [vmem:[#allocation2 + $0x10c] sm:$0xff] }
 0x31c   : > { %v4114_v33 = vadd.f32 %v4098_v24, %v4058_v32  ;;  %v3722_v16 = vadd.f32 %v3706_v8, %v3666_v3  ;;  %v4075_v8 = vld [vmem:[#allocation2 + $0x10b] sm:$0xff]  ;;  %v3651_v9 = vmul.f32 %v9116_v54, %v9499_v38  ;;  %v3707_v25 = vmul.f32 %v10222_v19, %v9510_v62 }
 0x31d   : > { %v3386_v1 = vadd.f32 %v3370_v22, %v3329_v17  ;;  %v4099_v0 = vmul.f32 %v9205_v57, %v4075_v8  ;;  %v10233_v13 = vld [vmem:[#allocation14_spill] sm:$0xff]  ;;  %v4155_v12 = vmul.f32 %v10225_v42, %v4131_v18  ;;  %v3763_v54 = vmul.f32 %v10227_v51, %v9519_v59  ;;  %v3964_v19 = vld [vmem:[#allocation2 + $0x111] sm:$0xff] }
 0x31e   : > { %v4170_v6 = vadd.f32 %v4154_v10, %v4114_v33  ;;  %v3778_v27 = vadd.f32 %v3762_v48, %v3722_v16  ;;  %v3819_v35 = vmul.f32 %v10203_v46, %v9527_v53  ;;  %v3875_v62 = vmul.f32 %v9160_v41, %v9535_v7 }
 0x31f   : > { %v3442_v45 = vadd.f32 %v3426_v47, %v3386_v1  ;;  %v4020_v47 = vld [vmem:[#allocation2 + $0x112] sm:$0xff]  ;;  %v3988_v30 = vmul.f32 %v9182_v49, %v3964_v19 }
 0x320   : > { %v9556_v43 = vadd.f32 %v9335_v58, %v4170_v6  ;;  %v3834_v23 = vadd.f32 %v3818_v36, %v3778_v27  ;;  %v3908_v36 = vld [vmem:[#allocation2 + $0x110] sm:$0xff]  ;;  %v4044_v53 = vmul.f32 %v9189_v15, %v4020_v47 }
 0x321   : > { %v3498_v52 = vadd.f32 %v3482_v28, %v3442_v45  ;;  %v3932_v61 = vmul.f32 %v9167_v5, %v3908_v36 }
 0x322   : > { %v4209_v44 = vsub.f32 0.0, %v9556_v43  ;;  %v3890_v24 = vadd.f32 %v3874_v56, %v3834_v23  ;;  %v4076_v56 = vld [vmem:[#allocation2 + $0x113] sm:$0xff] }
 0x323   : > { %v3554_v39 = vadd.f32 %v3538_v31, %v3498_v52  ;;  %v4100_v34 = vmul.f32 %v9205_v57, %v4076_v56 }
 0x324   : > { %v6391_v63 = vpop.eup %6390  ;;  %v4238_v11 = vmul.f32 1.442695, %v4209_v44  ;;  %v3947_v50 = vadd.f32 %v3931_v37, %v3890_v24  ;;  %v4156_v37 = vmul.f32 %v10225_v42, %v4132_v60  ;;  %v5090_v60 = vld [vmem:[%s6810_s23 + $0x6b] sm:$0xff] }
 0x325   : > { %v4256_v55 = vadd.f32 1.0, %v6391_v63  ;;  %v3610_v48 = vadd.f32 %v3594_v20, %v3554_v39 }
 0x326   : > { %v6393_v10 = vpop.eup %6392  ;;  %6394 = vpow2.f32 %v4238_v11  ;;  %v4003_v21 = vadd.f32 %v3987_v40, %v3947_v50 }
 0x327   : > { %v4303_v32 = vmul.f32 %v6393_v10, %v10233_v13  ;;  %6396 = vrcp.f32 %v4256_v55  ;;  %v3667_v2 = vadd.f32 %v3651_v9, %v3610_v48 }
 0x328   : > { %v4059_v3 = vadd.f32 %v4043_v29, %v4003_v21 }
 0x329   : > { %6163 = vmatmul.mubr.f32.gmra.mxu1 %v4303_v32  ;;  %v3723_v22 = vadd.f32 %v3707_v25, %v3667_v2 }
 0x32a   : > { %v4115_v38 = vadd.f32 %v4099_v0, %v4059_v3 }
 0x32b   : > { %v3779_v16 = vadd.f32 %v3763_v54, %v3723_v22 }
 0x32c   : > { %v4171_v33 = vadd.f32 %v4155_v12, %v4115_v38 }
 0x32d   : > { %v3835_v17 = vadd.f32 %v3819_v35, %v3779_v16  ;;  %v5088_v16 = vld [vmem:[%s6810_s23 + $0x53] sm:$0xff] }
 0x32e   : > { %v4194_v26 = vadd.f32 %v9335_v58, %v4171_v33 }
 0x32f   : > { %v3891_v51 = vadd.f32 %v3875_v62, %v3835_v17 }
 0x330   : > { %v4210_v59 = vsub.f32 0.0, %v4194_v26 }
 0x331   : > { %v3948_v46 = vadd.f32 %v3932_v61, %v3891_v51 }
 0x332   : > { %v4240_v6 = vmul.f32 1.442695, %v4210_v59 }
 0x333   : > { %v6395_v27 = vpop.eup %6394  ;;  %v4004_v7 = vadd.f32 %v3988_v30, %v3948_v46 }
 0x334   : > { %v6397_v1 = vpop.eup %6396  ;;  %v4257_v41 = vadd.f32 1.0, %v6395_v27  ;;  %6398 = vpow2.f32 %v4240_v6 }
 0x335   : > { %v4304_v5 = vmul.f32 %v6397_v1, %v9504_v4  ;;  %v4060_v28 = vadd.f32 %v4044_v53, %v4004_v7 }
 0x336   : > { %6400 = vrcp.f32 %v4257_v41 }
 0x337   : > { %6165 = vmatprep.mubr.f32.mxu1 %v4304_v5  ;;  %v4116_v49 = vadd.f32 %v4100_v34, %v4060_v28  ;;  %v5089_v34 = vld [vmem:[%s6810_s23 + $0x63] sm:$0xff] }
 0x339   : > { %v4172_v23 = vadd.f32 %v4156_v37, %v4116_v49 }
 0x33b   : > { %v4195_v14 = vadd.f32 %v9335_v58, %v4172_v23  ;;  %v9590_v58 = vld [vmem:[%s9709_s6] ss:$0 sm:$0xff] }
 0x33d   : > { %v4211_v15 = vsub.f32 0.0, %v4195_v14 }
 0x33f   : > { %v4242_v45 = vmul.f32 1.442695, %v4211_v15 }
 0x341   : > { %v6399_v31 = vpop.eup %6398  ;;  %6402 = vpow2.f32 %v4242_v45 }
 0x342   : > { %v4258_v40 = vadd.f32 1.0, %v6399_v31 }
 0x343   : > { %v6401_v44 = vpop.eup %6400 }
 0x344   : > { %v4305_v24 = vmul.f32 %v6401_v44, %v9556_v43  ;;  %6404 = vrcp.f32 %v4258_v40 }
 0x346   : > { %6166 = vmatmul.mubr.f32.gmra.mxu1 %v4305_v24 }
 0x34e   : > { %v6403_v57 = vpop.eup %6402 }
 0x34f   : > { %v4259_v4 = vadd.f32 1.0, %v6403_v57 }
 0x351   : > { %v6405_v8 = vpop.eup %6404  ;;  %6406 = vrcp.f32 %v4259_v4 }
 0x352   : > { %v4306_v52 = vmul.f32 %v6405_v8, %v4194_v26  ;;  %v5087_v26 = vld [vmem:[%s6810_s23 + $0x4b] sm:$0xff] }
 0x354   : > { %6168 = vmatprep.mubr.f32.mxu1 %v4306_v52  ;;  %v5092_v52 = vld [vmem:[%s6810_s23 + $0x83] sm:$0xff] }
 0x35e   : > { %v6407_v42 = vpop.eup %6406 }
 0x35f   : > { %v4307_v20 = vmul.f32 %v6407_v42, %v4195_v14 }
 0x361   : > { %6169 = vmatmul.mubr.f32.gmra.mxu1 %v4307_v20 }
 0x36d   : > { %v6149_v29 = vpop.f32.mrf.mxu1 }
 0x36e   : > { %v4403_v63 = vadd.f32 %v6149_v29, %v9590_v58 }
 0x36f   : > { %v4397_v43 = vpop.f32.mrf.mxu1 }
 0x370   : > { %v4477_v11 = vsub.f32 0.0, %v4403_v63  ;;  %v4398_v50 = vadd.f32 %v9590_v58, %v4397_v43 }
 0x372   : > { %v4494_v39 = vmul.f32 1.442695, %v4477_v11  ;;  %v4476_v9 = vsub.f32 0.0, %v4398_v50 }
 0x374   : > { %6408 = vpow2.f32 %v4494_v39  ;;  %v4492_v55 = vmul.f32 1.442695, %v4476_v9 }
 0x376   : > { %6410 = vpow2.f32 %v4492_v55  ;;  %v6152_v0 = vpop.f32.mrf.mxu1 }
 0x377   : > { %v4413_v18 = vadd.f32 %v6152_v0, %v9590_v58 }
 0x378   : > { %v4407_v10 = vpop.f32.mrf.mxu1 }
 0x379   : > { %v4479_v21 = vsub.f32 0.0, %v4413_v18  ;;  %v4408_v48 = vadd.f32 %v9590_v58, %v4407_v10 }
 0x37b   : > { %v4498_v25 = vmul.f32 1.442695, %v4479_v21  ;;  %v4478_v13 = vsub.f32 0.0, %v4408_v48 }
 0x37d   : > { %6412 = vpow2.f32 %v4498_v25  ;;  %v4496_v32 = vmul.f32 1.442695, %v4478_v13 }
 0x37f   : > { %6414 = vpow2.f32 %v4496_v32 }
 0x381   : > { %v6409_v3 = vpop.eup %6408 }
 0x382   : > { %v4525_v12 = vadd.f32 1.0, %v6409_v3 }
 0x383   : > { %v6411_v2 = vpop.eup %6410 }
 0x384   : > { %6416 = vrcp.f32 %v4525_v12  ;;  %v4524_v54 = vadd.f32 1.0, %v6411_v2  ;;  %v5094_v2 = vld [vmem:[%s6810_s23 + $0x9b] sm:$0xff] }
 0x386   : > { %6418 = vrcp.f32 %v4524_v54 }
 0x38a   : > { %v6413_v38 = vpop.eup %6412 }
 0x38b   : > { %v4527_v22 = vadd.f32 1.0, %v6413_v38 }
 0x38c   : > { %v6415_v35 = vpop.eup %6414 }
 0x38d   : > { %6420 = vrcp.f32 %v4527_v22  ;;  %v4526_v36 = vadd.f32 1.0, %v6415_v35  ;;  %v5093_v22 = vld [vmem:[%s6810_s23 + $0x93] sm:$0xff] }
 0x38f   : > { %6422 = vrcp.f32 %v4526_v36 }
 0x391   : > { %v6417_v33 = vpop.eup %6416 }
 0x392   : > { %v4573_v62 = vmul.f32 %v6417_v33, %v4403_v63  ;;  %v5091_v63 = vld [vmem:[%s6810_s23 + $0x7b] sm:$0xff] }
 0x393   : > { %v6419_v19 = vpop.eup %6418 }
 0x394   : > { %v4608_v17 = vadd.f32 %v5088_v16, %v4573_v62  ;;  %v4572_v61 = vmul.f32 %v6419_v19, %v4398_v50 }
 0x396   : > { %v6155_v47 = vpop.f32.mrf.mxu1  ;;  %4624 = vst [vmem:[%s8165_s22 + $0x8] sm:$0xff] %v4608_v17  ;;  %v4607_v51 = vadd.f32 %v5087_v26, %v4572_v61 }
 0x397   : > { %v4423_v59 = vadd.f32 %v6155_v47, %v9590_v58 }
 0x398   : > { %v4417_v30 = vpop.f32.mrf.mxu1  ;;  %4623 = vst [vmem:[%s8165_s22] sm:$0xff] %v4607_v51 }
 0x399   : > { %v4481_v56 = vsub.f32 0.0, %v4423_v59  ;;  %v4418_v6 = vadd.f32 %v9590_v58, %v4417_v30 }
 0x39a   : > { %v6421_v27 = vpop.eup %6420 }
 0x39b   : > { %v4502_v46 = vmul.f32 1.442695, %v4481_v56  ;;  %v4480_v53 = vsub.f32 0.0, %v4418_v6  ;;  %v4575_v41 = vmul.f32 %v6421_v27, %v4413_v18 }
 0x39c   : > { %v6423_v7 = vpop.eup %6422 }
 0x39d   : > { %6424 = vpow2.f32 %v4502_v46  ;;  %v4500_v1 = vmul.f32 1.442695, %v4480_v53  ;;  %v4610_v5 = vadd.f32 %v5090_v60, %v4575_v41  ;;  %v4574_v28 = vmul.f32 %v6423_v7, %v4408_v48  ;;  %v5096_v53 = vld [vmem:[%s6810_s23 + $0xb3] sm:$0xff] }
 0x39f   : > { %6426 = vpow2.f32 %v4500_v1  ;;  %4626 = vst [vmem:[%s8165_s22 + $0x18] sm:$0xff] %v4610_v5  ;;  %v4609_v37 = vadd.f32 %v5089_v34, %v4574_v28  ;;  %v5095_v1 = vld [vmem:[%s6810_s23 + $0xab] sm:$0xff] }
 0x3a1   : > { %4625 = vst [vmem:[%s8165_s22 + $0x10] sm:$0xff] %v4609_v37 }
 0x3aa   : > { %v6425_v49 = vpop.eup %6424 }
 0x3ab   : > { %v4529_v23 = vadd.f32 1.0, %v6425_v49 }
 0x3ac   : > { %v6427_v14 = vpop.eup %6426 }
 0x3ad   : > { %6428 = vrcp.f32 %v4529_v23  ;;  %v4528_v15 = vadd.f32 1.0, %v6427_v14 }
 0x3af   : > { %6430 = vrcp.f32 %v4528_v15 }
 0x3b2   : > { %v6158_v45 = vpop.f32.mrf.mxu1 }
 0x3b3   : > { %v4433_v31 = vadd.f32 %v6158_v45, %v9590_v58 }
 0x3b4   : > { %v4427_v40 = vpop.f32.mrf.mxu1 }
 0x3b5   : > { %v4483_v44 = vsub.f32 0.0, %v4433_v31  ;;  %v4428_v24 = vadd.f32 %v9590_v58, %v4427_v40 }
 0x3b7   : > { %v4506_v57 = vmul.f32 1.442695, %v4483_v44  ;;  %v4482_v4 = vsub.f32 0.0, %v4428_v24 }
 0x3b9   : > { %6432 = vpow2.f32 %v4506_v57  ;;  %v4504_v42 = vmul.f32 1.442695, %v4482_v4  ;;  %v5098_v57 = vld [vmem:[%s6810_s23 + $0xcb] sm:$0xff] }
 0x3ba   : > { %v6429_v8 = vpop.eup %6428 }
 0x3bb   : > { %v4577_v20 = vmul.f32 %v6429_v8, %v4423_v59  ;;  %6434 = vpow2.f32 %v4504_v42  ;;  %v5097_v42 = vld [vmem:[%s6810_s23 + $0xc3] sm:$0xff] }
 0x3bc   : > { %v6431_v29 = vpop.eup %6430 }
 0x3bd   : > { %v4612_v43 = vadd.f32 %v5092_v52, %v4577_v20  ;;  %v4576_v11 = vmul.f32 %v6431_v29, %v4418_v6 }
 0x3bf   : > { %4628 = vst [vmem:[%s8165_s22 + $0x28] sm:$0xff] %v4612_v43  ;;  %v4611_v50 = vadd.f32 %v5091_v63, %v4576_v11 }
 0x3c1   : > { %4627 = vst [vmem:[%s8165_s22 + $0x20] sm:$0xff] %v4611_v50 }
 0x3c6   : > { %v6433_v39 = vpop.eup %6432 }
 0x3c7   : > { %v4531_v9 = vadd.f32 1.0, %v6433_v39 }
 0x3c8   : > { %v6435_v55 = vpop.eup %6434 }
 0x3c9   : > { %6436 = vrcp.f32 %v4531_v9  ;;  %v4530_v0 = vadd.f32 1.0, %v6435_v55 }
 0x3cb   : > { %6438 = vrcp.f32 %v4530_v0 }
 0x3ce   : > { %v6161_v18 = vpop.f32.mrf.mxu1 }
 0x3cf   : > { %v4443_v10 = vadd.f32 %v6161_v18, %v9590_v58 }
 0x3d0   : > { %v4437_v21 = vpop.f32.mrf.mxu1 }
 0x3d1   : > { %v4485_v48 = vsub.f32 0.0, %v4443_v10  ;;  %v4438_v25 = vadd.f32 %v9590_v58, %v4437_v21 }
 0x3d3   : > { %v4510_v13 = vmul.f32 1.442695, %v4485_v48  ;;  %v4484_v32 = vsub.f32 0.0, %v4438_v25 }
 0x3d5   : > { %6440 = vpow2.f32 %v4510_v13  ;;  %v4508_v3 = vmul.f32 1.442695, %v4484_v32  ;;  %v5100_v32 = vld [vmem:[%s6810_s23 + $0xe3] sm:$0xff] }
 0x3d6   : > { %v6437_v12 = vpop.eup %6436 }
 0x3d7   : > { %v4579_v54 = vmul.f32 %v6437_v12, %v4433_v31  ;;  %6442 = vpow2.f32 %v4508_v3 }
 0x3d8   : > { %v6439_v38 = vpop.eup %6438 }
 0x3d9   : > { %v4614_v35 = vadd.f32 %v5094_v2, %v4579_v54  ;;  %v4578_v36 = vmul.f32 %v6439_v38, %v4428_v24  ;;  %v5099_v2 = vld [vmem:[%s6810_s23 + $0xdb] sm:$0xff] }
 0x3db   : > { %4630 = vst [vmem:[%s8165_s22 + $0x38] sm:$0xff] %v4614_v35  ;;  %v4613_v33 = vadd.f32 %v5093_v22, %v4578_v36 }
 0x3dd   : > { %4629 = vst [vmem:[%s8165_s22 + $0x30] sm:$0xff] %v4613_v33 }
 0x3e2   : > { %v6441_v16 = vpop.eup %6440 }
 0x3e3   : > { %v4533_v62 = vadd.f32 1.0, %v6441_v16 }
 0x3e4   : > { %v6443_v19 = vpop.eup %6442 }
 0x3e5   : > { %6444 = vrcp.f32 %v4533_v62  ;;  %v4532_v26 = vadd.f32 1.0, %v6443_v19  ;;  %v5102_v62 = vld [vmem:[%s6810_s23 + $0xfb] sm:$0xff] }
 0x3e7   : > { %6446 = vrcp.f32 %v4532_v26 }
 0x3e9   : > { %v6164_v17 = vpop.f32.mrf.mxu1 }
 0x3ea   : > { %v4453_v61 = vadd.f32 %v6164_v17, %v9590_v58  ;;  %v5101_v17 = vld [vmem:[%s6810_s23 + $0xf3] sm:$0xff]  ;;  %s6595_s23 = smov [#allocation3]  }
 0x3eb   : > { %v4447_v47 = vpop.f32.mrf.mxu1  ;;  %s6502_s9 = sshll.u32 %s6595_s23, 4  ;;  %s6503_s9 = int_to_ptr.vmem [resolvable:$false] %s6502_s9 }
 0x3ec   : > { %v4487_v59 = vsub.f32 0.0, %v4453_v61  ;;  %v4448_v51 = vadd.f32 %v9590_v58, %v4447_v47  ;;  %s6504_s18 = scalar_lea.vmem %s6503_s9, 4096  ;;  %p6505_p5 = scmp.lt.s32.totalorder %s9646_s21, %s6503_s9 }
 0x3ed   : > { %p6506_p6 = scmp.lt.s32.totalorder %s6504_s18, %s6498_s12 }
 0x3ee   : > { %v4514_v30 = vmul.f32 1.442695, %v4487_v59  ;;  %v4486_v56 = vsub.f32 0.0, %v4448_v51 }
 0x3ef   : > { %p6507_p7 = por %p6506_p6, %p6505_p5 }
 0x3f0   : > { %6448 = vpow2.f32 %v4514_v30  ;;  %v4512_v6 = vmul.f32 1.442695, %v4486_v56 }
 0x3f1   : > { %p6508_p9 = pnand %p6507_p7, %p6501_p4 }
 0x3f2   : > { %v6445_v46 = vpop.eup %6444  ;;  %6450 = vpow2.f32 %v4512_v6 }
 0x3f3   : > { %v4581_v27 = vmul.f32 %v6445_v46, %v4443_v10 }
 0x3f4   : > { %v6447_v60 = vpop.eup %6446 }
 0x3f5   : > { %v4616_v41 = vadd.f32 %v5096_v53, %v4581_v27  ;;  %v4580_v7 = vmul.f32 %v6447_v60, %v4438_v25 }
 0x3f7   : > { %4632 = vst [vmem:[%s8165_s22 + $0x48] sm:$0xff] %v4616_v41  ;;  %v4615_v34 = vadd.f32 %v5095_v1, %v4580_v7 }
 0x3f9   : > { %4631 = vst [vmem:[%s8165_s22 + $0x40] sm:$0xff] %v4615_v34 }
 0x3fd   : > { %v6449_v5 = vpop.eup %6448 }
 0x3fe   : > { %v4535_v28 = vadd.f32 1.0, %v6449_v5 }
 0x3ff   : > { %v6451_v37 = vpop.eup %6450 }
 0x400   : > { %6452 = vrcp.f32 %v4535_v28  ;;  %v4534_v49 = vadd.f32 1.0, %v6451_v37 }
 0x402   : > { %6454 = vrcp.f32 %v4534_v49 }
 0x406   : > { %v6167_v23 = vpop.f32.mrf.mxu1 }
 0x407   : > { %v4463_v14 = vadd.f32 %v6167_v23, %v9590_v58 }
 0x408   : > { %v4457_v15 = vpop.f32.mrf.mxu1 }
 0x409   : > { %v4489_v45 = vsub.f32 0.0, %v4463_v14  ;;  %v4458_v31 = vadd.f32 %v9590_v58, %v4457_v15 }
 0x40b   : > { %v4518_v40 = vmul.f32 1.442695, %v4489_v45  ;;  %v4488_v44 = vsub.f32 0.0, %v4458_v31 }
 0x40d   : > { %v6453_v24 = vpop.eup %6452  ;;  %6456 = vpow2.f32 %v4518_v40  ;;  %v4516_v4 = vmul.f32 1.442695, %v4488_v44 }
 0x40e   : > { %v4583_v8 = vmul.f32 %v6453_v24, %v4453_v61 }
 0x40f   : > { %v6455_v52 = vpop.eup %6454  ;;  %6458 = vpow2.f32 %v4516_v4 }
 0x410   : > { %v4618_v20 = vadd.f32 %v5098_v57, %v4583_v8  ;;  %v4582_v29 = vmul.f32 %v6455_v52, %v4448_v51 }
 0x412   : > { %4634 = vst [vmem:[%s8165_s22 + $0x58] sm:$0xff] %v4618_v20  ;;  %v4617_v63 = vadd.f32 %v5097_v42, %v4582_v29 }
 0x414   : > { %4633 = vst [vmem:[%s8165_s22 + $0x50] sm:$0xff] %v4617_v63 }
 0x41a   : > { %v6457_v43 = vpop.eup %6456 }
 0x41b   : > { %v4537_v11 = vadd.f32 1.0, %v6457_v43 }
 0x41c   : > { %v6459_v50 = vpop.eup %6458 }
 0x41d   : > { %6460 = vrcp.f32 %v4537_v11  ;;  %v4536_v39 = vadd.f32 1.0, %v6459_v50 }
 0x41f   : > { %6462 = vrcp.f32 %v4536_v39 }
 0x421   : > { %v6170_v9 = vpop.f32.mrf.mxu1 }
 0x422   : > { %v4473_v55 = vadd.f32 %v6170_v9, %v9590_v58 }
 0x423   : > { %v4467_v0 = vpop.f32.mrf.mxu1 }
 0x424   : > { %v4491_v18 = vsub.f32 0.0, %v4473_v55  ;;  %v4468_v10 = vadd.f32 %v9590_v58, %v4467_v0 }
 0x426   : > { %v4522_v21 = vmul.f32 1.442695, %v4491_v18  ;;  %v4490_v48 = vsub.f32 0.0, %v4468_v10 }
 0x428   : > { %6464 = vpow2.f32 %v4522_v21  ;;  %v4520_v25 = vmul.f32 1.442695, %v4490_v48 }
 0x42a   : > { %v6461_v13 = vpop.eup %6460  ;;  %6466 = vpow2.f32 %v4520_v25 }
 0x42b   : > { %v4585_v3 = vmul.f32 %v6461_v13, %v4463_v14 }
 0x42c   : > { %v6463_v12 = vpop.eup %6462 }
 0x42d   : > { %v4620_v54 = vadd.f32 %v5100_v32, %v4585_v3  ;;  %v4584_v38 = vmul.f32 %v6463_v12, %v4458_v31 }
 0x42f   : > { %4636 = vst [vmem:[%s8165_s22 + $0x68] sm:$0xff] %v4620_v54  ;;  %v4619_v22 = vadd.f32 %v5099_v2, %v4584_v38 }
 0x431   : > { %4635 = vst [vmem:[%s8165_s22 + $0x60] sm:$0xff] %v4619_v22 }
 0x435   : > { %v6465_v58 = vpop.eup %6464 }
 0x436   : > { %v4539_v35 = vadd.f32 1.0, %v6465_v58 }
 0x437   : > { %v6467_v36 = vpop.eup %6466 }
 0x438   : > { %6468 = vrcp.f32 %v4539_v35  ;;  %v4538_v33 = vadd.f32 1.0, %v6467_v36 }
 0x43a   : > { %6470 = vrcp.f32 %v4538_v33 }
 0x445   : > { %v6469_v16 = vpop.eup %6468 }
 0x446   : > { %v4587_v19 = vmul.f32 %v6469_v16, %v4473_v55 }
 0x447   : > { %v6471_v26 = vpop.eup %6470 }
 0x448   : > { %v4622_v61 = vadd.f32 %v5102_v62, %v4587_v19  ;;  %v4586_v47 = vmul.f32 %v6471_v26, %v4468_v10 }
 0x44a   : > { %4638 = vst [vmem:[%s8165_s22 + $0x78] sm:$0xff] %v4622_v61  ;;  %v4621_v59 = vadd.f32 %v5101_v17, %v4586_v47 }
 0x44c   : > { %4637 = vst [vmem:[%s8165_s22 + $0x70] sm:$0xff] %v4621_v59 }
 0x44d   : > { %6511 = shalt.err (!%p6508_p9)
}
 0x44e   : > { %s6512_s22 = scalar_lea.hbm %s9644_s11, 2048  ;;  %s6516_s16 = scalar_lea.hbm %s9710_s7, 8192 }
 0x44f   : > { %p6513_p10 = scmp.ne.s32.totalorder %s9644_s11, %s6512_s22  ;;  %p6517_p13 = scmp.lt.s32.totalorder %s9644_s11, %s9710_s7 }
 0x450   : > { %p6518_p0 = scmp.lt.s32.totalorder %s6516_s16, %s6512_s22 }
 0x451   : > { %p6514_p11 = pnand %p6513_p10, %p6689_p3 }
 0x452   : > { %p6519_p1 = por %p6518_p0, %p6517_p13 }
 0x453   : > { %p6515_p12 = pneg %p6514_p11 }
 0x455   : > { %p6520_p2 = pnand %p6519_p1, %p6515_p12 }
 0x457   : > { %6523 = shalt.err (!%p6520_p2)
}
 0x458   : > { %s6596_s30 = smov 128   ;;  %s6597_s27 = smov 8  }
 0x459   : > { %6172 = dma.vmem_to_hbm [thread:$0]  (%p6689_p3), %s9646_s21, 2048, %s9644_s11, %s9652_s28, %s6596_s30, %s6596_s30, %s6597_s27  }
 0x45a PF: > { %p6178_p4 = scmp.ge.s32.totalorder %s6590_s8, 2  ;;  %s4671_s12 = sand.u32 1, %s6562_s24  }
 0x45b   : > { %s4672_s23 = scalar_lea.sflag [#allocation4], %s4671_s12 }
 0x45c   : > { %p6175_p5 = pnand %p6178_p4, %p6698_p8 }
 0x45e   : > { %p6176_p6 = pneg %p6175_p5 }
 0x460   : > { %6557 = dma.done.wait (%p6176_p6), %s4672_s23, 2048  }
 0x461   : > { %6559 = vsyncadd (%p6176_p6), %s4672_s23, 4294965248  ;;  %s20_s8 = sadd.s32 1, %s6590_s8   ;;  %s10235_s28 = sld [smem:[#allocation6_spill]] }
 0x462   : > { %p17_p7 = scmp.ge.s32.totalorder %s20_s8, 6   ;;  %s10236_s14 = sld [smem:[#allocation7_spill]] }
 0x463   : > { %s10237_s30 = sld [smem:[#allocation8_spill]]  ;;  %s10238_s24 = smov %s6566_s25 }
 0x464   : > { %s10239_s25 = smov %s6570_s26  ;;  %s10240_s26 = smov %s6707_s19 }
 0x465   : > { %s10241_s27 = smov %s6582_s29  ;;  %19 = sbr.rel (!%p17_p7) target bundleno = 5 (0x5), region = 132 }
 0x468   : > { %s10242_s29 = smov %s10236_s14 }
 0x46a   :  { %4677 = vsyncpa [#allocation4], 1 }
 0x46b   :  { %4679 = vsyncpa [#allocation4 + $0x1], 1 }

</bundles_post_ra>
